<compile_context>
chip_gen: v5e
topology: v5e:2x2
jax: 0.10.0
libtpu: 0.0.40
codegen_flags: <defaults>
</compile_context>

<pallas_src>
import functools

import jax
import jax.numpy as jnp
from jax.experimental import pallas as pl
from jax.experimental.pallas import tpu as pltpu

# ----------------------------- synthetic "Config" -----------------------------
VOCAB = 128          # vocab size (synthetic)
TYPE_VOCAB = 2       # token-type vocab
MAX_POS = 64         # max position embeddings
HIDDEN = 128         # Config.bert_output_logits / hidden size
N_LAYERS = 2         # encoder layers (small synthetic BERT)
N_HEADS = 4
HEAD_DIM = HIDDEN // N_HEADS
INTERMEDIATE = 256
BERT_LN_EPS = 1e-12  # HF BERT layer-norm eps
HEAD_LN_EPS = 1e-5   # torch.nn.LayerNorm default eps


# ------------------------------ in-kernel helpers ------------------------------
def _ln(x, g, b, eps):
    # LayerNorm over the last (lane) axis, f32 math.
    mu = jnp.mean(x, axis=-1, keepdims=True)
    xc = x - mu
    var = jnp.mean(xc * xc, axis=-1, keepdims=True)
    return xc * jax.lax.rsqrt(var + eps) * g + b


def _gelu(x):
    # TODO(synk): HF BertModel default act is exact erf-GELU; tanh approximation is
    # used here to keep the lowering on the EUP tanh path.
    c = 0.7978845608028654  # sqrt(2/pi)
    return 0.5 * x * (1.0 + jnp.tanh(c * (x + 0.044715 * x * x * x)))


def _silu(x):
    return x * jax.nn.sigmoid(x)


def _mm(x_f32, w_bf16):
    # bf16 MXU operands, f32 accumulation.
    return jnp.dot(x_f32.astype(jnp.bfloat16), w_bf16,
                   preferred_element_type=jnp.float32)


# --------------------------- fused encoder layer kernel -------------------------
def _encoder_layer_kernel(h_ref, mask_ref,
                          wqkv_ref, bqkv_ref, wo_ref, bo_ref,
                          ln1_g_ref, ln1_b_ref,
                          wi_ref, bi_ref, wout_ref, bout_ref,
                          ln2_g_ref, ln2_b_ref,
                          o_ref,
                          qkv_s, ctx_s,
                          *, n_heads, head_dim, scale):
    hidden = n_heads * head_dim
    h = h_ref[...]                       # (S, H) f32, one batch element
    m = mask_ref[0]                      # (1, S) additive key bias (broadcast in-kernel)

    # ---- fused QKV projection: one MXU pass with N = 3H ----
    qkv_s[...] = _mm(h, wqkv_ref[...]) + bqkv_ref[...]

    # ---- per-head attention; static slices of VMEM scratch ----
    for hd in range(n_heads):
        q = qkv_s[:, pl.ds(hd * head_dim, head_dim)].astype(jnp.bfloat16)
        k = qkv_s[:, pl.ds(hidden + hd * head_dim, head_dim)].astype(jnp.bfloat16)
        v = qkv_s[:, pl.ds(2 * hidden + hd * head_dim, head_dim)].astype(jnp.bfloat16)
        # scores: (S, Dh) x (S, Dh)^T -> (S, S), f32 accumulation
        s = jax.lax.dot_general(q, k, (((1,), (1,)), ((), ())),
                                preferred_element_type=jnp.float32)
        s = s * scale + m
        s = s - jnp.max(s, axis=-1, keepdims=True)
        p = jnp.exp(s)
        p = p * pl.reciprocal(jnp.sum(p, axis=-1, keepdims=True), approx=True)
        ctx_s[:, pl.ds(hd * head_dim, head_dim)] = jnp.dot(
            p.astype(jnp.bfloat16), v, preferred_element_type=jnp.float32)

    # ---- output projection + residual + LN1 (residual folded into LN) ----
    attn_out = _mm(ctx_s[...], wo_ref[...]) + bo_ref[...]
    h1 = _ln(h + attn_out, ln1_g_ref[...], ln1_b_ref[...], BERT_LN_EPS)

    # ---- FFN (gelu) + residual + LN2 ----
    inter = _gelu(_mm(h1, wi_ref[...]) + bi_ref[...])
    ffn = _mm(inter, wout_ref[...]) + bout_ref[...]
    o_ref[...] = _ln(h1 + ffn, ln2_g_ref[...], ln2_b_ref[...], BERT_LN_EPS)


def encoder_layer(h2d, add_mask, layer, batch, seq):
    rows, hidden = h2d.shape
    kernel = functools.partial(_encoder_layer_kernel, n_heads=N_HEADS,
                               head_dim=HEAD_DIM, scale=1.0 / (HEAD_DIM ** 0.5))

    def _wspec(shape):
        # weights / biases: same (only) block for every grid step
        return pl.BlockSpec(shape, lambda b: (0,) * len(shape))

    return pl.pallas_call(
        kernel,
        out_shape=jax.ShapeDtypeStruct((rows, hidden), jnp.float32),
        grid_spec=pltpu.PrefetchScalarGridSpec(
            num_scalar_prefetch=0,
            grid=(batch,),
            in_specs=[
                pl.BlockSpec((seq, hidden), lambda b: (b, 0)),     # h   (per-batch slab)
                pl.BlockSpec((1, 1, seq), lambda b: (b, 0, 0)),    # additive mask (B,1,S)
                _wspec((hidden, 3 * hidden)),                      # wqkv (bf16)
                _wspec((1, 3 * hidden)),                           # bqkv
                _wspec((hidden, hidden)),                          # wo   (bf16)
                _wspec((1, hidden)),                               # bo
                _wspec((1, hidden)), _wspec((1, hidden)),          # ln1 g/b
                _wspec((hidden, INTERMEDIATE)),                    # wi   (bf16)
                _wspec((1, INTERMEDIATE)),                         # bi
                _wspec((INTERMEDIATE, hidden)),                    # wout (bf16)
                _wspec((1, hidden)),                               # bout
                _wspec((1, hidden)), _wspec((1, hidden)),          # ln2 g/b
            ],
            out_specs=pl.BlockSpec((seq, hidden), lambda b: (b, 0)),
            scratch_shapes=[pltpu.VMEM((seq, 3 * hidden), jnp.float32),
                            pltpu.VMEM((seq, hidden), jnp.float32)],
        ),
        compiler_params=pltpu.CompilerParams(
            dimension_semantics=("parallel",)),   # lets v7x split batches across its 2 TCs
    )(h2d, add_mask, layer["wqkv"], layer["bqkv"], layer["wo"], layer["bo"],
      layer["ln1_g"], layer["ln1_b"], layer["wi"], layer["bi"],
      layer["wout"], layer["bout"], layer["ln2_g"], layer["ln2_b"])


# ------------------------------ small standalone kernels ------------------------
def _layernorm_kernel(x_ref, g_ref, b_ref, o_ref, *, eps):
    o_ref[...] = _ln(x_ref[...], g_ref[...], b_ref[...], eps)


def layernorm(x, g, b, eps):
    return pl.pallas_call(
        functools.partial(_layernorm_kernel, eps=eps),
        out_shape=jax.ShapeDtypeStruct(x.shape, jnp.float32),
    )(x, g, b)


def _pooler_head_kernel(cls_ref, pw_ref, pb_ref, g_ref, b_ref,
                        w1_ref, b1_ref, w2_ref, b2_ref, w3_ref, b3_ref, o_ref):
    # pooler: tanh(cls @ Wp + bp)
    x = jnp.tanh(jnp.dot(cls_ref[...], pw_ref[...],
                         preferred_element_type=jnp.float32) + pb_ref[...])
    # regression head: LN -> Linear+SiLU -> Linear+SiLU -> Linear   (dropout = identity)
    x = _ln(x, g_ref[...], b_ref[...], HEAD_LN_EPS)
    x = _silu(jnp.dot(x, w1_ref[...], preferred_element_type=jnp.float32) + b1_ref[...])
    x = _silu(jnp.dot(x, w2_ref[...], preferred_element_type=jnp.float32) + b2_ref[...])
    o_ref[...] = jnp.dot(x, w3_ref[...], preferred_element_type=jnp.float32) + b3_ref[...]


def pooler_head(cls, p):
    batch = cls.shape[0]
    return pl.pallas_call(
        _pooler_head_kernel,
        out_shape=jax.ShapeDtypeStruct((batch, 1), jnp.float32),
    )(cls, p["pool_w"], p["pool_b"], p["head_ln_g"], p["head_ln_b"],
      p["d1_w"], p["d1_b"], p["d2_w"], p["d2_b"], p["d3_w"], p["d3_b"])


# ------------------------------ parameter setup --------------------------------
def init_params(key):
    std = 0.02

    def nrm(k, shape, dtype=jnp.bfloat16):
        return (std * jax.random.normal(k, shape, dtype=jnp.float32)).astype(dtype)

    keys = iter(jax.random.split(key, 64))
    p = {}
    p["word_emb"] = nrm(next(keys), (VOCAB, HIDDEN), jnp.float32)
    p["pos_emb"] = nrm(next(keys), (MAX_POS, HIDDEN), jnp.float32)
    p["type_emb"] = nrm(next(keys), (TYPE_VOCAB, HIDDEN), jnp.float32)
    p["emb_ln_g"] = jnp.ones((1, HIDDEN), jnp.float32)
    p["emb_ln_b"] = jnp.zeros((1, HIDDEN), jnp.float32)

    layers = []
    for _ in range(N_LAYERS):
        l = {
            # fused QKV weight [wq | wk | wv] -> (H, 3H); bf16 MXU operands
            "wqkv": nrm(next(keys), (HIDDEN, 3 * HIDDEN)),
            "bqkv": jnp.zeros((1, 3 * HIDDEN), jnp.float32),
            "wo": nrm(next(keys), (HIDDEN, HIDDEN)),
            "bo": jnp.zeros((1, HIDDEN), jnp.float32),
            "ln1_g": jnp.ones((1, HIDDEN), jnp.float32),
            "ln1_b": jnp.zeros((1, HIDDEN), jnp.float32),
            "wi": nrm(next(keys), (HIDDEN, INTERMEDIATE)),
            "bi": jnp.zeros((1, INTERMEDIATE), jnp.float32),
            "wout": nrm(next(keys), (INTERMEDIATE, HIDDEN)),
            "bout": jnp.zeros((1, HIDDEN), jnp.float32),
            "ln2_g": jnp.ones((1, HIDDEN), jnp.float32),
            "ln2_b": jnp.zeros((1, HIDDEN), jnp.float32),
        }
        layers.append(l)
    p["layers"] = layers

    # pooler + regression head (tiny; kept f32)
    p["pool_w"] = nrm(next(keys), (HIDDEN, HIDDEN), jnp.float32)
    p["pool_b"] = jnp.zeros((1, HIDDEN), jnp.float32)
    p["head_ln_g"] = jnp.ones((1, HIDDEN), jnp.float32)
    p["head_ln_b"] = jnp.zeros((1, HIDDEN), jnp.float32)
    p["d1_w"] = nrm(next(keys), (HIDDEN, 128), jnp.float32)
    p["d1_b"] = jnp.zeros((1, 128), jnp.float32)
    p["d2_w"] = nrm(next(keys), (128, 64), jnp.float32)
    p["d2_b"] = jnp.zeros((1, 64), jnp.float32)
    p["d3_w"] = nrm(next(keys), (64, 1), jnp.float32)
    p["d3_b"] = jnp.zeros((1, 1), jnp.float32)
    return p


# ------------------------------ model forward ----------------------------------
def bert_model_forward(params, input_ids, token_type_ids, attention_mask):
    B, S = input_ids.shape
    rows = B * S

    # ---- embeddings (gather = plain-JAX glue) + LN kernel ----
    positions = jnp.arange(S, dtype=jnp.int32)
    h = (jnp.take(params["word_emb"], input_ids, axis=0)
         + jnp.take(params["pos_emb"], positions, axis=0)[None, :, :]
         + jnp.take(params["type_emb"], token_type_ids, axis=0))
    h2d = layernorm(h.reshape(rows, HIDDEN), params["emb_ln_g"], params["emb_ln_b"],
                    BERT_LN_EPS)
    # dropout: identity (eval)

    # additive key-position bias, kept tiny at (B, 1, S); broadcast happens in-kernel
    add_mask = ((1.0 - attention_mask.astype(jnp.float32)) * -10000.0)[:, None, :]

    # ---- fused encoder layers (one pallas_call per layer) ----
    for l in params["layers"]:
        h2d = encoder_layer(h2d, add_mask, l, B, S)

    # ---- pooler (tanh Linear on CLS) + regression head, fused in one kernel ----
    cls = h2d.reshape(B, S, HIDDEN)[:, 0, :]          # (B, H)
    preds = pooler_head(cls, params)                  # (B, 1)
    return jnp.squeeze(preds, axis=-1)                # (B,)


# ----------------------------------- main ---------------------------------------
if __name__ == "__main__":
    B, S = 2, 8
    key = jax.random.PRNGKey(0)
    k_ids, k_types = jax.random.split(key, 2)

    input_ids = jax.random.randint(k_ids, (B, S), 0, VOCAB, dtype=jnp.int32)
    token_type_ids = jax.random.randint(k_types, (B, S), 0, TYPE_VOCAB, dtype=jnp.int32)
    attention_mask = jnp.ones((B, S), dtype=jnp.int32).at[:, S - 2:].set(0)  # pad last 2 tokens

    params = init_params(jax.random.PRNGKey(42))

    preds = jax.jit(bert_model_forward)(params, input_ids, token_type_ids, attention_mask)
    preds = jax.block_until_ready(preds)
    assert preds.shape == (B,)
    print("KERNEL_OK")
</pallas_src>

<mosaic_0001>
module attributes {stable_mosaic.version = 11 : i64} {
  func.func @_layernorm_kernel(%arg0: memref<16x128xf32, #tpu.memory_space<vmem>>, %arg1: memref<1x128xf32, #tpu.memory_space<vmem>>, %arg2: memref<1x128xf32, #tpu.memory_space<vmem>>, %arg3: memref<16x128xf32, #tpu.memory_space<vmem>>) attributes {dimension_semantics = [], scalar_prefetch = 0 : i64, scratch_operands = 0 : i64, tpu.core_type = #tpu.core_type<tc>} {
    %c0 = arith.constant 0 : index
    %c0_0 = arith.constant 0 : index
    %0 = vector.load %arg0[%c0, %c0_0] : memref<16x128xf32, #tpu.memory_space<vmem>>, vector<16x128xf32>
    %c0_1 = arith.constant 0 : index
    %c0_2 = arith.constant 0 : index
    %1 = vector.load %arg1[%c0_1, %c0_2] : memref<1x128xf32, #tpu.memory_space<vmem>>, vector<1x128xf32>
    %c0_3 = arith.constant 0 : index
    %c0_4 = arith.constant 0 : index
    %2 = vector.load %arg2[%c0_3, %c0_4] : memref<1x128xf32, #tpu.memory_space<vmem>>, vector<1x128xf32>
    %cst = arith.constant dense<0.000000e+00> : vector<16xf32>
    %3 = vector.multi_reduction <add>, %0, %cst [1] : vector<16x128xf32> to vector<16xf32>
    %4 = vector.shape_cast %3 : vector<16xf32> to vector<16x1xf32>
    %cst_5 = arith.constant 1.280000e+02 : f32
    %5 = vector.broadcast %cst_5 : f32 to vector<16x1xf32>
    %6 = arith.divf %4, %5 : vector<16x1xf32>
    %7 = vector.broadcast %6 : vector<16x1xf32> to vector<16x128xf32>
    %8 = arith.subf %0, %7 : vector<16x128xf32>
    %9 = arith.mulf %8, %8 : vector<16x128xf32>
    %cst_6 = arith.constant dense<0.000000e+00> : vector<16xf32>
    %10 = vector.multi_reduction <add>, %9, %cst_6 [1] : vector<16x128xf32> to vector<16xf32>
    %11 = vector.shape_cast %10 : vector<16xf32> to vector<16x1xf32>
    %cst_7 = arith.constant 1.280000e+02 : f32
    %12 = vector.broadcast %cst_7 : f32 to vector<16x1xf32>
    %13 = arith.divf %11, %12 : vector<16x1xf32>
    %cst_8 = arith.constant 9.99999996E-13 : f32
    %14 = vector.broadcast %cst_8 : f32 to vector<16x1xf32>
    %15 = arith.addf %13, %14 : vector<16x1xf32>
    %16 = math.rsqrt %15 : vector<16x1xf32>
    %17 = vector.broadcast %16 : vector<16x1xf32> to vector<16x128xf32>
    %18 = arith.mulf %8, %17 : vector<16x128xf32>
    %19 = vector.broadcast %1 : vector<1x128xf32> to vector<16x128xf32>
    %20 = arith.mulf %18, %19 : vector<16x128xf32>
    %21 = vector.broadcast %2 : vector<1x128xf32> to vector<16x128xf32>
    %22 = arith.addf %20, %21 : vector<16x128xf32>
    %c0_9 = arith.constant 0 : index
    %c0_10 = arith.constant 0 : index
    %23 = vector.load %arg3[%c0_9, %c0_10] : memref<16x128xf32, #tpu.memory_space<vmem>>, vector<16x128xf32>
    tpu.vector_store %arg3[%c0_9, %c0_10], %22 {strides = array<i32>} : memref<16x128xf32, #tpu.memory_space<vmem>>, vector<16x128xf32>,
    return
  }
}

module attributes {stable_mosaic.version = 11 : i64} {
  func.func @_encoder_layer_kernel(%arg0: i32, %arg1: memref<8x128xf32, #tpu.memory_space<vmem>>, %arg2: memref<1x1x8xf32, #tpu.memory_space<vmem>>, %arg3: memref<128x384xbf16, #tpu.memory_space<vmem>>, %arg4: memref<1x384xf32, #tpu.memory_space<vmem>>, %arg5: memref<128x128xbf16, #tpu.memory_space<vmem>>, %arg6: memref<1x128xf32, #tpu.memory_space<vmem>>, %arg7: memref<1x128xf32, #tpu.memory_space<vmem>>, %arg8: memref<1x128xf32, #tpu.memory_space<vmem>>, %arg9: memref<128x256xbf16, #tpu.memory_space<vmem>>, %arg10: memref<1x256xf32, #tpu.memory_space<vmem>>, %arg11: memref<256x128xbf16, #tpu.memory_space<vmem>>, %arg12: memref<1x128xf32, #tpu.memory_space<vmem>>, %arg13: memref<1x128xf32, #tpu.memory_space<vmem>>, %arg14: memref<1x128xf32, #tpu.memory_space<vmem>>, %arg15: memref<8x128xf32, #tpu.memory_space<vmem>>, %arg16: memref<8x384xf32, #tpu.memory_space<vmem>>, %arg17: memref<8x128xf32, #tpu.memory_space<vmem>>) attributes {dimension_semantics = [#tpu.dimension_semantics<parallel>], iteration_bounds = array<i64: 2>, scalar_prefetch = 0 : i64, scratch_operands = 2 : i64, tpu.core_type = #tpu.core_type<tc>, window_params = [{transform_indices = @transform_0, window_bounds = array<i64: 8, 128>}, {transform_indices = @transform_1, window_bounds = array<i64: 1, 1, 8>}, {pipeline_mode = #tpu.pipeline_mode<synchronous>, transform_indices = @transform_2, window_bounds = array<i64: 128, 384>}, {pipeline_mode = #tpu.pipeline_mode<synchronous>, transform_indices = @transform_3, window_bounds = array<i64: 1, 384>}, {pipeline_mode = #tpu.pipeline_mode<synchronous>, transform_indices = @transform_4, window_bounds = array<i64: 128, 128>}, {pipeline_mode = #tpu.pipeline_mode<synchronous>, transform_indices = @transform_5, window_bounds = array<i64: 1, 128>}, {pipeline_mode = #tpu.pipeline_mode<synchronous>, transform_indices = @transform_6, window_bounds = array<i64: 1, 128>}, {pipeline_mode = #tpu.pipeline_mode<synchronous>, transform_indices = @transform_7, window_bounds = array<i64: 1, 128>}, {pipeline_mode = #tpu.pipeline_mode<synchronous>, transform_indices = @transform_8, window_bounds = array<i64: 128, 256>}, {pipeline_mode = #tpu.pipeline_mode<synchronous>, transform_indices = @transform_9, window_bounds = array<i64: 1, 256>}, {pipeline_mode = #tpu.pipeline_mode<synchronous>, transform_indices = @transform_10, window_bounds = array<i64: 256, 128>}, {pipeline_mode = #tpu.pipeline_mode<synchronous>, transform_indices = @transform_11, window_bounds = array<i64: 1, 128>}, {pipeline_mode = #tpu.pipeline_mode<synchronous>, transform_indices = @transform_12, window_bounds = array<i64: 1, 128>}, {pipeline_mode = #tpu.pipeline_mode<synchronous>, transform_indices = @transform_13, window_bounds = array<i64: 1, 128>}, {transform_indices = @transform_14, window_bounds = array<i64: 8, 128>}]} {
    %c0 = arith.constant 0 : index
    %c0_0 = arith.constant 0 : index
    %0 = vector.load %arg1[%c0, %c0_0] : memref<8x128xf32, #tpu.memory_space<vmem>>, vector<8x128xf32>
    %c0_1 = arith.constant 0 : index
    %c0_2 = arith.constant 0 : index
    %c0_3 = arith.constant 0 : index
    %1 = vector.load %arg2[%c0_1, %c0_2, %c0_3] : memref<1x1x8xf32, #tpu.memory_space<vmem>>, vector<1x1x8xf32>
    %2 = vector.shape_cast %1 : vector<1x1x8xf32> to vector<1x8xf32>
    %c0_4 = arith.constant 0 : index
    %c0_5 = arith.constant 0 : index
    %3 = vector.load %arg3[%c0_4, %c0_5] : memref<128x384xbf16, #tpu.memory_space<vmem>>, vector<128x384xbf16>
    %4 = arith.truncf %0 : vector<8x128xf32> to vector<8x128xbf16>
    %cst = arith.constant dense<0.000000e+00> : vector<8x384xf32>
    %5 = tpu.matmul %4, %3, %cst {dimension_numbers = #tpu.dot_dimension_numbers<[1], [0], [0], [1], [0, 0, 1, 1], [], []>} : vector<8x128xbf16>, vector<128x384xbf16>, vector<8x384xf32> -> vector<8x384xf32>
    %c0_6 = arith.constant 0 : index
    %c0_7 = arith.constant 0 : index
    %6 = vector.load %arg4[%c0_6, %c0_7] : memref<1x384xf32, #tpu.memory_space<vmem>>, vector<1x384xf32>
    %7 = vector.broadcast %6 : vector<1x384xf32> to vector<8x384xf32>
    %8 = arith.addf %5, %7 : vector<8x384xf32>
    %c0_8 = arith.constant 0 : index
    %c0_9 = arith.constant 0 : index
    %9 = vector.load %arg16[%c0_8, %c0_9] : memref<8x384xf32, #tpu.memory_space<vmem>>, vector<8x384xf32>
    tpu.vector_store %arg16[%c0_8, %c0_9], %8 {strides = array<i32>} : memref<8x384xf32, #tpu.memory_space<vmem>>, vector<8x384xf32>,
    %c0_10 = arith.constant 0 : index
    %c0_11 = arith.constant 0 : index
    %10 = vector.load %arg16[%c0_10, %c0_11] : memref<8x384xf32, #tpu.memory_space<vmem>>, vector<8x32xf32>
    %11 = arith.truncf %10 : vector<8x32xf32> to vector<8x32xbf16>
    %c0_12 = arith.constant 0 : index
    %c128 = arith.constant 128 : index
    %12 = vector.load %arg16[%c0_12, %c128] : memref<8x384xf32, #tpu.memory_space<vmem>>, vector<8x32xf32>
    %13 = arith.truncf %12 : vector<8x32xf32> to vector<8x32xbf16>
    %c0_13 = arith.constant 0 : index
    %c256 = arith.constant 256 : index
    %14 = vector.load %arg16[%c0_13, %c256] : memref<8x384xf32, #tpu.memory_space<vmem>>, vector<8x32xf32>
    %15 = arith.truncf %14 : vector<8x32xf32> to vector<8x32xbf16>
    %cst_14 = arith.constant dense<0.000000e+00> : vector<8x8xf32>
    %16 = tpu.matmul %11, %13, %cst_14 {dimension_numbers = #tpu.dot_dimension_numbers<[1], [1], [0], [0], [0, 0, 1, 0], [], []>} : vector<8x32xbf16>, vector<8x32xbf16>, vector<8x8xf32> -> vector<8x8xf32>
    %cst_15 = arith.constant 0.176776692 : f32
    %17 = vector.broadcast %cst_15 : f32 to vector<8x8xf32>
    %18 = arith.mulf %16, %17 : vector<8x8xf32>
    %19 = vector.broadcast %2 : vector<1x8xf32> to vector<8x8xf32>
    %20 = arith.addf %18, %19 : vector<8x8xf32>
    %cst_16 = arith.constant dense<0xFF800000> : vector<8xf32>
    %21 = vector.multi_reduction <maximumf>, %20, %cst_16 [1] : vector<8x8xf32> to vector<8xf32>
    %22 = vector.shape_cast %21 : vector<8xf32> to vector<8x1xf32>
    %23 = vector.broadcast %22 : vector<8x1xf32> to vector<8x8xf32>
    %24 = arith.subf %20, %23 : vector<8x8xf32>
    %25 = math.exp %24 : vector<8x8xf32>
    %cst_17 = arith.constant dense<0.000000e+00> : vector<8xf32>
    %26 = vector.multi_reduction <add>, %25, %cst_17 [1] : vector<8x8xf32> to vector<8xf32>
    %27 = vector.shape_cast %26 : vector<8xf32> to vector<8x1xf32>
    %28 = tpu.reciprocal %27 {approx = true} : vector<8x1xf32> -> vector<8x1xf32>
    %29 = vector.broadcast %28 : vector<8x1xf32> to vector<8x8xf32>
    %30 = arith.mulf %25, %29 : vector<8x8xf32>
    %31 = arith.truncf %30 : vector<8x8xf32> to vector<8x8xbf16>
    %cst_18 = arith.constant dense<0.000000e+00> : vector<8x32xf32>
    %32 = tpu.matmul %31, %15, %cst_18 {dimension_numbers = #tpu.dot_dimension_numbers<[1], [0], [0], [1], [0, 0, 1, 1], [], []>} : vector<8x8xbf16>, vector<8x32xbf16>, vector<8x32xf32> -> vector<8x32xf32>
    %c0_19 = arith.constant 0 : index
    %c0_20 = arith.constant 0 : index
    %33 = vector.load %arg17[%c0_19, %c0_20] : memref<8x128xf32, #tpu.memory_space<vmem>>, vector<8x32xf32>
    tpu.vector_store %arg17[%c0_19, %c0_20], %32 {strides = array<i32>} : memref<8x128xf32, #tpu.memory_space<vmem>>, vector<8x32xf32>,
    %c0_21 = arith.constant 0 : index
    %c32 = arith.constant 32 : index
    %34 = vector.load %arg16[%c0_21, %c32] : memref<8x384xf32, #tpu.memory_space<vmem>>, vector<8x32xf32>
    %35 = arith.truncf %34 : vector<8x32xf32> to vector<8x32xbf16>
    %c0_22 = arith.constant 0 : index
    %c160 = arith.constant 160 : index
    %36 = vector.load %arg16[%c0_22, %c160] : memref<8x384xf32, #tpu.memory_space<vmem>>, vector<8x32xf32>
    %37 = arith.truncf %36 : vector<8x32xf32> to vector<8x32xbf16>
    %c0_23 = arith.constant 0 : index
    %c288 = arith.constant 288 : index
    %38 = vector.load %arg16[%c0_23, %c288] : memref<8x384xf32, #tpu.memory_space<vmem>>, vector<8x32xf32>
    %39 = arith.truncf %38 : vector<8x32xf32> to vector<8x32xbf16>
    %cst_24 = arith.constant dense<0.000000e+00> : vector<8x8xf32>
    %40 = tpu.matmul %35, %37, %cst_24 {dimension_numbers = #tpu.dot_dimension_numbers<[1], [1], [0], [0], [0, 0, 1, 0], [], []>} : vector<8x32xbf16>, vector<8x32xbf16>, vector<8x8xf32> -> vector<8x8xf32>
    %cst_25 = arith.constant 0.176776692 : f32
    %41 = vector.broadcast %cst_25 : f32 to vector<8x8xf32>
    %42 = arith.mulf %40, %41 : vector<8x8xf32>
    %43 = vector.broadcast %2 : vector<1x8xf32> to vector<8x8xf32>
    %44 = arith.addf %42, %43 : vector<8x8xf32>
    %cst_26 = arith.constant dense<0xFF800000> : vector<8xf32>
    %45 = vector.multi_reduction <maximumf>, %44, %cst_26 [1] : vector<8x8xf32> to vector<8xf32>
    %46 = vector.shape_cast %45 : vector<8xf32> to vector<8x1xf32>
    %47 = vector.broadcast %46 : vector<8x1xf32> to vector<8x8xf32>
    %48 = arith.subf %44, %47 : vector<8x8xf32>
    %49 = math.exp %48 : vector<8x8xf32>
    %cst_27 = arith.constant dense<0.000000e+00> : vector<8xf32>
    %50 = vector.multi_reduction <add>, %49, %cst_27 [1] : vector<8x8xf32> to vector<8xf32>
    %51 = vector.shape_cast %50 : vector<8xf32> to vector<8x1xf32>
    %52 = tpu.reciprocal %51 {approx = true} : vector<8x1xf32> -> vector<8x1xf32>
    %53 = vector.broadcast %52 : vector<8x1xf32> to vector<8x8xf32>
    %54 = arith.mulf %49, %53 : vector<8x8xf32>
    %55 = arith.truncf %54 : vector<8x8xf32> to vector<8x8xbf16>
    %cst_28 = arith.constant dense<0.000000e+00> : vector<8x32xf32>
    %56 = tpu.matmul %55, %39, %cst_28 {dimension_numbers = #tpu.dot_dimension_numbers<[1], [0], [0], [1], [0, 0, 1, 1], [], []>} : vector<8x8xbf16>, vector<8x32xbf16>, vector<8x32xf32> -> vector<8x32xf32>
    %c0_29 = arith.constant 0 : index
    %c32_30 = arith.constant 32 : index
    %57 = vector.load %arg17[%c0_29, %c32_30] : memref<8x128xf32, #tpu.memory_space<vmem>>, vector<8x32xf32>
    tpu.vector_store %arg17[%c0_29, %c32_30], %56 {strides = array<i32>} : memref<8x128xf32, #tpu.memory_space<vmem>>, vector<8x32xf32>,
    %c0_31 = arith.constant 0 : index
    %c64 = arith.constant 64 : index
    %58 = vector.load %arg16[%c0_31, %c64] : memref<8x384xf32, #tpu.memory_space<vmem>>, vector<8x32xf32>
    %59 = arith.truncf %58 : vector<8x32xf32> to vector<8x32xbf16>
    %c0_32 = arith.constant 0 : index
    %c192 = arith.constant 192 : index
    %60 = vector.load %arg16[%c0_32, %c192] : memref<8x384xf32, #tpu.memory_space<vmem>>, vector<8x32xf32>
    %61 = arith.truncf %60 : vector<8x32xf32> to vector<8x32xbf16>
    %c0_33 = arith.constant 0 : index
    %c320 = arith.constant 320 : index
    %62 = vector.load %arg16[%c0_33, %c320] : memref<8x384xf32, #tpu.memory_space<vmem>>, vector<8x32xf32>
    %63 = arith.truncf %62 : vector<8x32xf32> to vector<8x32xbf16>
    %cst_34 = arith.constant dense<0.000000e+00> : vector<8x8xf32>
    %64 = tpu.matmul %59, %61, %cst_34 {dimension_numbers = #tpu.dot_dimension_numbers<[1], [1], [0], [0], [0, 0, 1, 0], [], []>} : vector<8x32xbf16>, vector<8x32xbf16>, vector<8x8xf32> -> vector<8x8xf32>
    %cst_35 = arith.constant 0.176776692 : f32
    %65 = vector.broadcast %cst_35 : f32 to vector<8x8xf32>
    %66 = arith.mulf %64, %65 : vector<8x8xf32>
    %67 = vector.broadcast %2 : vector<1x8xf32> to vector<8x8xf32>
    %68 = arith.addf %66, %67 : vector<8x8xf32>
    %cst_36 = arith.constant dense<0xFF800000> : vector<8xf32>
    %69 = vector.multi_reduction <maximumf>, %68, %cst_36 [1] : vector<8x8xf32> to vector<8xf32>
    %70 = vector.shape_cast %69 : vector<8xf32> to vector<8x1xf32>
    %71 = vector.broadcast %70 : vector<8x1xf32> to vector<8x8xf32>
    %72 = arith.subf %68, %71 : vector<8x8xf32>
    %73 = math.exp %72 : vector<8x8xf32>
    %cst_37 = arith.constant dense<0.000000e+00> : vector<8xf32>
    %74 = vector.multi_reduction <add>, %73, %cst_37 [1] : vector<8x8xf32> to vector<8xf32>
    %75 = vector.shape_cast %74 : vector<8xf32> to vector<8x1xf32>
    %76 = tpu.reciprocal %75 {approx = true} : vector<8x1xf32> -> vector<8x1xf32>
    %77 = vector.broadcast %76 : vector<8x1xf32> to vector<8x8xf32>
    %78 = arith.mulf %73, %77 : vector<8x8xf32>
    %79 = arith.truncf %78 : vector<8x8xf32> to vector<8x8xbf16>
    %cst_38 = arith.constant dense<0.000000e+00> : vector<8x32xf32>
    %80 = tpu.matmul %79, %63, %cst_38 {dimension_numbers = #tpu.dot_dimension_numbers<[1], [0], [0], [1], [0, 0, 1, 1], [], []>} : vector<8x8xbf16>, vector<8x32xbf16>, vector<8x32xf32> -> vector<8x32xf32>
    %c0_39 = arith.constant 0 : index
    %c64_40 = arith.constant 64 : index
    %81 = vector.load %arg17[%c0_39, %c64_40] : memref<8x128xf32, #tpu.memory_space<vmem>>, vector<8x32xf32>
    tpu.vector_store %arg17[%c0_39, %c64_40], %80 {strides = array<i32>} : memref<8x128xf32, #tpu.memory_space<vmem>>, vector<8x32xf32>,
    %c0_41 = arith.constant 0 : index
    %c96 = arith.constant 96 : index
    %82 = vector.load %arg16[%c0_41, %c96] : memref<8x384xf32, #tpu.memory_space<vmem>>, vector<8x32xf32>
    %83 = arith.truncf %82 : vector<8x32xf32> to vector<8x32xbf16>
    %c0_42 = arith.constant 0 : index
    %c224 = arith.constant 224 : index
    %84 = vector.load %arg16[%c0_42, %c224] : memref<8x384xf32, #tpu.memory_space<vmem>>, vector<8x32xf32>
    %85 = arith.truncf %84 : vector<8x32xf32> to vector<8x32xbf16>
    %c0_43 = arith.constant 0 : index
    %c352 = arith.constant 352 : index
    %86 = vector.load %arg16[%c0_43, %c352] : memref<8x384xf32, #tpu.memory_space<vmem>>, vector<8x32xf32>
    %87 = arith.truncf %86 : vector<8x32xf32> to vector<8x32xbf16>
    %cst_44 = arith.constant dense<0.000000e+00> : vector<8x8xf32>
    %88 = tpu.matmul %83, %85, %cst_44 {dimension_numbers = #tpu.dot_dimension_numbers<[1], [1], [0], [0], [0, 0, 1, 0], [], []>} : vector<8x32xbf16>, vector<8x32xbf16>, vector<8x8xf32> -> vector<8x8xf32>
    %cst_45 = arith.constant 0.176776692 : f32
    %89 = vector.broadcast %cst_45 : f32 to vector<8x8xf32>
    %90 = arith.mulf %88, %89 : vector<8x8xf32>
    %91 = vector.broadcast %2 : vector<1x8xf32> to vector<8x8xf32>
    %92 = arith.addf %90, %91 : vector<8x8xf32>
    %cst_46 = arith.constant dense<0xFF800000> : vector<8xf32>
    %93 = vector.multi_reduction <maximumf>, %92, %cst_46 [1] : vector<8x8xf32> to vector<8xf32>
    %94 = vector.shape_cast %93 : vector<8xf32> to vector<8x1xf32>
    %95 = vector.broadcast %94 : vector<8x1xf32> to vector<8x8xf32>
    %96 = arith.subf %92, %95 : vector<8x8xf32>
    %97 = math.exp %96 : vector<8x8xf32>
    %cst_47 = arith.constant dense<0.000000e+00> : vector<8xf32>
    %98 = vector.multi_reduction <add>, %97, %cst_47 [1] : vector<8x8xf32> to vector<8xf32>
    %99 = vector.shape_cast %98 : vector<8xf32> to vector<8x1xf32>
    %100 = tpu.reciprocal %99 {approx = true} : vector<8x1xf32> -> vector<8x1xf32>
    %101 = vector.broadcast %100 : vector<8x1xf32> to vector<8x8xf32>
    %102 = arith.mulf %97, %101 : vector<8x8xf32>
    %103 = arith.truncf %102 : vector<8x8xf32> to vector<8x8xbf16>
    %cst_48 = arith.constant dense<0.000000e+00> : vector<8x32xf32>
    %104 = tpu.matmul %103, %87, %cst_48 {dimension_numbers = #tpu.dot_dimension_numbers<[1], [0], [0], [1], [0, 0, 1, 1], [], []>} : vector<8x8xbf16>, vector<8x32xbf16>, vector<8x32xf32> -> vector<8x32xf32>
    %c0_49 = arith.constant 0 : index
    %c96_50 = arith.constant 96 : index
    %105 = vector.load %arg17[%c0_49, %c96_50] : memref<8x128xf32, #tpu.memory_space<vmem>>, vector<8x32xf32>
    tpu.vector_store %arg17[%c0_49, %c96_50], %104 {strides = array<i32>} : memref<8x128xf32, #tpu.memory_space<vmem>>, vector<8x32xf32>,
    %c0_51 = arith.constant 0 : index
    %c0_52 = arith.constant 0 : index
    %106 = vector.load %arg17[%c0_51, %c0_52] : memref<8x128xf32, #tpu.memory_space<vmem>>, vector<8x128xf32>
    %c0_53 = arith.constant 0 : index
    %c0_54 = arith.constant 0 : index
    %107 = vector.load %arg5[%c0_53, %c0_54] : memref<128x128xbf16, #tpu.memory_space<vmem>>, vector<128x128xbf16>
    %108 = arith.truncf %106 : vector<8x128xf32> to vector<8x128xbf16>
    %cst_55 = arith.constant dense<0.000000e+00> : vector<8x128xf32>
    %109 = tpu.matmul %108, %107, %cst_55 {dimension_numbers = #tpu.dot_dimension_numbers<[1], [0], [0], [1], [0, 0, 1, 1], [], []>} : vector<8x128xbf16>, vector<128x128xbf16>, vector<8x128xf32> -> vector<8x128xf32>
    %c0_56 = arith.constant 0 : index
    %c0_57 = arith.constant 0 : index
    %110 = vector.load %arg6[%c0_56, %c0_57] : memref<1x128xf32, #tpu.memory_space<vmem>>, vector<1x128xf32>
    %111 = vector.broadcast %110 : vector<1x128xf32> to vector<8x128xf32>
    %112 = arith.addf %109, %111 : vector<8x128xf32>
    %113 = arith.addf %0, %112 : vector<8x128xf32>
    %c0_58 = arith.constant 0 : index
    %c0_59 = arith.constant 0 : index
    %114 = vector.load %arg7[%c0_58, %c0_59] : memref<1x128xf32, #tpu.memory_space<vmem>>, vector<1x128xf32>
    %c0_60 = arith.constant 0 : index
    %c0_61 = arith.constant 0 : index
    %115 = vector.load %arg8[%c0_60, %c0_61] : memref<1x128xf32, #tpu.memory_space<vmem>>, vector<1x128xf32>
    %cst_62 = arith.constant dense<0.000000e+00> : vector<8xf32>
    %116 = vector.multi_reduction <add>, %113, %cst_62 [1] : vector<8x128xf32> to vector<8xf32>
    %117 = vector.shape_cast %116 : vector<8xf32> to vector<8x1xf32>
    %cst_63 = arith.constant 1.280000e+02 : f32
    %118 = vector.broadcast %cst_63 : f32 to vector<8x1xf32>
    %119 = arith.divf %117, %118 : vector<8x1xf32>
    %120 = vector.broadcast %119 : vector<8x1xf32> to vector<8x128xf32>
    %121 = arith.subf %113, %120 : vector<8x128xf32>
    %122 = arith.mulf %121, %121 : vector<8x128xf32>
    %cst_64 = arith.constant dense<0.000000e+00> : vector<8xf32>
    %123 = vector.multi_reduction <add>, %122, %cst_64 [1] : vector<8x128xf32> to vector<8xf32>
    %124 = vector.shape_cast %123 : vector<8xf32> to vector<8x1xf32>
    %cst_65 = arith.constant 1.280000e+02 : f32
    %125 = vector.broadcast %cst_65 : f32 to vector<8x1xf32>
    %126 = arith.divf %124, %125 : vector<8x1xf32>
    %cst_66 = arith.constant 9.99999996E-13 : f32
    %127 = vector.broadcast %cst_66 : f32 to vector<8x1xf32>
    %128 = arith.addf %126, %127 : vector<8x1xf32>
    %129 = math.rsqrt %128 : vector<8x1xf32>
    %130 = vector.broadcast %129 : vector<8x1xf32> to vector<8x128xf32>
    %131 = arith.mulf %121, %130 : vector<8x128xf32>
    %132 = vector.broadcast %114 : vector<1x128xf32> to vector<8x128xf32>
    %133 = arith.mulf %131, %132 : vector<8x128xf32>
    %134 = vector.broadcast %115 : vector<1x128xf32> to vector<8x128xf32>
    %135 = arith.addf %133, %134 : vector<8x128xf32>
    %c0_67 = arith.constant 0 : index
    %c0_68 = arith.constant 0 : index
    %136 = vector.load %arg9[%c0_67, %c0_68] : memref<128x256xbf16, #tpu.memory_space<vmem>>, vector<128x256xbf16>
    %137 = arith.truncf %135 : vector<8x128xf32> to vector<8x128xbf16>
    %cst_69 = arith.constant dense<0.000000e+00> : vector<8x256xf32>
    %138 = tpu.matmul %137, %136, %cst_69 {dimension_numbers = #tpu.dot_dimension_numbers<[1], [0], [0], [1], [0, 0, 1, 1], [], []>} : vector<8x128xbf16>, vector<128x256xbf16>, vector<8x256xf32> -> vector<8x256xf32>
    %c0_70 = arith.constant 0 : index
    %c0_71 = arith.constant 0 : index
    %139 = vector.load %arg10[%c0_70, %c0_71] : memref<1x256xf32, #tpu.memory_space<vmem>>, vector<1x256xf32>
    %140 = vector.broadcast %139 : vector<1x256xf32> to vector<8x256xf32>
    %141 = arith.addf %138, %140 : vector<8x256xf32>
    %cst_72 = arith.constant 5.000000e-01 : f32
    %142 = vector.broadcast %cst_72 : f32 to vector<8x256xf32>
    %143 = arith.mulf %142, %141 : vector<8x256xf32>
    %cst_73 = arith.constant 4.471500e-02 : f32
    %144 = vector.broadcast %cst_73 : f32 to vector<8x256xf32>
    %145 = arith.mulf %144, %141 : vector<8x256xf32>
    %146 = arith.mulf %145, %141 : vector<8x256xf32>
    %147 = arith.mulf %146, %141 : vector<8x256xf32>
    %148 = arith.addf %141, %147 : vector<8x256xf32>
    %cst_74 = arith.constant 0.797884583 : f32
    %149 = vector.broadcast %cst_74 : f32 to vector<8x256xf32>
    %150 = arith.mulf %149, %148 : vector<8x256xf32>
    %151 = math.tanh %150 : vector<8x256xf32>
    %cst_75 = arith.constant 1.000000e+00 : f32
    %152 = vector.broadcast %cst_75 : f32 to vector<8x256xf32>
    %153 = arith.addf %152, %151 : vector<8x256xf32>
    %154 = arith.mulf %143, %153 : vector<8x256xf32>
    %c0_76 = arith.constant 0 : index
    %c0_77 = arith.constant 0 : index
    %155 = vector.load %arg11[%c0_76, %c0_77] : memref<256x128xbf16, #tpu.memory_space<vmem>>, vector<256x128xbf16>
    %156 = arith.truncf %154 : vector<8x256xf32> to vector<8x256xbf16>
    %cst_78 = arith.constant dense<0.000000e+00> : vector<8x128xf32>
    %157 = tpu.matmul %156, %155, %cst_78 {dimension_numbers = #tpu.dot_dimension_numbers<[1], [0], [0], [1], [0, 0, 1, 1], [], []>} : vector<8x256xbf16>, vector<256x128xbf16>, vector<8x128xf32> -> vector<8x128xf32>
    %c0_79 = arith.constant 0 : index
    %c0_80 = arith.constant 0 : index
    %158 = vector.load %arg12[%c0_79, %c0_80] : memref<1x128xf32, #tpu.memory_space<vmem>>, vector<1x128xf32>
    %159 = vector.broadcast %158 : vector<1x128xf32> to vector<8x128xf32>
    %160 = arith.addf %157, %159 : vector<8x128xf32>
    %161 = arith.addf %135, %160 : vector<8x128xf32>
    %c0_81 = arith.constant 0 : index
    %c0_82 = arith.constant 0 : index
    %162 = vector.load %arg13[%c0_81, %c0_82] : memref<1x128xf32, #tpu.memory_space<vmem>>, vector<1x128xf32>
    %c0_83 = arith.constant 0 : index
    %c0_84 = arith.constant 0 : index
    %163 = vector.load %arg14[%c0_83, %c0_84] : memref<1x128xf32, #tpu.memory_space<vmem>>, vector<1x128xf32>
    %cst_85 = arith.constant dense<0.000000e+00> : vector<8xf32>
    %164 = vector.multi_reduction <add>, %161, %cst_85 [1] : vector<8x128xf32> to vector<8xf32>
    %165 = vector.shape_cast %164 : vector<8xf32> to vector<8x1xf32>
    %cst_86 = arith.constant 1.280000e+02 : f32
    %166 = vector.broadcast %cst_86 : f32 to vector<8x1xf32>
    %167 = arith.divf %165, %166 : vector<8x1xf32>
    %168 = vector.broadcast %167 : vector<8x1xf32> to vector<8x128xf32>
    %169 = arith.subf %161, %168 : vector<8x128xf32>
    %170 = arith.mulf %169, %169 : vector<8x128xf32>
    %cst_87 = arith.constant dense<0.000000e+00> : vector<8xf32>
    %171 = vector.multi_reduction <add>, %170, %cst_87 [1] : vector<8x128xf32> to vector<8xf32>
    %172 = vector.shape_cast %171 : vector<8xf32> to vector<8x1xf32>
    %cst_88 = arith.constant 1.280000e+02 : f32
    %173 = vector.broadcast %cst_88 : f32 to vector<8x1xf32>
    %174 = arith.divf %172, %173 : vector<8x1xf32>
    %cst_89 = arith.constant 9.99999996E-13 : f32
    %175 = vector.broadcast %cst_89 : f32 to vector<8x1xf32>
    %176 = arith.addf %174, %175 : vector<8x1xf32>
    %177 = math.rsqrt %176 : vector<8x1xf32>
    %178 = vector.broadcast %177 : vector<8x1xf32> to vector<8x128xf32>
    %179 = arith.mulf %169, %178 : vector<8x128xf32>
    %180 = vector.broadcast %162 : vector<1x128xf32> to vector<8x128xf32>
    %181 = arith.mulf %179, %180 : vector<8x128xf32>
    %182 = vector.broadcast %163 : vector<1x128xf32> to vector<8x128xf32>
    %183 = arith.addf %181, %182 : vector<8x128xf32>
    %c0_90 = arith.constant 0 : index
    %c0_91 = arith.constant 0 : index
    %184 = vector.load %arg15[%c0_90, %c0_91] : memref<8x128xf32, #tpu.memory_space<vmem>>, vector<8x128xf32>
    tpu.vector_store %arg15[%c0_90, %c0_91], %183 {strides = array<i32>} : memref<8x128xf32, #tpu.memory_space<vmem>>, vector<8x128xf32>,
    return
  }
  func.func @transform_0(%arg0: i32) -> (i32, i32) {
    %c0_i32 = arith.constant 0 : i32
    %c0_i32_0 = arith.constant 0 : i32
    return %arg0, %c0_i32 : i32, i32
  }
  func.func @transform_1(%arg0: i32) -> (i32, i32, i32) {
    %c0_i32 = arith.constant 0 : i32
    %c0_i32_0 = arith.constant 0 : i32
    %c0_i32_1 = arith.constant 0 : i32
    return %arg0, %c0_i32, %c0_i32_0 : i32, i32, i32
  }
  func.func @transform_2(%arg0: i32) -> (i32, i32) {
    %c0_i32 = arith.constant 0 : i32
    %c0_i32_0 = arith.constant 0 : i32
    %c0_i32_1 = arith.constant 0 : i32
    return %c0_i32, %c0_i32_0 : i32, i32
  }
  func.func @transform_3(%arg0: i32) -> (i32, i32) {
    %c0_i32 = arith.constant 0 : i32
    %c0_i32_0 = arith.constant 0 : i32
    %c0_i32_1 = arith.constant 0 : i32
    return %c0_i32, %c0_i32_0 : i32, i32
  }
  func.func @transform_4(%arg0: i32) -> (i32, i32) {
    %c0_i32 = arith.constant 0 : i32
    %c0_i32_0 = arith.constant 0 : i32
    %c0_i32_1 = arith.constant 0 : i32
    return %c0_i32, %c0_i32_0 : i32, i32
  }
  func.func @transform_5(%arg0: i32) -> (i32, i32) {
    %c0_i32 = arith.constant 0 : i32
    %c0_i32_0 = arith.constant 0 : i32
    %c0_i32_1 = arith.constant 0 : i32
    return %c0_i32, %c0_i32_0 : i32, i32
  }
  func.func @transform_6(%arg0: i32) -> (i32, i32) {
    %c0_i32 = arith.constant 0 : i32
    %c0_i32_0 = arith.constant 0 : i32
    %c0_i32_1 = arith.constant 0 : i32
    return %c0_i32, %c0_i32_0 : i32, i32
  }
  func.func @transform_7(%arg0: i32) -> (i32, i32) {
    %c0_i32 = arith.constant 0 : i32
    %c0_i32_0 = arith.constant 0 : i32
    %c0_i32_1 = arith.constant 0 : i32
    return %c0_i32, %c0_i32_0 : i32, i32
  }
  func.func @transform_8(%arg0: i32) -> (i32, i32) {
    %c0_i32 = arith.constant 0 : i32
    %c0_i32_0 = arith.constant 0 : i32
    %c0_i32_1 = arith.constant 0 : i32
    return %c0_i32, %c0_i32_0 : i32, i32
  }
  func.func @transform_9(%arg0: i32) -> (i32, i32) {
    %c0_i32 = arith.constant 0 : i32
    %c0_i32_0 = arith.constant 0 : i32
    %c0_i32_1 = arith.constant 0 : i32
    return %c0_i32, %c0_i32_0 : i32, i32
  }
  func.func @transform_10(%arg0: i32) -> (i32, i32) {
    %c0_i32 = arith.constant 0 : i32
    %c0_i32_0 = arith.constant 0 : i32
    %c0_i32_1 = arith.constant 0 : i32
    return %c0_i32, %c0_i32_0 : i32, i32
  }
  func.func @transform_11(%arg0: i32) -> (i32, i32) {
    %c0_i32 = arith.constant 0 : i32
    %c0_i32_0 = arith.constant 0 : i32
    %c0_i32_1 = arith.constant 0 : i32
    return %c0_i32, %c0_i32_0 : i32, i32
  }
  func.func @transform_12(%arg0: i32) -> (i32, i32) {
    %c0_i32 = arith.constant 0 : i32
    %c0_i32_0 = arith.constant 0 : i32
    %c0_i32_1 = arith.constant 0 : i32
    return %c0_i32, %c0_i32_0 : i32, i32
  }
  func.func @transform_13(%arg0: i32) -> (i32, i32) {
    %c0_i32 = arith.constant 0 : i32
    %c0_i32_0 = arith.constant 0 : i32
    %c0_i32_1 = arith.constant 0 : i32
    return %c0_i32, %c0_i32_0 : i32, i32
  }
  func.func @transform_14(%arg0: i32) -> (i32, i32) {
    %c0_i32 = arith.constant 0 : i32
    %c0_i32_0 = arith.constant 0 : i32
    return %arg0, %c0_i32 : i32, i32
  }
}

module attributes {stable_mosaic.version = 11 : i64} {
  func.func @_encoder_layer_kernel(%arg0: i32, %arg1: memref<8x128xf32, #tpu.memory_space<vmem>>, %arg2: memref<1x1x8xf32, #tpu.memory_space<vmem>>, %arg3: memref<128x384xbf16, #tpu.memory_space<vmem>>, %arg4: memref<1x384xf32, #tpu.memory_space<vmem>>, %arg5: memref<128x128xbf16, #tpu.memory_space<vmem>>, %arg6: memref<1x128xf32, #tpu.memory_space<vmem>>, %arg7: memref<1x128xf32, #tpu.memory_space<vmem>>, %arg8: memref<1x128xf32, #tpu.memory_space<vmem>>, %arg9: memref<128x256xbf16, #tpu.memory_space<vmem>>, %arg10: memref<1x256xf32, #tpu.memory_space<vmem>>, %arg11: memref<256x128xbf16, #tpu.memory_space<vmem>>, %arg12: memref<1x128xf32, #tpu.memory_space<vmem>>, %arg13: memref<1x128xf32, #tpu.memory_space<vmem>>, %arg14: memref<1x128xf32, #tpu.memory_space<vmem>>, %arg15: memref<8x128xf32, #tpu.memory_space<vmem>>, %arg16: memref<8x384xf32, #tpu.memory_space<vmem>>, %arg17: memref<8x128xf32, #tpu.memory_space<vmem>>) attributes {dimension_semantics = [#tpu.dimension_semantics<parallel>], iteration_bounds = array<i64: 2>, scalar_prefetch = 0 : i64, scratch_operands = 2 : i64, tpu.core_type = #tpu.core_type<tc>, window_params = [{transform_indices = @transform_0, window_bounds = array<i64: 8, 128>}, {transform_indices = @transform_1, window_bounds = array<i64: 1, 1, 8>}, {pipeline_mode = #tpu.pipeline_mode<synchronous>, transform_indices = @transform_2, window_bounds = array<i64: 128, 384>}, {pipeline_mode = #tpu.pipeline_mode<synchronous>, transform_indices = @transform_3, window_bounds = array<i64: 1, 384>}, {pipeline_mode = #tpu.pipeline_mode<synchronous>, transform_indices = @transform_4, window_bounds = array<i64: 128, 128>}, {pipeline_mode = #tpu.pipeline_mode<synchronous>, transform_indices = @transform_5, window_bounds = array<i64: 1, 128>}, {pipeline_mode = #tpu.pipeline_mode<synchronous>, transform_indices = @transform_6, window_bounds = array<i64: 1, 128>}, {pipeline_mode = #tpu.pipeline_mode<synchronous>, transform_indices = @transform_7, window_bounds = array<i64: 1, 128>}, {pipeline_mode = #tpu.pipeline_mode<synchronous>, transform_indices = @transform_8, window_bounds = array<i64: 128, 256>}, {pipeline_mode = #tpu.pipeline_mode<synchronous>, transform_indices = @transform_9, window_bounds = array<i64: 1, 256>}, {pipeline_mode = #tpu.pipeline_mode<synchronous>, transform_indices = @transform_10, window_bounds = array<i64: 256, 128>}, {pipeline_mode = #tpu.pipeline_mode<synchronous>, transform_indices = @transform_11, window_bounds = array<i64: 1, 128>}, {pipeline_mode = #tpu.pipeline_mode<synchronous>, transform_indices = @transform_12, window_bounds = array<i64: 1, 128>}, {pipeline_mode = #tpu.pipeline_mode<synchronous>, transform_indices = @transform_13, window_bounds = array<i64: 1, 128>}, {transform_indices = @transform_14, window_bounds = array<i64: 8, 128>}]} {
    %c0 = arith.constant 0 : index
    %c0_0 = arith.constant 0 : index
    %0 = vector.load %arg1[%c0, %c0_0] : memref<8x128xf32, #tpu.memory_space<vmem>>, vector<8x128xf32>
    %c0_1 = arith.constant 0 : index
    %c0_2 = arith.constant 0 : index
    %c0_3 = arith.constant 0 : index
    %1 = vector.load %arg2[%c0_1, %c0_2, %c0_3] : memref<1x1x8xf32, #tpu.memory_space<vmem>>, vector<1x1x8xf32>
    %2 = vector.shape_cast %1 : vector<1x1x8xf32> to vector<1x8xf32>
    %c0_4 = arith.constant 0 : index
    %c0_5 = arith.constant 0 : index
    %3 = vector.load %arg3[%c0_4, %c0_5] : memref<128x384xbf16, #tpu.memory_space<vmem>>, vector<128x384xbf16>
    %4 = arith.truncf %0 : vector<8x128xf32> to vector<8x128xbf16>
    %cst = arith.constant dense<0.000000e+00> : vector<8x384xf32>
    %5 = tpu.matmul %4, %3, %cst {dimension_numbers = #tpu.dot_dimension_numbers<[1], [0], [0], [1], [0, 0, 1, 1], [], []>} : vector<8x128xbf16>, vector<128x384xbf16>, vector<8x384xf32> -> vector<8x384xf32>
    %c0_6 = arith.constant 0 : index
    %c0_7 = arith.constant 0 : index
    %6 = vector.load %arg4[%c0_6, %c0_7] : memref<1x384xf32, #tpu.memory_space<vmem>>, vector<1x384xf32>
    %7 = vector.broadcast %6 : vector<1x384xf32> to vector<8x384xf32>
    %8 = arith.addf %5, %7 : vector<8x384xf32>
    %c0_8 = arith.constant 0 : index
    %c0_9 = arith.constant 0 : index
    %9 = vector.load %arg16[%c0_8, %c0_9] : memref<8x384xf32, #tpu.memory_space<vmem>>, vector<8x384xf32>
    tpu.vector_store %arg16[%c0_8, %c0_9], %8 {strides = array<i32>} : memref<8x384xf32, #tpu.memory_space<vmem>>, vector<8x384xf32>,
    %c0_10 = arith.constant 0 : index
    %c0_11 = arith.constant 0 : index
    %10 = vector.load %arg16[%c0_10, %c0_11] : memref<8x384xf32, #tpu.memory_space<vmem>>, vector<8x32xf32>
    %11 = arith.truncf %10 : vector<8x32xf32> to vector<8x32xbf16>
    %c0_12 = arith.constant 0 : index
    %c128 = arith.constant 128 : index
    %12 = vector.load %arg16[%c0_12, %c128] : memref<8x384xf32, #tpu.memory_space<vmem>>, vector<8x32xf32>
    %13 = arith.truncf %12 : vector<8x32xf32> to vector<8x32xbf16>
    %c0_13 = arith.constant 0 : index
    %c256 = arith.constant 256 : index
    %14 = vector.load %arg16[%c0_13, %c256] : memref<8x384xf32, #tpu.memory_space<vmem>>, vector<8x32xf32>
    %15 = arith.truncf %14 : vector<8x32xf32> to vector<8x32xbf16>
    %cst_14 = arith.constant dense<0.000000e+00> : vector<8x8xf32>
    %16 = tpu.matmul %11, %13, %cst_14 {dimension_numbers = #tpu.dot_dimension_numbers<[1], [1], [0], [0], [0, 0, 1, 0], [], []>} : vector<8x32xbf16>, vector<8x32xbf16>, vector<8x8xf32> -> vector<8x8xf32>
    %cst_15 = arith.constant 0.176776692 : f32
    %17 = vector.broadcast %cst_15 : f32 to vector<8x8xf32>
    %18 = arith.mulf %16, %17 : vector<8x8xf32>
    %19 = vector.broadcast %2 : vector<1x8xf32> to vector<8x8xf32>
    %20 = arith.addf %18, %19 : vector<8x8xf32>
    %cst_16 = arith.constant dense<0xFF800000> : vector<8xf32>
    %21 = vector.multi_reduction <maximumf>, %20, %cst_16 [1] : vector<8x8xf32> to vector<8xf32>
    %22 = vector.shape_cast %21 : vector<8xf32> to vector<8x1xf32>
    %23 = vector.broadcast %22 : vector<8x1xf32> to vector<8x8xf32>
    %24 = arith.subf %20, %23 : vector<8x8xf32>
    %25 = math.exp %24 : vector<8x8xf32>
    %cst_17 = arith.constant dense<0.000000e+00> : vector<8xf32>
    %26 = vector.multi_reduction <add>, %25, %cst_17 [1] : vector<8x8xf32> to vector<8xf32>
    %27 = vector.shape_cast %26 : vector<8xf32> to vector<8x1xf32>
    %28 = tpu.reciprocal %27 {approx = true} : vector<8x1xf32> -> vector<8x1xf32>
    %29 = vector.broadcast %28 : vector<8x1xf32> to vector<8x8xf32>
    %30 = arith.mulf %25, %29 : vector<8x8xf32>
    %31 = arith.truncf %30 : vector<8x8xf32> to vector<8x8xbf16>
    %cst_18 = arith.constant dense<0.000000e+00> : vector<8x32xf32>
    %32 = tpu.matmul %31, %15, %cst_18 {dimension_numbers = #tpu.dot_dimension_numbers<[1], [0], [0], [1], [0, 0, 1, 1], [], []>} : vector<8x8xbf16>, vector<8x32xbf16>, vector<8x32xf32> -> vector<8x32xf32>
    %c0_19 = arith.constant 0 : index
    %c0_20 = arith.constant 0 : index
    %33 = vector.load %arg17[%c0_19, %c0_20] : memref<8x128xf32, #tpu.memory_space<vmem>>, vector<8x32xf32>
    tpu.vector_store %arg17[%c0_19, %c0_20], %32 {strides = array<i32>} : memref<8x128xf32, #tpu.memory_space<vmem>>, vector<8x32xf32>,
    %c0_21 = arith.constant 0 : index
    %c32 = arith.constant 32 : index
    %34 = vector.load %arg16[%c0_21, %c32] : memref<8x384xf32, #tpu.memory_space<vmem>>, vector<8x32xf32>
    %35 = arith.truncf %34 : vector<8x32xf32> to vector<8x32xbf16>
    %c0_22 = arith.constant 0 : index
    %c160 = arith.constant 160 : index
    %36 = vector.load %arg16[%c0_22, %c160] : memref<8x384xf32, #tpu.memory_space<vmem>>, vector<8x32xf32>
    %37 = arith.truncf %36 : vector<8x32xf32> to vector<8x32xbf16>
    %c0_23 = arith.constant 0 : index
    %c288 = arith.constant 288 : index
    %38 = vector.load %arg16[%c0_23, %c288] : memref<8x384xf32, #tpu.memory_space<vmem>>, vector<8x32xf32>
    %39 = arith.truncf %38 : vector<8x32xf32> to vector<8x32xbf16>
    %cst_24 = arith.constant dense<0.000000e+00> : vector<8x8xf32>
    %40 = tpu.matmul %35, %37, %cst_24 {dimension_numbers = #tpu.dot_dimension_numbers<[1], [1], [0], [0], [0, 0, 1, 0], [], []>} : vector<8x32xbf16>, vector<8x32xbf16>, vector<8x8xf32> -> vector<8x8xf32>
    %cst_25 = arith.constant 0.176776692 : f32
    %41 = vector.broadcast %cst_25 : f32 to vector<8x8xf32>
    %42 = arith.mulf %40, %41 : vector<8x8xf32>
    %43 = vector.broadcast %2 : vector<1x8xf32> to vector<8x8xf32>
    %44 = arith.addf %42, %43 : vector<8x8xf32>
    %cst_26 = arith.constant dense<0xFF800000> : vector<8xf32>
    %45 = vector.multi_reduction <maximumf>, %44, %cst_26 [1] : vector<8x8xf32> to vector<8xf32>
    %46 = vector.shape_cast %45 : vector<8xf32> to vector<8x1xf32>
    %47 = vector.broadcast %46 : vector<8x1xf32> to vector<8x8xf32>
    %48 = arith.subf %44, %47 : vector<8x8xf32>
    %49 = math.exp %48 : vector<8x8xf32>
    %cst_27 = arith.constant dense<0.000000e+00> : vector<8xf32>
    %50 = vector.multi_reduction <add>, %49, %cst_27 [1] : vector<8x8xf32> to vector<8xf32>
    %51 = vector.shape_cast %50 : vector<8xf32> to vector<8x1xf32>
    %52 = tpu.reciprocal %51 {approx = true} : vector<8x1xf32> -> vector<8x1xf32>
    %53 = vector.broadcast %52 : vector<8x1xf32> to vector<8x8xf32>
    %54 = arith.mulf %49, %53 : vector<8x8xf32>
    %55 = arith.truncf %54 : vector<8x8xf32> to vector<8x8xbf16>
    %cst_28 = arith.constant dense<0.000000e+00> : vector<8x32xf32>
    %56 = tpu.matmul %55, %39, %cst_28 {dimension_numbers = #tpu.dot_dimension_numbers<[1], [0], [0], [1], [0, 0, 1, 1], [], []>} : vector<8x8xbf16>, vector<8x32xbf16>, vector<8x32xf32> -> vector<8x32xf32>
    %c0_29 = arith.constant 0 : index
    %c32_30 = arith.constant 32 : index
    %57 = vector.load %arg17[%c0_29, %c32_30] : memref<8x128xf32, #tpu.memory_space<vmem>>, vector<8x32xf32>
    tpu.vector_store %arg17[%c0_29, %c32_30], %56 {strides = array<i32>} : memref<8x128xf32, #tpu.memory_space<vmem>>, vector<8x32xf32>,
    %c0_31 = arith.constant 0 : index
    %c64 = arith.constant 64 : index
    %58 = vector.load %arg16[%c0_31, %c64] : memref<8x384xf32, #tpu.memory_space<vmem>>, vector<8x32xf32>
    %59 = arith.truncf %58 : vector<8x32xf32> to vector<8x32xbf16>
    %c0_32 = arith.constant 0 : index
    %c192 = arith.constant 192 : index
    %60 = vector.load %arg16[%c0_32, %c192] : memref<8x384xf32, #tpu.memory_space<vmem>>, vector<8x32xf32>
    %61 = arith.truncf %60 : vector<8x32xf32> to vector<8x32xbf16>
    %c0_33 = arith.constant 0 : index
    %c320 = arith.constant 320 : index
    %62 = vector.load %arg16[%c0_33, %c320] : memref<8x384xf32, #tpu.memory_space<vmem>>, vector<8x32xf32>
    %63 = arith.truncf %62 : vector<8x32xf32> to vector<8x32xbf16>
    %cst_34 = arith.constant dense<0.000000e+00> : vector<8x8xf32>
    %64 = tpu.matmul %59, %61, %cst_34 {dimension_numbers = #tpu.dot_dimension_numbers<[1], [1], [0], [0], [0, 0, 1, 0], [], []>} : vector<8x32xbf16>, vector<8x32xbf16>, vector<8x8xf32> -> vector<8x8xf32>
    %cst_35 = arith.constant 0.176776692 : f32
    %65 = vector.broadcast %cst_35 : f32 to vector<8x8xf32>
    %66 = arith.mulf %64, %65 : vector<8x8xf32>
    %67 = vector.broadcast %2 : vector<1x8xf32> to vector<8x8xf32>
    %68 = arith.addf %66, %67 : vector<8x8xf32>
    %cst_36 = arith.constant dense<0xFF800000> : vector<8xf32>
    %69 = vector.multi_reduction <maximumf>, %68, %cst_36 [1] : vector<8x8xf32> to vector<8xf32>
    %70 = vector.shape_cast %69 : vector<8xf32> to vector<8x1xf32>
    %71 = vector.broadcast %70 : vector<8x1xf32> to vector<8x8xf32>
    %72 = arith.subf %68, %71 : vector<8x8xf32>
    %73 = math.exp %72 : vector<8x8xf32>
    %cst_37 = arith.constant dense<0.000000e+00> : vector<8xf32>
    %74 = vector.multi_reduction <add>, %73, %cst_37 [1] : vector<8x8xf32> to vector<8xf32>
    %75 = vector.shape_cast %74 : vector<8xf32> to vector<8x1xf32>
    %76 = tpu.reciprocal %75 {approx = true} : vector<8x1xf32> -> vector<8x1xf32>
    %77 = vector.broadcast %76 : vector<8x1xf32> to vector<8x8xf32>
    %78 = arith.mulf %73, %77 : vector<8x8xf32>
    %79 = arith.truncf %78 : vector<8x8xf32> to vector<8x8xbf16>
    %cst_38 = arith.constant dense<0.000000e+00> : vector<8x32xf32>
    %80 = tpu.matmul %79, %63, %cst_38 {dimension_numbers = #tpu.dot_dimension_numbers<[1], [0], [0], [1], [0, 0, 1, 1], [], []>} : vector<8x8xbf16>, vector<8x32xbf16>, vector<8x32xf32> -> vector<8x32xf32>
    %c0_39 = arith.constant 0 : index
    %c64_40 = arith.constant 64 : index
    %81 = vector.load %arg17[%c0_39, %c64_40] : memref<8x128xf32, #tpu.memory_space<vmem>>, vector<8x32xf32>
    tpu.vector_store %arg17[%c0_39, %c64_40], %80 {strides = array<i32>} : memref<8x128xf32, #tpu.memory_space<vmem>>, vector<8x32xf32>,
    %c0_41 = arith.constant 0 : index
    %c96 = arith.constant 96 : index
    %82 = vector.load %arg16[%c0_41, %c96] : memref<8x384xf32, #tpu.memory_space<vmem>>, vector<8x32xf32>
    %83 = arith.truncf %82 : vector<8x32xf32> to vector<8x32xbf16>
    %c0_42 = arith.constant 0 : index
    %c224 = arith.constant 224 : index
    %84 = vector.load %arg16[%c0_42, %c224] : memref<8x384xf32, #tpu.memory_space<vmem>>, vector<8x32xf32>
    %85 = arith.truncf %84 : vector<8x32xf32> to vector<8x32xbf16>
    %c0_43 = arith.constant 0 : index
    %c352 = arith.constant 352 : index
    %86 = vector.load %arg16[%c0_43, %c352] : memref<8x384xf32, #tpu.memory_space<vmem>>, vector<8x32xf32>
    %87 = arith.truncf %86 : vector<8x32xf32> to vector<8x32xbf16>
    %cst_44 = arith.constant dense<0.000000e+00> : vector<8x8xf32>
    %88 = tpu.matmul %83, %85, %cst_44 {dimension_numbers = #tpu.dot_dimension_numbers<[1], [1], [0], [0], [0, 0, 1, 0], [], []>} : vector<8x32xbf16>, vector<8x32xbf16>, vector<8x8xf32> -> vector<8x8xf32>
    %cst_45 = arith.constant 0.176776692 : f32
    %89 = vector.broadcast %cst_45 : f32 to vector<8x8xf32>
    %90 = arith.mulf %88, %89 : vector<8x8xf32>
    %91 = vector.broadcast %2 : vector<1x8xf32> to vector<8x8xf32>
    %92 = arith.addf %90, %91 : vector<8x8xf32>
    %cst_46 = arith.constant dense<0xFF800000> : vector<8xf32>
    %93 = vector.multi_reduction <maximumf>, %92, %cst_46 [1] : vector<8x8xf32> to vector<8xf32>
    %94 = vector.shape_cast %93 : vector<8xf32> to vector<8x1xf32>
    %95 = vector.broadcast %94 : vector<8x1xf32> to vector<8x8xf32>
    %96 = arith.subf %92, %95 : vector<8x8xf32>
    %97 = math.exp %96 : vector<8x8xf32>
    %cst_47 = arith.constant dense<0.000000e+00> : vector<8xf32>
    %98 = vector.multi_reduction <add>, %97, %cst_47 [1] : vector<8x8xf32> to vector<8xf32>
    %99 = vector.shape_cast %98 : vector<8xf32> to vector<8x1xf32>
    %100 = tpu.reciprocal %99 {approx = true} : vector<8x1xf32> -> vector<8x1xf32>
    %101 = vector.broadcast %100 : vector<8x1xf32> to vector<8x8xf32>
    %102 = arith.mulf %97, %101 : vector<8x8xf32>
    %103 = arith.truncf %102 : vector<8x8xf32> to vector<8x8xbf16>
    %cst_48 = arith.constant dense<0.000000e+00> : vector<8x32xf32>
    %104 = tpu.matmul %103, %87, %cst_48 {dimension_numbers = #tpu.dot_dimension_numbers<[1], [0], [0], [1], [0, 0, 1, 1], [], []>} : vector<8x8xbf16>, vector<8x32xbf16>, vector<8x32xf32> -> vector<8x32xf32>
    %c0_49 = arith.constant 0 : index
    %c96_50 = arith.constant 96 : index
    %105 = vector.load %arg17[%c0_49, %c96_50] : memref<8x128xf32, #tpu.memory_space<vmem>>, vector<8x32xf32>
    tpu.vector_store %arg17[%c0_49, %c96_50], %104 {strides = array<i32>} : memref<8x128xf32, #tpu.memory_space<vmem>>, vector<8x32xf32>,
    %c0_51 = arith.constant 0 : index
    %c0_52 = arith.constant 0 : index
    %106 = vector.load %arg17[%c0_51, %c0_52] : memref<8x128xf32, #tpu.memory_space<vmem>>, vector<8x128xf32>
    %c0_53 = arith.constant 0 : index
    %c0_54 = arith.constant 0 : index
    %107 = vector.load %arg5[%c0_53, %c0_54] : memref<128x128xbf16, #tpu.memory_space<vmem>>, vector<128x128xbf16>
    %108 = arith.truncf %106 : vector<8x128xf32> to vector<8x128xbf16>
    %cst_55 = arith.constant dense<0.000000e+00> : vector<8x128xf32>
    %109 = tpu.matmul %108, %107, %cst_55 {dimension_numbers = #tpu.dot_dimension_numbers<[1], [0], [0], [1], [0, 0, 1, 1], [], []>} : vector<8x128xbf16>, vector<128x128xbf16>, vector<8x128xf32> -> vector<8x128xf32>
    %c0_56 = arith.constant 0 : index
    %c0_57 = arith.constant 0 : index
    %110 = vector.load %arg6[%c0_56, %c0_57] : memref<1x128xf32, #tpu.memory_space<vmem>>, vector<1x128xf32>
    %111 = vector.broadcast %110 : vector<1x128xf32> to vector<8x128xf32>
    %112 = arith.addf %109, %111 : vector<8x128xf32>
    %113 = arith.addf %0, %112 : vector<8x128xf32>
    %c0_58 = arith.constant 0 : index
    %c0_59 = arith.constant 0 : index
    %114 = vector.load %arg7[%c0_58, %c0_59] : memref<1x128xf32, #tpu.memory_space<vmem>>, vector<1x128xf32>
    %c0_60 = arith.constant 0 : index
    %c0_61 = arith.constant 0 : index
    %115 = vector.load %arg8[%c0_60, %c0_61] : memref<1x128xf32, #tpu.memory_space<vmem>>, vector<1x128xf32>
    %cst_62 = arith.constant dense<0.000000e+00> : vector<8xf32>
    %116 = vector.multi_reduction <add>, %113, %cst_62 [1] : vector<8x128xf32> to vector<8xf32>
    %117 = vector.shape_cast %116 : vector<8xf32> to vector<8x1xf32>
    %cst_63 = arith.constant 1.280000e+02 : f32
    %118 = vector.broadcast %cst_63 : f32 to vector<8x1xf32>
    %119 = arith.divf %117, %118 : vector<8x1xf32>
    %120 = vector.broadcast %119 : vector<8x1xf32> to vector<8x128xf32>
    %121 = arith.subf %113, %120 : vector<8x128xf32>
    %122 = arith.mulf %121, %121 : vector<8x128xf32>
    %cst_64 = arith.constant dense<0.000000e+00> : vector<8xf32>
    %123 = vector.multi_reduction <add>, %122, %cst_64 [1] : vector<8x128xf32> to vector<8xf32>
    %124 = vector.shape_cast %123 : vector<8xf32> to vector<8x1xf32>
    %cst_65 = arith.constant 1.280000e+02 : f32
    %125 = vector.broadcast %cst_65 : f32 to vector<8x1xf32>
    %126 = arith.divf %124, %125 : vector<8x1xf32>
    %cst_66 = arith.constant 9.99999996E-13 : f32
    %127 = vector.broadcast %cst_66 : f32 to vector<8x1xf32>
    %128 = arith.addf %126, %127 : vector<8x1xf32>
    %129 = math.rsqrt %128 : vector<8x1xf32>
    %130 = vector.broadcast %129 : vector<8x1xf32> to vector<8x128xf32>
    %131 = arith.mulf %121, %130 : vector<8x128xf32>
    %132 = vector.broadcast %114 : vector<1x128xf32> to vector<8x128xf32>
    %133 = arith.mulf %131, %132 : vector<8x128xf32>
    %134 = vector.broadcast %115 : vector<1x128xf32> to vector<8x128xf32>
    %135 = arith.addf %133, %134 : vector<8x128xf32>
    %c0_67 = arith.constant 0 : index
    %c0_68 = arith.constant 0 : index
    %136 = vector.load %arg9[%c0_67, %c0_68] : memref<128x256xbf16, #tpu.memory_space<vmem>>, vector<128x256xbf16>
    %137 = arith.truncf %135 : vector<8x128xf32> to vector<8x128xbf16>
    %cst_69 = arith.constant dense<0.000000e+00> : vector<8x256xf32>
    %138 = tpu.matmul %137, %136, %cst_69 {dimension_numbers = #tpu.dot_dimension_numbers<[1], [0], [0], [1], [0, 0, 1, 1], [], []>} : vector<8x128xbf16>, vector<128x256xbf16>, vector<8x256xf32> -> vector<8x256xf32>
    %c0_70 = arith.constant 0 : index
    %c0_71 = arith.constant 0 : index
    %139 = vector.load %arg10[%c0_70, %c0_71] : memref<1x256xf32, #tpu.memory_space<vmem>>, vector<1x256xf32>
    %140 = vector.broadcast %139 : vector<1x256xf32> to vector<8x256xf32>
    %141 = arith.addf %138, %140 : vector<8x256xf32>
    %cst_72 = arith.constant 5.000000e-01 : f32
    %142 = vector.broadcast %cst_72 : f32 to vector<8x256xf32>
    %143 = arith.mulf %142, %141 : vector<8x256xf32>
    %cst_73 = arith.constant 4.471500e-02 : f32
    %144 = vector.broadcast %cst_73 : f32 to vector<8x256xf32>
    %145 = arith.mulf %144, %141 : vector<8x256xf32>
    %146 = arith.mulf %145, %141 : vector<8x256xf32>
    %147 = arith.mulf %146, %141 : vector<8x256xf32>
    %148 = arith.addf %141, %147 : vector<8x256xf32>
    %cst_74 = arith.constant 0.797884583 : f32
    %149 = vector.broadcast %cst_74 : f32 to vector<8x256xf32>
    %150 = arith.mulf %149, %148 : vector<8x256xf32>
    %151 = math.tanh %150 : vector<8x256xf32>
    %cst_75 = arith.constant 1.000000e+00 : f32
    %152 = vector.broadcast %cst_75 : f32 to vector<8x256xf32>
    %153 = arith.addf %152, %151 : vector<8x256xf32>
    %154 = arith.mulf %143, %153 : vector<8x256xf32>
    %c0_76 = arith.constant 0 : index
    %c0_77 = arith.constant 0 : index
    %155 = vector.load %arg11[%c0_76, %c0_77] : memref<256x128xbf16, #tpu.memory_space<vmem>>, vector<256x128xbf16>
    %156 = arith.truncf %154 : vector<8x256xf32> to vector<8x256xbf16>
    %cst_78 = arith.constant dense<0.000000e+00> : vector<8x128xf32>
    %157 = tpu.matmul %156, %155, %cst_78 {dimension_numbers = #tpu.dot_dimension_numbers<[1], [0], [0], [1], [0, 0, 1, 1], [], []>} : vector<8x256xbf16>, vector<256x128xbf16>, vector<8x128xf32> -> vector<8x128xf32>
    %c0_79 = arith.constant 0 : index
    %c0_80 = arith.constant 0 : index
    %158 = vector.load %arg12[%c0_79, %c0_80] : memref<1x128xf32, #tpu.memory_space<vmem>>, vector<1x128xf32>
    %159 = vector.broadcast %158 : vector<1x128xf32> to vector<8x128xf32>
    %160 = arith.addf %157, %159 : vector<8x128xf32>
    %161 = arith.addf %135, %160 : vector<8x128xf32>
    %c0_81 = arith.constant 0 : index
    %c0_82 = arith.constant 0 : index
    %162 = vector.load %arg13[%c0_81, %c0_82] : memref<1x128xf32, #tpu.memory_space<vmem>>, vector<1x128xf32>
    %c0_83 = arith.constant 0 : index
    %c0_84 = arith.constant 0 : index
    %163 = vector.load %arg14[%c0_83, %c0_84] : memref<1x128xf32, #tpu.memory_space<vmem>>, vector<1x128xf32>
    %cst_85 = arith.constant dense<0.000000e+00> : vector<8xf32>
    %164 = vector.multi_reduction <add>, %161, %cst_85 [1] : vector<8x128xf32> to vector<8xf32>
    %165 = vector.shape_cast %164 : vector<8xf32> to vector<8x1xf32>
    %cst_86 = arith.constant 1.280000e+02 : f32
    %166 = vector.broadcast %cst_86 : f32 to vector<8x1xf32>
    %167 = arith.divf %165, %166 : vector<8x1xf32>
    %168 = vector.broadcast %167 : vector<8x1xf32> to vector<8x128xf32>
    %169 = arith.subf %161, %168 : vector<8x128xf32>
    %170 = arith.mulf %169, %169 : vector<8x128xf32>
    %cst_87 = arith.constant dense<0.000000e+00> : vector<8xf32>
    %171 = vector.multi_reduction <add>, %170, %cst_87 [1] : vector<8x128xf32> to vector<8xf32>
    %172 = vector.shape_cast %171 : vector<8xf32> to vector<8x1xf32>
    %cst_88 = arith.constant 1.280000e+02 : f32
    %173 = vector.broadcast %cst_88 : f32 to vector<8x1xf32>
    %174 = arith.divf %172, %173 : vector<8x1xf32>
    %cst_89 = arith.constant 9.99999996E-13 : f32
    %175 = vector.broadcast %cst_89 : f32 to vector<8x1xf32>
    %176 = arith.addf %174, %175 : vector<8x1xf32>
    %177 = math.rsqrt %176 : vector<8x1xf32>
    %178 = vector.broadcast %177 : vector<8x1xf32> to vector<8x128xf32>
    %179 = arith.mulf %169, %178 : vector<8x128xf32>
    %180 = vector.broadcast %162 : vector<1x128xf32> to vector<8x128xf32>
    %181 = arith.mulf %179, %180 : vector<8x128xf32>
    %182 = vector.broadcast %163 : vector<1x128xf32> to vector<8x128xf32>
    %183 = arith.addf %181, %182 : vector<8x128xf32>
    %c0_90 = arith.constant 0 : index
    %c0_91 = arith.constant 0 : index
    %184 = vector.load %arg15[%c0_90, %c0_91] : memref<8x128xf32, #tpu.memory_space<vmem>>, vector<8x128xf32>
    tpu.vector_store %arg15[%c0_90, %c0_91], %183 {strides = array<i32>} : memref<8x128xf32, #tpu.memory_space<vmem>>, vector<8x128xf32>,
    return
  }
  func.func @transform_0(%arg0: i32) -> (i32, i32) {
    %c0_i32 = arith.constant 0 : i32
    %c0_i32_0 = arith.constant 0 : i32
    return %arg0, %c0_i32 : i32, i32
  }
  func.func @transform_1(%arg0: i32) -> (i32, i32, i32) {
    %c0_i32 = arith.constant 0 : i32
    %c0_i32_0 = arith.constant 0 : i32
    %c0_i32_1 = arith.constant 0 : i32
    return %arg0, %c0_i32, %c0_i32_0 : i32, i32, i32
  }
  func.func @transform_2(%arg0: i32) -> (i32, i32) {
    %c0_i32 = arith.constant 0 : i32
    %c0_i32_0 = arith.constant 0 : i32
    %c0_i32_1 = arith.constant 0 : i32
    return %c0_i32, %c0_i32_0 : i32, i32
  }
  func.func @transform_3(%arg0: i32) -> (i32, i32) {
    %c0_i32 = arith.constant 0 : i32
    %c0_i32_0 = arith.constant 0 : i32
    %c0_i32_1 = arith.constant 0 : i32
    return %c0_i32, %c0_i32_0 : i32, i32
  }
  func.func @transform_4(%arg0: i32) -> (i32, i32) {
    %c0_i32 = arith.constant 0 : i32
    %c0_i32_0 = arith.constant 0 : i32
    %c0_i32_1 = arith.constant 0 : i32
    return %c0_i32, %c0_i32_0 : i32, i32
  }
  func.func @transform_5(%arg0: i32) -> (i32, i32) {
    %c0_i32 = arith.constant 0 : i32
    %c0_i32_0 = arith.constant 0 : i32
    %c0_i32_1 = arith.constant 0 : i32
    return %c0_i32, %c0_i32_0 : i32, i32
  }
  func.func @transform_6(%arg0: i32) -> (i32, i32) {
    %c0_i32 = arith.constant 0 : i32
    %c0_i32_0 = arith.constant 0 : i32
    %c0_i32_1 = arith.constant 0 : i32
    return %c0_i32, %c0_i32_0 : i32, i32
  }
  func.func @transform_7(%arg0: i32) -> (i32, i32) {
    %c0_i32 = arith.constant 0 : i32
    %c0_i32_0 = arith.constant 0 : i32
    %c0_i32_1 = arith.constant 0 : i32
    return %c0_i32, %c0_i32_0 : i32, i32
  }
  func.func @transform_8(%arg0: i32) -> (i32, i32) {
    %c0_i32 = arith.constant 0 : i32
    %c0_i32_0 = arith.constant 0 : i32
    %c0_i32_1 = arith.constant 0 : i32
    return %c0_i32, %c0_i32_0 : i32, i32
  }
  func.func @transform_9(%arg0: i32) -> (i32, i32) {
    %c0_i32 = arith.constant 0 : i32
    %c0_i32_0 = arith.constant 0 : i32
    %c0_i32_1 = arith.constant 0 : i32
    return %c0_i32, %c0_i32_0 : i32, i32
  }
  func.func @transform_10(%arg0: i32) -> (i32, i32) {
    %c0_i32 = arith.constant 0 : i32
    %c0_i32_0 = arith.constant 0 : i32
    %c0_i32_1 = arith.constant 0 : i32
    return %c0_i32, %c0_i32_0 : i32, i32
  }
  func.func @transform_11(%arg0: i32) -> (i32, i32) {
    %c0_i32 = arith.constant 0 : i32
    %c0_i32_0 = arith.constant 0 : i32
    %c0_i32_1 = arith.constant 0 : i32
    return %c0_i32, %c0_i32_0 : i32, i32
  }
  func.func @transform_12(%arg0: i32) -> (i32, i32) {
    %c0_i32 = arith.constant 0 : i32
    %c0_i32_0 = arith.constant 0 : i32
    %c0_i32_1 = arith.constant 0 : i32
    return %c0_i32, %c0_i32_0 : i32, i32
  }
  func.func @transform_13(%arg0: i32) -> (i32, i32) {
    %c0_i32 = arith.constant 0 : i32
    %c0_i32_0 = arith.constant 0 : i32
    %c0_i32_1 = arith.constant 0 : i32
    return %c0_i32, %c0_i32_0 : i32, i32
  }
  func.func @transform_14(%arg0: i32) -> (i32, i32) {
    %c0_i32 = arith.constant 0 : i32
    %c0_i32_0 = arith.constant 0 : i32
    return %arg0, %c0_i32 : i32, i32
  }
}

module attributes {stable_mosaic.version = 11 : i64} {
  func.func @_pooler_head_kernel(%arg0: memref<2x128xf32, #tpu.memory_space<vmem>>, %arg1: memref<128x128xf32, #tpu.memory_space<vmem>>, %arg2: memref<1x128xf32, #tpu.memory_space<vmem>>, %arg3: memref<1x128xf32, #tpu.memory_space<vmem>>, %arg4: memref<1x128xf32, #tpu.memory_space<vmem>>, %arg5: memref<128x128xf32, #tpu.memory_space<vmem>>, %arg6: memref<1x128xf32, #tpu.memory_space<vmem>>, %arg7: memref<128x64xf32, #tpu.memory_space<vmem>>, %arg8: memref<1x64xf32, #tpu.memory_space<vmem>>, %arg9: memref<64x1xf32, #tpu.memory_space<vmem>>, %arg10: memref<1x1xf32, #tpu.memory_space<vmem>>, %arg11: memref<2x1xf32, #tpu.memory_space<vmem>>) attributes {dimension_semantics = [], scalar_prefetch = 0 : i64, scratch_operands = 0 : i64, tpu.core_type = #tpu.core_type<tc>} {
    %c0 = arith.constant 0 : index
    %c0_0 = arith.constant 0 : index
    %0 = vector.load %arg0[%c0, %c0_0] : memref<2x128xf32, #tpu.memory_space<vmem>>, vector<2x128xf32>
    %c0_1 = arith.constant 0 : index
    %c0_2 = arith.constant 0 : index
    %1 = vector.load %arg1[%c0_1, %c0_2] : memref<128x128xf32, #tpu.memory_space<vmem>>, vector<128x128xf32>
    %cst = arith.constant dense<0.000000e+00> : vector<2x128xf32>
    %2 = tpu.matmul %0, %1, %cst {dimension_numbers = #tpu.dot_dimension_numbers<[1], [0], [0], [1], [0, 0, 1, 1], [], []>} : vector<2x128xf32>, vector<128x128xf32>, vector<2x128xf32> -> vector<2x128xf32>
    %c0_3 = arith.constant 0 : index
    %c0_4 = arith.constant 0 : index
    %3 = vector.load %arg2[%c0_3, %c0_4] : memref<1x128xf32, #tpu.memory_space<vmem>>, vector<1x128xf32>
    %4 = vector.broadcast %3 : vector<1x128xf32> to vector<2x128xf32>
    %5 = arith.addf %2, %4 : vector<2x128xf32>
    %6 = math.tanh %5 : vector<2x128xf32>
    %c0_5 = arith.constant 0 : index
    %c0_6 = arith.constant 0 : index
    %7 = vector.load %arg3[%c0_5, %c0_6] : memref<1x128xf32, #tpu.memory_space<vmem>>, vector<1x128xf32>
    %c0_7 = arith.constant 0 : index
    %c0_8 = arith.constant 0 : index
    %8 = vector.load %arg4[%c0_7, %c0_8] : memref<1x128xf32, #tpu.memory_space<vmem>>, vector<1x128xf32>
    %cst_9 = arith.constant dense<0.000000e+00> : vector<2xf32>
    %9 = vector.multi_reduction <add>, %6, %cst_9 [1] : vector<2x128xf32> to vector<2xf32>
    %10 = vector.shape_cast %9 : vector<2xf32> to vector<2x1xf32>
    %cst_10 = arith.constant 1.280000e+02 : f32
    %11 = vector.broadcast %cst_10 : f32 to vector<2x1xf32>
    %12 = arith.divf %10, %11 : vector<2x1xf32>
    %13 = vector.broadcast %12 : vector<2x1xf32> to vector<2x128xf32>
    %14 = arith.subf %6, %13 : vector<2x128xf32>
    %15 = arith.mulf %14, %14 : vector<2x128xf32>
    %cst_11 = arith.constant dense<0.000000e+00> : vector<2xf32>
    %16 = vector.multi_reduction <add>, %15, %cst_11 [1] : vector<2x128xf32> to vector<2xf32>
    %17 = vector.shape_cast %16 : vector<2xf32> to vector<2x1xf32>
    %cst_12 = arith.constant 1.280000e+02 : f32
    %18 = vector.broadcast %cst_12 : f32 to vector<2x1xf32>
    %19 = arith.divf %17, %18 : vector<2x1xf32>
    %cst_13 = arith.constant 9.99999974E-6 : f32
    %20 = vector.broadcast %cst_13 : f32 to vector<2x1xf32>
    %21 = arith.addf %19, %20 : vector<2x1xf32>
    %22 = math.rsqrt %21 : vector<2x1xf32>
    %23 = vector.broadcast %22 : vector<2x1xf32> to vector<2x128xf32>
    %24 = arith.mulf %14, %23 : vector<2x128xf32>
    %25 = vector.broadcast %7 : vector<1x128xf32> to vector<2x128xf32>
    %26 = arith.mulf %24, %25 : vector<2x128xf32>
    %27 = vector.broadcast %8 : vector<1x128xf32> to vector<2x128xf32>
    %28 = arith.addf %26, %27 : vector<2x128xf32>
    %c0_14 = arith.constant 0 : index
    %c0_15 = arith.constant 0 : index
    %29 = vector.load %arg5[%c0_14, %c0_15] : memref<128x128xf32, #tpu.memory_space<vmem>>, vector<128x128xf32>
    %cst_16 = arith.constant dense<0.000000e+00> : vector<2x128xf32>
    %30 = tpu.matmul %28, %29, %cst_16 {dimension_numbers = #tpu.dot_dimension_numbers<[1], [0], [0], [1], [0, 0, 1, 1], [], []>} : vector<2x128xf32>, vector<128x128xf32>, vector<2x128xf32> -> vector<2x128xf32>
    %c0_17 = arith.constant 0 : index
    %c0_18 = arith.constant 0 : index
    %31 = vector.load %arg6[%c0_17, %c0_18] : memref<1x128xf32, #tpu.memory_space<vmem>>, vector<1x128xf32>
    %32 = vector.broadcast %31 : vector<1x128xf32> to vector<2x128xf32>
    %33 = arith.addf %30, %32 : vector<2x128xf32>
    %34 = arith.negf %33 : vector<2x128xf32>
    %35 = math.exp %34 : vector<2x128xf32>
    %cst_19 = arith.constant 1.000000e+00 : f32
    %36 = vector.broadcast %cst_19 : f32 to vector<2x128xf32>
    %37 = arith.addf %36, %35 : vector<2x128xf32>
    %38 = arith.divf %36, %37 : vector<2x128xf32>
    %39 = arith.mulf %33, %38 : vector<2x128xf32>
    %c0_20 = arith.constant 0 : index
    %c0_21 = arith.constant 0 : index
    %40 = vector.load %arg7[%c0_20, %c0_21] : memref<128x64xf32, #tpu.memory_space<vmem>>, vector<128x64xf32>
    %cst_22 = arith.constant dense<0.000000e+00> : vector<2x64xf32>
    %41 = tpu.matmul %39, %40, %cst_22 {dimension_numbers = #tpu.dot_dimension_numbers<[1], [0], [0], [1], [0, 0, 1, 1], [], []>} : vector<2x128xf32>, vector<128x64xf32>, vector<2x64xf32> -> vector<2x64xf32>
    %c0_23 = arith.constant 0 : index
    %c0_24 = arith.constant 0 : index
    %42 = vector.load %arg8[%c0_23, %c0_24] : memref<1x64xf32, #tpu.memory_space<vmem>>, vector<1x64xf32>
    %43 = vector.broadcast %42 : vector<1x64xf32> to vector<2x64xf32>
    %44 = arith.addf %41, %43 : vector<2x64xf32>
    %45 = arith.negf %44 : vector<2x64xf32>
    %46 = math.exp %45 : vector<2x64xf32>
    %cst_25 = arith.constant 1.000000e+00 : f32
    %47 = vector.broadcast %cst_25 : f32 to vector<2x64xf32>
    %48 = arith.addf %47, %46 : vector<2x64xf32>
    %49 = arith.divf %47, %48 : vector<2x64xf32>
    %50 = arith.mulf %44, %49 : vector<2x64xf32>
    %c0_26 = arith.constant 0 : index
    %c0_27 = arith.constant 0 : index
    %51 = vector.load %arg9[%c0_26, %c0_27] : memref<64x1xf32, #tpu.memory_space<vmem>>, vector<64x1xf32>
    %cst_28 = arith.constant dense<0.000000e+00> : vector<2x1xf32>
    %52 = tpu.matmul %50, %51, %cst_28 {dimension_numbers = #tpu.dot_dimension_numbers<[1], [0], [0], [1], [0, 0, 1, 1], [], []>} : vector<2x64xf32>, vector<64x1xf32>, vector<2x1xf32> -> vector<2x1xf32>
    %c0_29 = arith.constant 0 : index
    %c0_30 = arith.constant 0 : index
    %53 = vector.load %arg10[%c0_29, %c0_30] : memref<1x1xf32, #tpu.memory_space<vmem>>, vector<1x1xf32>
    %54 = vector.broadcast %53 : vector<1x1xf32> to vector<2x1xf32>
    %55 = arith.addf %52, %54 : vector<2x1xf32>
    %c0_31 = arith.constant 0 : index
    %c0_32 = arith.constant 0 : index
    %56 = vector.load %arg11[%c0_31, %c0_32] : memref<2x1xf32, #tpu.memory_space<vmem>>, vector<2x1xf32>
    tpu.vector_store %arg11[%c0_31, %c0_32], %55 {strides = array<i32>} : memref<2x1xf32, #tpu.memory_space<vmem>>, vector<2x1xf32>,
    return
  }
}

</mosaic_0001>

<bundles_post_ra>
// kernel: bert_model_forward.4
= control target key start
LH: loop header
LB: loop body
LE: loop exit
PB: predicated region body
PF: predicated region fallthrough
CT: control target
= control target key end

     0   :  { %v90_v2 = vmov 128.0   ;;  %s129_s0 = inlined_call_operand.vmem [shape: f32[16,128], index: 0, kind: input, shape index: {}]   ;;  %s130_s1 = inlined_call_operand.vmem [shape: f32[1,128], index: 1, kind: input, shape index: {}]   ;;  %s131_s2 = inlined_call_operand.vmem [shape: f32[1,128], index: 2, kind: input, shape index: {}]   ;;  %s132_s3 = inlined_call_operand.vmem [shape: f32[16,128], index: 3, kind: output, shape index: {}]  }
   0x1   :  { %v14_v0 = vld [vmem:[%s129_s0] sm:$0xff]  ;;  %v15_v1 = vld [vmem:[%s129_s0 + $0x8] sm:$0xff]  ;;  %84 = vrcp.f32 %v90_v2 }
   0x2   :  { %18 = vadd.xlane.f32.xlu0 %v14_v0  ;;  %v82_v31 = vld [vmem:[%s130_s1] ss:$0 sm:$0xff] }
   0x3   :  { %v83_v34 = vld [vmem:[%s131_s2] ss:$0 sm:$0xff] }
   0x7   :  { %v85_v3 = vpop.eup %84 }
   0x8   :  { %v23_v4 = vmul.f32 128.0, %v85_v3  ;;  %vm27_vm0 = vweird.f32 %v85_v3 }
   0xa   :  { %20 = vadd.xlane.f32.xlu0 %v15_v1  ;;  %v24_v5 = vsub.f32 1.0, %v23_v4 }
   0xc   :  { %v25_v6 = vmul.f32 %v85_v3, %v24_v5 }
   0xe   :  { %v26_v7 = vadd.f32 %v85_v3, %v25_v6 }
  0x10   :  { %v28_v8 = vsel %vm27_vm0, %v85_v3, %v26_v7 }
  0x75   :  { %v19_v9 = vpop.xlane.xlu0 %18 }
  0x76   :  { %v29_v10 = vmul.f32 %v28_v8, %v19_v9 }
  0x78   :  { %v31_v11 = vsub.f32 %v14_v0, %v29_v10 }
  0x7a   :  { %v33_v12 = vmul.f32 %v31_v11, %v31_v11 }
  0x7c   :  { %35 = vadd.xlane.f32.xlu1 %v33_v12 }
  0x7d   :  { %v21_v13 = vpop.xlane.xlu0 %20 }
  0x7e   :  { %v30_v14 = vmul.f32 %v28_v8, %v21_v13 }
  0x80   :  { %v32_v15 = vsub.f32 %v15_v1, %v30_v14 }
  0x82   :  { %v34_v16 = vmul.f32 %v32_v15, %v32_v15 }
  0x84   :  { %37 = vadd.xlane.f32.xlu1 %v34_v16 }
  0xef   :  { %v36_v17 = vpop.xlane.xlu1 %35 }
  0xf0   :  { %v39_v18 = vmul.f32 %v36_v17, %v28_v8 }
  0xf2   :  { %v41_v19 = vadd.f32 1e-12, %v39_v18 }
  0xf4   :  { %86 = vrsqrt.f32 %v41_v19  ;;  %vm49_vm2 = vweird.f32 %v41_v19 }
  0xf7   :  { %v38_v20 = vpop.xlane.xlu1 %37 }
  0xf8   :  { %v40_v21 = vmul.f32 %v38_v20, %v28_v8 }
  0xfa   :  { %v87_v22 = vpop.eup %86  ;;  %v42_v23 = vadd.f32 1e-12, %v40_v21 }
  0xfb   :  { %v44_v24 = vmul.f32 %v87_v22, %v41_v19  ;;  %vm50_vm1 = vweird.f32 %v87_v22 }
  0xfc   :  { %88 = vrsqrt.f32 %v42_v23  ;;  %vm51_vm3 = vmor %vm49_vm2, %vm50_vm1  ;;  %vm59_vm5 = vweird.f32 %v42_v23 }
  0xfd   :  { %v45_v25 = vmul.f32 %v87_v22, %v44_v24 }
  0xff   :  { %v46_v26 = vmul.f32 0.5, %v45_v25 }
 0x101   :  { %v47_v27 = vsub.f32 1.5, %v46_v26 }
 0x102   :  { %v89_v28 = vpop.eup %88 }
 0x103   :  { %v48_v29 = vmul.f32 %v87_v22, %v47_v27  ;;  %v54_v30 = vmul.f32 %v89_v28, %v42_v23  ;;  %vm60_vm4 = vweird.f32 %v89_v28 }
 0x104   :  { %vm61_vm6 = vmor %vm59_vm5, %vm60_vm4 }
 0x105   :  { %v52_v32 = vsel %vm51_vm3, %v87_v22, %v48_v29  ;;  %v55_v33 = vmul.f32 %v89_v28, %v54_v30 }
 0x106   :  { %v63_v35 = vmul.f32 %v52_v32, %v31_v11 }
 0x107   :  { %v56_v36 = vmul.f32 0.5, %v55_v33 }
 0x108   :  { %v68_v37 = vmul.f32 %v82_v31, %v63_v35 }
 0x109   :  { %v57_v38 = vsub.f32 1.5, %v56_v36 }
 0x10a   :  { %v73_v39 = vadd.f32 %v83_v34, %v68_v37 }
 0x10b   :  { %v58_v40 = vmul.f32 %v89_v28, %v57_v38 }
 0x10c   :  { %75 = vst [vmem:[%s132_s3] sm:$0xff] %v73_v39 }
 0x10d   :  { %v62_v41 = vsel %vm61_vm6, %v89_v28, %v58_v40 }
 0x10e   :  { %v64_v42 = vmul.f32 %v62_v41, %v32_v15 }
 0x110   :  { %v69_v43 = vmul.f32 %v82_v31, %v64_v42 }
 0x112   :  { %v74_v44 = vadd.f32 %v83_v34, %v69_v43 }
 0x114   :  { %76 = vst [vmem:[%s132_s3 + $0x8] sm:$0xff] %v74_v44 }

// kernel: bert_model_forward.7
= control target key start
LH: loop header
LB: loop body
LE: loop exit
PB: predicated region body
PF: predicated region fallthrough
CT: control target
= control target key end

     0   :  { %s731_s0 = inlined_call_operand.vmem [shape: f32[2,128], index: 0, kind: input, shape index: {}]   ;;  %s732_s1 = inlined_call_operand.vmem [shape: f32[128,128], index: 1, kind: input, shape index: {}]   ;;  %s733_s2 = inlined_call_operand.vmem [shape: f32[1,128], index: 2, kind: input, shape index: {}]   ;;  %s734_s3 = inlined_call_operand.hbm [shape: f32[1,128], index: 3, kind: input, shape index: {}]   ;;  %s735_s4 = inlined_call_operand.hbm [shape: f32[1,128], index: 4, kind: input, shape index: {}]   ;;  %s736_s5 = inlined_call_operand.vmem [shape: f32[128,128], index: 5, kind: input, shape index: {}]   ;;  %s737_s6 = inlined_call_operand.hbm [shape: f32[1,128], index: 6, kind: input, shape index: {}]   ;;  %s738_s7 = inlined_call_operand.vmem [shape: f32[128,64], index: 7, kind: input, shape index: {}]   ;;  %s739_s8 = inlined_call_operand.hbm [shape: f32[1,64], index: 8, kind: input, shape index: {}]   ;;  %s740_s9 = inlined_call_operand.vmem [shape: f32[64,1], index: 9, kind: input, shape index: {}]   ;;  %s741_s10 = inlined_call_operand.<no memory space> [shape: f32[1,1], index: 10, kind: input, shape index: {}]   ;;  %s742_s11 = inlined_call_operand.vmem [shape: f32[2,1], index: 11, kind: output, shape index: {}]  }
   0x1   :  { %v16_v0 = vstv %s741_s10 }
   0x2   :  { %17 = vst [vmem:[#allocation2] sm:$0x1] %v16_v0 }
   0x3   :  { %18 = vsyncpa [#allocation4], 0 }
   0x4   :  { %19 = vsyncpa [#allocation6], 0  ;;  %s43_s21 = sshll.u32 %s735_s4, 4  ;;  %s44_s21 = int_to_ptr.hbm [resolvable:$true] %s43_s21 }
   0x5   :  { %20 = vsyncpa [#allocation9], 0  ;;  %s472_s22 = smov [#allocation5]   ;;  %s32_s26 = sshll.u32 %s734_s3, 4  ;;  %s33_s26 = int_to_ptr.hbm [resolvable:$true] %s32_s26 }
   0x6   :  { %s45_s23 = sshll.u32 %s472_s22, 4  ;;  %s473_s27 = smov [#allocation3]   ;;  %s46_s23 = int_to_ptr.vmem [resolvable:$true] %s45_s23 }
   0x7   :  { %48 = dma.hbm_to_vmem [thread:$0]  %s44_s21, 16, %s46_s23, [#allocation6]  }
   0x8   :  { %s34_s10 = sshll.u32 %s473_s27, 4  ;;  %s56_s30 = sshll.u32 %s737_s6, 4  ;;  %s35_s10 = int_to_ptr.vmem [resolvable:$true] %s34_s10  ;;  %s57_s30 = int_to_ptr.hbm [resolvable:$true] %s56_s30 }
   0x9   :  { %37 = dma.hbm_to_vmem [thread:$0]  %s33_s26, 16, %s35_s10, [#allocation4]  }
   0xa   :  { %s69_s13 = sshll.u32 %s739_s8, 4  ;;  %s474_s14 = smov [#allocation7]   ;;  %s70_s13 = int_to_ptr.hbm [resolvable:$true] %s69_s13 }
   0xb   :  { %s58_s15 = sshll.u32 %s474_s14, 4  ;;  %s475_s3 = smov [#allocation8]   ;;  %s59_s15 = int_to_ptr.vmem [resolvable:$true] %s58_s15 }
   0xc   :  { %61 = dma.hbm_to_vmem [thread:$0]  %s57_s30, 16, %s59_s15, [#allocation6]  }
   0xd   :  { %s71_s16 = sshll.u32 %s475_s3, 4  ;;  %s72_s16 = int_to_ptr.vmem [resolvable:$true] %s71_s16 }
   0xe   :  { %74 = dma.hbm_to_vmem [thread:$0]  %s70_s13, 16, %s72_s16, [#allocation9]  }
   0xf   :  { %466 = dma.done.wait [#allocation4], 16  }
  0x10   :  { %467 = vsyncadd [#allocation4], 4294967280 }
  0x11   :  { %468 = dma.done.wait [#allocation6], 32  }
  0x12   :  { %469 = vsyncadd [#allocation6], 4294967264 }
  0x13   :  { %470 = dma.done.wait [#allocation9], 16  }
  0x14   :  { %471 = vsyncadd [#allocation9], 4294967280  ;;  %v111_v1 = vld [vmem:[%s732_s1 + $0x78] sm:$0xff]  ;;  %v110_v2 = vld [vmem:[%s732_s1 + $0x70] sm:$0xff]  ;;  %vm139_vm0 = vcmask 1041408   ;;  %v476_v23 = vmov 128.0  }
  0x15   :  { %116 = vmatpush.msra.mxu0 %v111_v1  ;;  %v109_v3 = vld [vmem:[%s732_s1 + $0x68] sm:$0xff]  ;;  %v108_v4 = vld [vmem:[%s732_s1 + $0x60] sm:$0xff]  ;;  %v107_v5 = vld [vmem:[%s732_s1 + $0x58] sm:$0xff]  ;;  %vm309_vm13 = vcmask 523264   ;;  %vm333_vm14 = vcmask 1024  }
  0x16   :  { %v106_v6 = vld [vmem:[%s732_s1 + $0x50] sm:$0xff]  ;;  %v105_v7 = vld [vmem:[%s732_s1 + $0x48] sm:$0xff]  ;;  %v104_v8 = vld [vmem:[%s732_s1 + $0x40] sm:$0xff] }
  0x17   :  { %117 = vmatpush.msra.mxu0 %v110_v2  ;;  %v103_v9 = vld [vmem:[%s732_s1 + $0x38] sm:$0xff]  ;;  %v102_v10 = vld [vmem:[%s732_s1 + $0x30] sm:$0xff]  ;;  %v101_v11 = vld [vmem:[%s732_s1 + $0x28] sm:$0xff] }
  0x18   :  { %v100_v12 = vld [vmem:[%s732_s1 + $0x20] sm:$0xff]  ;;  %v99_v13 = vld [vmem:[%s732_s1 + $0x18] sm:$0xff]  ;;  %v98_v14 = vld [vmem:[%s732_s1 + $0x10] sm:$0xff] }
  0x19   :  { %118 = vmatpush.msra.mxu0 %v109_v3  ;;  %v97_v15 = vld [vmem:[%s732_s1 + $0x8] sm:$0xff]  ;;  %v96_v16 = vld [vmem:[%s732_s1] sm:$0xff]  ;;  %v192_v24 = vld [vmem:[%s736_s5 + $0x78] sm:$0xff] }
  0x1a   :  { %v95_v17 = vld [vmem:[%s731_s0] sm:$0x3]  ;;  %v191_v25 = vld [vmem:[%s736_s5 + $0x70] sm:$0xff]  ;;  %197 = vmatpush.msra.mxu1 %v192_v24  ;;  %v190_v37 = vld [vmem:[%s736_s5 + $0x68] sm:$0xff] }
  0x1b   :  { %119 = vmatpush.msra.mxu0 %v108_v4  ;;  %v350_v18 = vld [vmem:[%s733_s2] ss:$0 sm:$0xff]  ;;  %v188_v39 = vld [vmem:[%s736_s5 + $0x58] sm:$0xff]  ;;  %v187_v40 = vld [vmem:[%s736_s5 + $0x50] sm:$0xff] }
  0x1c   :  { %198 = vmatpush.msra.mxu1 %v191_v25  ;;  %v189_v38 = vld [vmem:[%s736_s5 + $0x60] sm:$0xff]  ;;  %v186_v41 = vld [vmem:[%s736_s5 + $0x48] sm:$0xff]  ;;  %v184_v43 = vld [vmem:[%s736_s5 + $0x38] sm:$0xff] }
  0x1d   :  { %120 = vmatpush.msra.mxu0 %v107_v5  ;;  %v185_v42 = vld [vmem:[%s736_s5 + $0x40] sm:$0xff]  ;;  %v183_v44 = vld [vmem:[%s736_s5 + $0x30] sm:$0xff]  ;;  %v182_v45 = vld [vmem:[%s736_s5 + $0x28] sm:$0xff] }
  0x1e   :  { %199 = vmatpush.msra.mxu1 %v190_v37  ;;  %v181_v46 = vld [vmem:[%s736_s5 + $0x20] sm:$0xff]  ;;  %v180_v47 = vld [vmem:[%s736_s5 + $0x18] sm:$0xff]  ;;  %v179_v48 = vld [vmem:[%s736_s5 + $0x10] sm:$0xff] }
  0x1f   :  { %121 = vmatpush.msra.mxu0 %v106_v6  ;;  %v178_v49 = vld [vmem:[%s736_s5 + $0x8] sm:$0xff]  ;;  %v177_v50 = vld [vmem:[%s736_s5] sm:$0xff]  ;;  %v252_v2 = vld [vmem:[%s738_s7 + $0x78] sm:$0xff] }
  0x20   :  { %200 = vmatpush.msra.mxu1 %v189_v38  ;;  %v351_v60 = vld [vmem:[#allocation3] ss:$0 sm:$0xff]  ;;  %v352_v63 = vld [vmem:[#allocation5] ss:$0 sm:$0xff]  ;;  %257 = vmatpush.msra.mxu2 %v252_v2  ;;  %v251_v3 = vld [vmem:[%s738_s7 + $0x70] sm:$0xff] }
  0x21   :  { %122 = vmatpush.msra.mxu0 %v105_v7  ;;  %v250_v4 = vld [vmem:[%s738_s7 + $0x68] sm:$0xff]  ;;  %v249_v5 = vld [vmem:[%s738_s7 + $0x60] sm:$0xff]  ;;  %v248_v6 = vld [vmem:[%s738_s7 + $0x58] sm:$0xff] }
  0x22   :  { %201 = vmatpush.msra.mxu1 %v188_v39  ;;  %258 = vmatpush.msra.mxu2 %v251_v3  ;;  %v247_v7 = vld [vmem:[%s738_s7 + $0x50] sm:$0xff]  ;;  %v302_v37 = vld [vmem:[%s740_s9 + $0x28] sm:$0xff]  ;;  %v301_v38 = vld [vmem:[%s740_s9 + $0x20] sm:$0xff] }
  0x23   :  { %123 = vmatpush.msra.mxu0 %v104_v8  ;;  %v246_v8 = vld [vmem:[%s738_s7 + $0x48] sm:$0xff]  ;;  %v300_v39 = vld [vmem:[%s740_s9 + $0x18] sm:$0xff] }
  0x24   :  { %202 = vmatpush.msra.mxu1 %v187_v40  ;;  %259 = vmatpush.msra.mxu2 %v250_v4  ;;  %v299_v40 = vld [vmem:[%s740_s9 + $0x10] sm:$0xff] }
  0x25   :  { %124 = vmatpush.msra.mxu0 %v103_v9  ;;  %v245_v9 = vld [vmem:[%s738_s7 + $0x40] sm:$0xff] }
  0x26   :  { %203 = vmatpush.msra.mxu1 %v186_v41  ;;  %260 = vmatpush.msra.mxu2 %v249_v5  ;;  %v354_v41 = vld [vmem:[#allocation8] ss:$0 sm:$0xff] }
  0x27   :  { %125 = vmatpush.msra.mxu0 %v102_v10  ;;  %v244_v10 = vld [vmem:[%s738_s7 + $0x38] sm:$0xff] }
  0x28   :  { %204 = vmatpush.msra.mxu1 %v185_v42  ;;  %261 = vmatpush.msra.mxu2 %v248_v6  ;;  %v298_v42 = vld [vmem:[%s740_s9 + $0x8] sm:$0xff] }
  0x29   :  { %126 = vmatpush.msra.mxu0 %v101_v11  ;;  %v243_v11 = vld [vmem:[%s738_s7 + $0x30] sm:$0xff] }
  0x2a   :  { %205 = vmatpush.msra.mxu1 %v184_v43  ;;  %262 = vmatpush.msra.mxu2 %v247_v7  ;;  %v297_v43 = vld [vmem:[%s740_s9] sm:$0xff] }
  0x2b   :  { %127 = vmatpush.msra.mxu0 %v100_v12  ;;  %v242_v12 = vld [vmem:[%s738_s7 + $0x28] sm:$0xff] }
  0x2c   :  { %206 = vmatpush.msra.mxu1 %v183_v44  ;;  %263 = vmatpush.msra.mxu2 %v246_v8 }
  0x2d   :  { %128 = vmatpush.msra.mxu0 %v99_v13  ;;  %v241_v13 = vld [vmem:[%s738_s7 + $0x20] sm:$0xff] }
  0x2e   :  { %207 = vmatpush.msra.mxu1 %v182_v45  ;;  %264 = vmatpush.msra.mxu2 %v245_v9 }
  0x2f   :  { %129 = vmatpush.msra.mxu0 %v98_v14  ;;  %v240_v14 = vld [vmem:[%s738_s7 + $0x18] sm:$0xff] }
  0x30   :  { %208 = vmatpush.msra.mxu1 %v181_v46  ;;  %265 = vmatpush.msra.mxu2 %v244_v10 }
  0x31   :  { %130 = vmatpush.msra.mxu0 %v97_v15  ;;  %v239_v15 = vld [vmem:[%s738_s7 + $0x10] sm:$0xff] }
  0x32   :  { %209 = vmatpush.msra.mxu1 %v180_v47  ;;  %266 = vmatpush.msra.mxu2 %v243_v11 }
  0x33   :  { %131 = vmatpush.msra.mxu0 %v96_v16  ;;  %v238_v16 = vld [vmem:[%s738_s7 + $0x8] sm:$0xff] }
  0x34   :  { %132 = vmatmul.f32.vlgmr.msra.gmra.mxu0 %v95_v17  ;;  %210 = vmatpush.msra.mxu1 %v179_v48  ;;  %v353_v17 = vld [vmem:[#allocation7] ss:$0 sm:$0xff] }
  0x35   :  { %267 = vmatpush.msra.mxu2 %v242_v12 }
  0x36   :  { %211 = vmatpush.msra.mxu1 %v178_v49 }
  0x37   :  { %268 = vmatpush.msra.mxu2 %v241_v13 }
  0x38   :  { %212 = vmatpush.msra.mxu1 %v177_v50 }
  0x39   :  { %269 = vmatpush.msra.mxu2 %v240_v14 }
  0x3b   :  { %270 = vmatpush.msra.mxu2 %v239_v15 }
  0x3d   :  { %271 = vmatpush.msra.mxu2 %v238_v16 }
  0xb1   :  { %v133_v19 = vpop.f32.mrf.mxu0 }
  0xb2   :  { %v134_v20 = vadd.f32 %v350_v18, %v133_v19  ;;  %v237_v18 = vld [vmem:[%s738_s7] sm:$0xff] }
  0xb3   :  { %272 = vmatpush.msra.mxu2 %v237_v18 }
  0xb4   :  { %356 = vtanh.f32 %v134_v20 }
  0xb5   :  { %358 = vrcp.f32 %v476_v23 }
  0xba   :  { %v357_v21 = vpop.eup %356 }
  0xbb   :  { %v140_v22 = vsel %vm139_vm0, %v357_v21, 0.0  ;;  %v359_v26 = vpop.eup %358 }
  0xbc   :  { %141 = vadd.xlane.f32.xlu0 %v140_v22  ;;  %v144_v27 = vmul.f32 128.0, %v359_v26  ;;  %vm148_vm1 = vweird.f32 %v359_v26 }
  0xbe   :  { %v145_v28 = vsub.f32 1.0, %v144_v27 }
  0xc0   :  { %v146_v29 = vmul.f32 %v359_v26, %v145_v28 }
  0xc2   :  { %v147_v30 = vadd.f32 %v359_v26, %v146_v29 }
  0xc4   :  { %v149_v31 = vsel %vm148_vm1, %v359_v26, %v147_v30 }
 0x12f   :  { %v142_v32 = vpop.xlane.xlu0 %141 }
 0x130   :  { %v150_v33 = vmul.f32 %v149_v31, %v142_v32 }
 0x132   :  { %v151_v34 = vsub.f32 %v357_v21, %v150_v33 }
 0x134   :  { %v152_v35 = vmul.f32 %v151_v34, %v151_v34 }
 0x136   :  { %v153_v36 = vsel %vm139_vm0, %v152_v35, 0.0  ;;  %v304_v35 = vld [vmem:[%s740_s9 + $0x38] sm:$0xff] }
 0x137   :  { %154 = vadd.xlane.f32.xlu0 %v153_v36  ;;  %321 = vmatpush.msra.mxu3 %v304_v35  ;;  %v303_v36 = vld [vmem:[%s740_s9 + $0x30] sm:$0xff] }
 0x139   :  { %322 = vmatpush.msra.mxu3 %v303_v36 }
 0x13b   :  { %323 = vmatpush.msra.mxu3 %v302_v37 }
 0x13d   :  { %324 = vmatpush.msra.mxu3 %v301_v38 }
 0x13f   :  { %325 = vmatpush.msra.mxu3 %v300_v39 }
 0x141   :  { %326 = vmatpush.msra.mxu3 %v299_v40 }
 0x143   :  { %327 = vmatpush.msra.mxu3 %v298_v42 }
 0x145   :  { %328 = vmatpush.msra.mxu3 %v297_v43 }
 0x1aa   :  { %v155_v51 = vpop.xlane.xlu0 %154 }
 0x1ab   :  { %v156_v52 = vmul.f32 %v155_v51, %v149_v31 }
 0x1ad   :  { %v157_v53 = vadd.f32 1e-05, %v156_v52 }
 0x1af   :  { %360 = vrsqrt.f32 %v157_v53  ;;  %vm164_vm3 = vweird.f32 %v157_v53 }
 0x1b5   :  { %v361_v54 = vpop.eup %360 }
 0x1b6   :  { %v159_v55 = vmul.f32 %v361_v54, %v157_v53  ;;  %vm165_vm2 = vweird.f32 %v361_v54 }
 0x1b7   :  { %vm166_vm4 = vmor %vm164_vm3, %vm165_vm2 }
 0x1b8   :  { %v160_v56 = vmul.f32 %v361_v54, %v159_v55 }
 0x1ba   :  { %v161_v57 = vmul.f32 0.5, %v160_v56 }
 0x1bc   :  { %v162_v58 = vsub.f32 1.5, %v161_v57 }
 0x1be   :  { %v163_v59 = vmul.f32 %v361_v54, %v162_v58 }
 0x1c0   :  { %v167_v61 = vsel %vm166_vm4, %v361_v54, %v163_v59 }
 0x1c1   :  { %v168_v62 = vmul.f32 %v167_v61, %v151_v34 }
 0x1c3   :  { %v172_v0 = vmul.f32 %v351_v60, %v168_v62  ;;  %v355_v60 = vld [vmem:[#allocation2] ss:$0 sm:$0xff] }
 0x1c5   :  { %v176_v1 = vadd.f32 %v352_v63, %v172_v0 }
 0x1c7   :  { %213 = vmatmul.f32.vlgmr.msra.gmra.mxu1 %v176_v1 }
 0x244   :  { %v214_v19 = vpop.f32.mrf.mxu1 }
 0x245   :  { %v215_v20 = vadd.f32 %v353_v17, %v214_v19 }
 0x247   :  { %v342_v21 = vmul.f32 -1.442695, %v215_v20 }
 0x249   :  { %362 = vpow2.f32 %v342_v21 }
 0x24f   :  { %v363_v22 = vpop.eup %362 }
 0x250   :  { %v220_v23 = vadd.f32 1.0, %v363_v22 }
 0x252   :  { %364 = vrcp.f32 %v220_v23  ;;  %v232_v27 = vand.u32 2147483648, %v220_v23  ;;  %v230_v29 = vand.u32 2147483647, %v220_v23  ;;  %vm226_vm6 = vweird.f32 %v220_v23 }
 0x254   :  { %v233_v31 = vor.u32 1.1754944e-38, %v232_v27  ;;  %vm231_vm8 = vcmp.eq.f32.partialorder %v230_v29, 8.507059e+37 }
 0x258   :  { %v365_v24 = vpop.eup %364 }
 0x259   :  { %v222_v25 = vmul.f32 %v365_v24, %v220_v23  ;;  %vm227_vm5 = vweird.f32 %v365_v24 }
 0x25a   :  { %vm228_vm7 = vmor %vm226_vm6, %vm227_vm5 }
 0x25b   :  { %v223_v26 = vsub.f32 1.0, %v222_v25 }
 0x25d   :  { %v224_v28 = vmul.f32 %v365_v24, %v223_v26 }
 0x25f   :  { %v225_v30 = vadd.f32 %v365_v24, %v224_v28 }
 0x261   :  { %v229_v32 = vsel %vm228_vm7, %v365_v24, %v225_v30 }
 0x262   :  { %v234_v33 = vsel %vm231_vm8, %v233_v31, %v229_v32 }
 0x263   :  { %v236_v34 = vmul.f32 %v234_v33, %v215_v20 }
 0x265   :  { %273 = vmatmul.f32.vlgmr.msra.gmra.mxu2 %v236_v34 }
 0x2e8   :  { %v274_v44 = vpop.f32.mrf.mxu2 }
 0x2e9   :  { %v275_v45 = vadd.f32 %v354_v41, %v274_v44 }
 0x2eb   :  { %v343_v46 = vmul.f32 -1.442695, %v275_v45 }
 0x2ed   :  { %366 = vpow2.f32 %v343_v46 }
 0x2f3   :  { %v367_v47 = vpop.eup %366 }
 0x2f4   :  { %v280_v48 = vadd.f32 1.0, %v367_v47 }
 0x2f6   :  { %368 = vrcp.f32 %v280_v48  ;;  %v292_v52 = vand.u32 2147483648, %v280_v48  ;;  %v290_v54 = vand.u32 2147483647, %v280_v48  ;;  %vm286_vm10 = vweird.f32 %v280_v48 }
 0x2f8   :  { %v293_v56 = vor.u32 1.1754944e-38, %v292_v52  ;;  %vm291_vm12 = vcmp.eq.f32.partialorder %v290_v54, 8.507059e+37 }
 0x2fc   :  { %v369_v49 = vpop.eup %368 }
 0x2fd   :  { %v282_v50 = vmul.f32 %v369_v49, %v280_v48  ;;  %vm287_vm9 = vweird.f32 %v369_v49 }
 0x2fe   :  { %vm288_vm11 = vmor %vm286_vm10, %vm287_vm9 }
 0x2ff   :  { %v283_v51 = vsub.f32 1.0, %v282_v50 }
 0x301   :  { %v284_v53 = vmul.f32 %v369_v49, %v283_v51 }
 0x303   :  { %v285_v55 = vadd.f32 %v369_v49, %v284_v53 }
 0x305   :  { %v289_v57 = vsel %vm288_vm11, %v369_v49, %v285_v55 }
 0x306   :  { %v294_v58 = vsel %vm291_vm12, %v293_v56, %v289_v57 }
 0x307   :  { %v296_v59 = vmul.f32 %v294_v58, %v275_v45 }
 0x309   :  { %344 = vmatmul.msk.f32.vlgmr.msra.gmra.mxu3 %vm309_vm13, %v296_v59 }
 0x38c   :  { %v330_v61 = vpop.f32.mrf.mxu3 }
 0x38d   :  { %v331_v62 = vadd.f32 %v355_v60, %v330_v61 }
 0x38f   :  { %334 = vst.msk [vmem:[%s742_s11] sm:$0x3] %vm333_vm14, %v331_v62 }
 0x390   :  { %339 = vsyncpa [#allocation4], 1 }
 0x391   :  { %340 = vsyncpa [#allocation6], 1 }
 0x392   :  { %341 = vsyncpa [#allocation9], 1 }

// kernel: bert_model_forward.5
= control target key start
LH: loop header
LB: loop body
LE: loop exit
PB: predicated region body
PF: predicated region fallthrough
CT: control target
= control target key end

     0   :  { %s2497_s0 = inlined_call_operand.vmem [shape: f32[16,128], index: 0, kind: input, shape index: {}]   ;;  %s2498_s1 = inlined_call_operand.vmem [shape: f32[2,1,8], index: 1, kind: input, shape index: {}]   ;;  %s2499_s2 = inlined_call_operand.vmem [shape: bf16[128,384], index: 2, kind: input, shape index: {}]   ;;  %s2500_s3 = inlined_call_operand.vmem [shape: f32[1,384], index: 3, kind: input, shape index: {}]   ;;  %s2501_s4 = inlined_call_operand.hbm [shape: bf16[128,128], index: 4, kind: input, shape index: {}]   ;;  %s2502_s5 = inlined_call_operand.vmem [shape: f32[1,128], index: 5, kind: input, shape index: {}]   ;;  %s2503_s6 = inlined_call_operand.vmem [shape: f32[1,128], index: 6, kind: input, shape index: {}]   ;;  %s2504_s7 = inlined_call_operand.vmem [shape: f32[1,128], index: 7, kind: input, shape index: {}]   ;;  %s2505_s8 = inlined_call_operand.hbm [shape: bf16[128,256], index: 8, kind: input, shape index: {}]   ;;  %s2506_s9 = inlined_call_operand.vmem [shape: f32[1,256], index: 9, kind: input, shape index: {}]   ;;  %s2507_s10 = inlined_call_operand.hbm [shape: bf16[256,128], index: 10, kind: input, shape index: {}]   ;;  %s2508_s11 = inlined_call_operand.vmem [shape: f32[1,128], index: 11, kind: input, shape index: {}]   ;;  %s2509_s12 = inlined_call_operand.vmem [shape: f32[1,128], index: 12, kind: input, shape index: {}]   ;;  %s2510_s13 = inlined_call_operand.vmem [shape: f32[1,128], index: 13, kind: input, shape index: {}]   ;;  %s2511_s14 = inlined_call_operand.vmem [shape: f32[16,128], index: 14, kind: output, shape index: {}]  }
   0x1   :  { %2512 = sst [smem:[#allocation11_spill]] %s2501_s4 }
   0x2   :  { %2513 = sst [smem:[#allocation12_spill]] %s2505_s8 }
   0x3   :  { %19 = vsyncpa [#allocation5], 0 }
   0x4   :  { %20 = vsyncpa [#allocation7], 0  ;;  %s2193_s29 = smov 0  }
   0x5 LB: > { %s2514_s8 = sld [smem:[#allocation12_spill]]  ;;  %s2202_s17 = sadd.s32 4294967295, %s2105_s29   ;;  %s2105_s29 = sphi %s2193_s29, %s26_s29  }
   0x6   : > { %p1580_p0 = scmp.ge.s32.totalorder %s2105_s29, 1  ;;  %p361_p1 = scmp.lt.s32.totalorder %s2105_s29, 3 }
   0x7   : > { %p1943_p2 = scmp.eq.s32.totalorder %s2202_s17, 0  ;;  %s2107_s19 = smov [#allocation6]  }
   0x8   : > { %p2207_p3 = pnand %p1580_p0, %p361_p1  ;;  %s403_s20 = sshll.u32 %s2107_s19, 4  ;;  %s404_s20 = int_to_ptr.vmem [resolvable:$true] %s403_s20 }
   0x9   : > { %s2516_s4 = sld [smem:[#allocation11_spill]]  ;;  %s2108_s25 = smov [#allocation4]  }
   0xa   : > { %p1933_p4 = pneg %p2207_p3  ;;  %s380_s26 = sshll.u32 %s2108_s25, 4  ;;  %s381_s26 = int_to_ptr.vmem [resolvable:$true] %s380_s26 }
   0xb   : > { %s401_s16 = sshll.u32 %s2514_s8, 4  ;;  %s2109_s27 = smov 128   ;;  %s402_s16 = int_to_ptr.hbm [resolvable:$true] %s401_s16 }
   0xc   : > { %p2218_p5 = pnand %p1943_p2, %p1933_p4  ;;  %s2110_s28 = smov 8  }
   0xd   : > { %s418_s19 = sshll.u32 %s2507_s10, 4  ;;  %s2111_s21 = smov 64   ;;  %s419_s19 = int_to_ptr.hbm [resolvable:$true] %s418_s19 }
   0xe   : > { %1939 = dma.hbm_to_vmem [thread:$0]  (!%p2218_p5), %s402_s16, 2048, %s404_s20, [#allocation7], %s2109_s27, %s2109_s27, %s2110_s28  }
   0xf   : > { %s378_s23 = sshll.u32 %s2516_s4, 4  ;;  %s2112_s22 = smov 4   ;;  %s379_s23 = int_to_ptr.hbm [resolvable:$true] %s378_s23 }
  0x10   : > { %1936 = dma.hbm_to_vmem [thread:$0]  (!%p2218_p5), %s379_s23, 1024, %s381_s26, [#allocation5], %s2111_s21, %s2111_s21, %s2112_s22  }
  0x11   : > { %s2113_s4 = smov [#allocation8]   ;;  %458 = sbr.rel (%p2207_p3) target bundleno = 2237 (0x8bd), region = 76 }
  0x12   : > { %s420_s8 = sshll.u32 %s2113_s4, 4  ;;  %s421_s8 = int_to_ptr.vmem [resolvable:$true] %s420_s8 }
  0x13   : > { %1942 = dma.hbm_to_vmem [thread:$0]  (!%p2218_p5), %s419_s19, 2048, %s421_s8, [#allocation7], %s2111_s21, %s2111_s21, %s2112_s22  }
  0x16   : > { %2096 = dma.done.wait (%p1943_p2), [#allocation5], 1024  }
  0x17   : > { %2098 = vsyncadd (%p1943_p2), [#allocation5], 4294966272 }
  0x18   : > { %2100 = dma.done.wait (%p1943_p2), [#allocation7], 4096  }
  0x19   : > { %2102 = vsyncadd (%p1943_p2), [#allocation7], 4294963200  ;;  %v1677_v0 = vld [vmem:[%s2499_s2 + $0xa8] sm:$0xf]  ;;  %v1879_v1 = vld [vmem:[%s2499_s2 + $0xb0] sm:$0xf0] }
  0x1a   : > { %v1878_v2 = vld [vmem:[%s2499_s2 + $0xac] sm:$0xf]  ;;  %v1678_v3 = vor.u32 %v1879_v1, %v1677_v0  ;;  %v1679_v4 = vld [vmem:[%s2499_s2 + $0xb4] sm:$0xf0]  ;;  %v1665_v5 = vld [vmem:[%s2499_s2 + $0x90] sm:$0xf] }
  0x1b   : > { %v1876_v6 = vld [vmem:[%s2499_s2 + $0x98] sm:$0xf0]  ;;  %v1682_v7 = vor.u32 %v1878_v2, %v1679_v4  ;;  %v1875_v8 = vld [vmem:[%s2499_s2 + $0x94] sm:$0xf]  ;;  %v1667_v9 = vld [vmem:[%s2499_s2 + $0x9c] sm:$0xf0] }
  0x1c   : > { %699 = vmatpush.bf16.msra.mxu0 %v1678_v3  ;;  %v1666_v10 = vor.u32 %v1876_v6, %v1665_v5  ;;  %v1670_v11 = vor.u32 %v1875_v8, %v1667_v9  ;;  %v1653_v12 = vld [vmem:[%s2499_s2 + $0x78] sm:$0xf]  ;;  %v1873_v13 = vld [vmem:[%s2499_s2 + $0x80] sm:$0xf0]  ;;  %v1872_v14 = vld [vmem:[%s2499_s2 + $0x7c] sm:$0xf] }
  0x1d   : > { %712 = vmatpush.bf16.msra.mxu1 %v1682_v7  ;;  %v1655_v15 = vld [vmem:[%s2499_s2 + $0x84] sm:$0xf0]  ;;  %v1654_v16 = vor.u32 %v1873_v13, %v1653_v12  ;;  %v1641_v18 = vld [vmem:[%s2499_s2 + $0x60] sm:$0xf]  ;;  %v1870_v19 = vld [vmem:[%s2499_s2 + $0x68] sm:$0xf0] }
  0x1e   : > { %v1658_v17 = vor.u32 %v1872_v14, %v1655_v15  ;;  %v1869_v20 = vld [vmem:[%s2499_s2 + $0x64] sm:$0xf]  ;;  %v1643_v21 = vld [vmem:[%s2499_s2 + $0x6c] sm:$0xf0]  ;;  %p516_p6 = scmp.lt.s32.totalorder %s2202_s17, 1  ;;  %v1642_v22 = vor.u32 %v1870_v19, %v1641_v18  ;;  %vm747_vm0 = vcmask 261120  }
  0x1f   : > { %v1685_v23 = vld [vmem:[%s2499_s2 + $0xb0] sm:$0xf]  ;;  %v1880_v24 = vld [vmem:[%s2499_s2 + $0xb8] sm:$0xf0]  ;;  %v1673_v25 = vld [vmem:[%s2499_s2 + $0x98] sm:$0xf]  ;;  %v1646_v26 = vor.u32 %v1869_v20, %v1643_v21 }
  0x20   : > { %700 = vmatpush.bf16.msra.mxu0 %v1666_v10  ;;  %v1629_v27 = vld [vmem:[%s2499_s2 + $0x48] sm:$0xf]  ;;  %v1867_v28 = vld [vmem:[%s2499_s2 + $0x50] sm:$0xf0]  ;;  %v1686_v29 = vor.u32 %v1880_v24, %v1685_v23  ;;  %v1877_v30 = vld [vmem:[%s2499_s2 + $0xa0] sm:$0xf0] }
  0x21   : > { %713 = vmatpush.bf16.msra.mxu1 %v1670_v11  ;;  %v1866_v31 = vld [vmem:[%s2499_s2 + $0x4c] sm:$0xf]  ;;  %v1631_v32 = vld [vmem:[%s2499_s2 + $0x54] sm:$0xf0]  ;;  %s2519_s17 = smov (!%p516_p6, %s2202_s17), 1  ;;  %v1674_v33 = vor.u32 %v1877_v30, %v1673_v25  ;;  %v1630_v34 = vor.u32 %v1867_v28, %v1629_v27  ;;  %s2114_s25 = smov 64  }
  0x22   : > { %725 = vmatpush.bf16.msra.mxu2 %v1686_v29  ;;  %v1617_v35 = vld [vmem:[%s2499_s2 + $0x30] sm:$0xf]  ;;  %v1661_v36 = vld [vmem:[%s2499_s2 + $0x80] sm:$0xf]  ;;  %v1874_v37 = vld [vmem:[%s2499_s2 + $0x88] sm:$0xf0]  ;;  %v1634_v38 = vor.u32 %v1866_v31, %v1631_v32  ;;  %s522_s19 = scalar_lea.vmem %s2498_s1, %s2519_s17 }
  0x23   : > { %v1864_v39 = vld [vmem:[%s2499_s2 + $0x38] sm:$0xf0]  ;;  %v1863_v40 = vld [vmem:[%s2499_s2 + $0x34] sm:$0xf]  ;;  %v1619_v41 = vld [vmem:[%s2499_s2 + $0x3c] sm:$0xf0]  ;;  %v1662_v42 = vor.u32 %v1874_v37, %v1661_v36 }
  0x24   : > { %701 = vmatpush.bf16.msra.mxu0 %v1654_v16  ;;  %v1618_v43 = vor.u32 %v1864_v39, %v1617_v35  ;;  %v1649_v44 = vld [vmem:[%s2499_s2 + $0x68] sm:$0xf]  ;;  %v1871_v45 = vld [vmem:[%s2499_s2 + $0x70] sm:$0xf0]  ;;  %v1622_v46 = vor.u32 %v1863_v40, %v1619_v41  ;;  %v1605_v47 = vld [vmem:[%s2499_s2 + $0x18] sm:$0xf] }
  0x25   : > { %714 = vmatpush.bf16.msra.mxu1 %v1658_v17  ;;  %v1861_v48 = vld [vmem:[%s2499_s2 + $0x20] sm:$0xf0]  ;;  %v1860_v49 = vld [vmem:[%s2499_s2 + $0x1c] sm:$0xf]  ;;  %v1607_v50 = vld [vmem:[%s2499_s2 + $0x24] sm:$0xf0]  ;;  %v1650_v51 = vor.u32 %v1871_v45, %v1649_v44 }
  0x26   : > { %726 = vmatpush.bf16.msra.mxu2 %v1674_v33  ;;  %s1589_s26 = sshll.u32 %s2519_s17, 3  ;;  %v1606_v52 = vor.u32 %v1861_v48, %v1605_v47  ;;  %v1637_v53 = vld [vmem:[%s2499_s2 + $0x50] sm:$0xf]  ;;  %v1868_v54 = vld [vmem:[%s2499_s2 + $0x58] sm:$0xf0]  ;;  %v1610_v55 = vor.u32 %v1860_v49, %v1607_v50  ;;  %s2115_s27 = smov 96  }
  0x27   : > { %v1593_v56 = vld [vmem:[%s2499_s2] sm:$0xf]  ;;  %v1858_v57 = vld [vmem:[%s2499_s2 + $0x8] sm:$0xf0]  ;;  %s519_s20 = scalar_lea.vmem %s2497_s0, %s1589_s26  ;;  %v1857_v58 = vld [vmem:[%s2499_s2 + $0x4] sm:$0xf]  ;;  %v1638_v60 = vor.u32 %v1868_v54, %v1637_v53  ;;  %s526_s22 = scalar_lea.vmem %s2511_s14, %s1589_s26 }
  0x28   : > { %702 = vmatpush.bf16.msra.mxu0 %v1642_v22  ;;  %v1595_v59 = vld [vmem:[%s2499_s2 + $0xc] sm:$0xf0]  ;;  %v1594_v61 = vor.u32 %v1858_v57, %v1593_v56  ;;  %v2379_v62 = vld [vmem:[%s519_s20] sm:$0xff]  ;;  %v1625_v63 = vld [vmem:[%s2499_s2 + $0x38] sm:$0xf]  ;;  %s2116_s28 = smov 32  }
  0x29   : > { %715 = vmatpush.bf16.msra.mxu1 %v1646_v26  ;;  %v1865_v0 = vld [vmem:[%s2499_s2 + $0x40] sm:$0xf0]  ;;  %v1598_v1 = vor.u32 %v1857_v58, %v1595_v59  ;;  %v562_v2 = vpack.c.bf16 %v2379_v62, %v2379_v62  ;;  %v1613_v4 = vld [vmem:[%s2499_s2 + $0x20] sm:$0xf]  ;;  %v1862_v5 = vld [vmem:[%s2499_s2 + $0x28] sm:$0xf0] }
  0x2a   : > { %727 = vmatpush.bf16.msra.mxu2 %v1662_v42  ;;  %v1626_v3 = vor.u32 %v1865_v0, %v1625_v63  ;;  %v1614_v6 = vor.u32 %v1862_v5, %v1613_v4  ;;  %v1601_v7 = vld [vmem:[%s2499_s2 + $0x8] sm:$0xf]  ;;  %v1859_v8 = vld [vmem:[%s2499_s2 + $0x10] sm:$0xf0]  ;;  %v563_v10 = vld [vmem:[%s2500_s3] sm:$0x7] }
  0x2b   : > { %v1602_v9 = vor.u32 %v1859_v8, %v1601_v7  ;;  %v566_v11 = vperm.slane %v563_v10, 1  ;;  %v565_v14 = vperm.slane %v563_v10, 0  ;;  %v567_v23 = vperm.slane %v563_v10, 2  ;;  %v1968_v32 = vld [vmem:[%s522_s19] ss:$0 sm:$0xff] }
  0x2c   : > { %703 = vmatpush.bf16.msra.mxu0 %v1630_v34  ;;  %vm788_vm1 = vcmask 1043456   ;;  %vm772_vm2 = vcmask 64512   ;;  %vm877_vm3 = vcmask 523520   ;;  %vm950_vm4 = vcmask 785920  }
  0x2d   : > { %716 = vmatpush.bf16.msra.mxu1 %v1634_v38  ;;  %vm1023_vm5 = vcmask 1048320  }
  0x2e   : > { %728 = vmatpush.bf16.msra.mxu2 %v1650_v51 }
  0x30   : > { %704 = vmatpush.bf16.msra.mxu0 %v1618_v43 }
  0x31   : > { %717 = vmatpush.bf16.msra.mxu1 %v1622_v46 }
  0x32   : > { %729 = vmatpush.bf16.msra.mxu2 %v1638_v60 }
  0x34   : > { %705 = vmatpush.bf16.msra.mxu0 %v1606_v52 }
  0x35   : > { %718 = vmatpush.bf16.msra.mxu1 %v1610_v55 }
  0x36   : > { %730 = vmatpush.bf16.msra.mxu2 %v1626_v3 }
  0x38   : > { %706 = vmatpush.bf16.msra.mxu0 %v1594_v61 }
  0x39   : > { %719 = vmatpush.bf16.msra.mxu1 %v1598_v1 }
  0x3a   : > { %731 = vmatpush.bf16.msra.mxu2 %v1614_v6 }
  0x3b   : > { %707 = vmatmul.bf16.vlgmr.msra.gmra.mxu0 %v562_v2 }
  0x3c   : > { %720 = vmatmul.bf16.vlgmr.msra.gmra.mxu1 %v562_v2 }
  0x3e   : > { %732 = vmatpush.bf16.msra.mxu2 %v1602_v9 }
  0x41   : > { %733 = vmatmul.bf16.vlgmr.msra.gmra.mxu2 %v562_v2 }
  0xb8   : > { %v708_v12 = vpop.f32.mrf.mxu0 }
  0xb9   : > { %v721_v13 = vpop.f32.mrf.mxu1  ;;  %v709_v17 = vadd.f32 %v708_v12, %v565_v14 }
  0xba   : > { %v722_v15 = vadd.f32 %v721_v13, %v566_v11 }
  0xbb   : > { %v742_v21 = vpack.c.bf16 %v709_v17, %v709_v17 }
  0xbc   : > { %v744_v16 = vpack.c.bf16 %v722_v15, %v722_v15 }
  0xbe   : > { %889 = vrot.lane.b32.xlu2 %v744_v16, %s2114_s25  ;;  %816 = vrot.lane.b32.xlu1 %v744_v16, %s2115_s27  ;;  %v752_v18 = vsel %vm747_vm0, %v744_v16, 0 }
  0xbf   : > { %761 = vmatpush.bf16.xpose.msra.mxu3 %v752_v18 }
  0xc0   : > { %v710_v19 = vpop.f32.mrf.mxu0 }
  0xc1   : > { %v723_v20 = vpop.f32.mrf.mxu1 }
  0xc4   : > { %v734_v22 = vpop.f32.mrf.mxu2 }
  0xc5   : > { %v735_v24 = vadd.f32 %v734_v22, %v567_v23 }
  0xc6   : > { %962 = vrot.lane.b32.xlu2 %v744_v16, %s2116_s28  ;;  %813 = vrot.lane.b32.xlu1 %v742_v21, %s2115_s27 }
  0xc7   : > { %1687 = vmatmul.msk.bf16.vlgmr.msra.gmra.mxu3 %vm747_vm0, %v742_v21  ;;  %v2415_v26 = vpack.c.bf16 %v735_v24, %v735_v24 }
  0xc9   : > { %v790_v27 = vsel %vm788_vm1, %v2415_v26, 0 }
  0xca   : > { %799 = vmatpush.bf16.msrb.mxu3 %v790_v27 }
  0xcc   : > { %v736_v25 = vpop.f32.mrf.mxu2 }
  0xce   : > { %959 = vrot.lane.b32.xlu1 %v742_v21, %s2116_s28 }
 0x118   : > { %v890_v28 = vpop.permute.xlu2 %889 }
 0x119   : > { %v895_v29 = vsel %vm747_vm0, %v890_v28, 0 }
 0x11a   : > { %904 = vmatpush.bf16.xpose.msrb.mxu2 %v895_v29 }
 0x120   : > { %v963_v46 = vpop.permute.xlu2 %962 }
 0x121   : > { %v968_v48 = vsel %vm747_vm0, %v963_v46, 0  ;;  %v1887_v46 = vld [vmem:[#allocation4 + $0x30] sm:$0xff] }
 0x130   : > { %v817_v30 = vpop.permute.xlu1 %816 }
 0x131   : > { %v822_v31 = vsel %vm747_vm0, %v817_v30, 0 }
 0x132   : > { %831 = vmatpush.bf16.xpose.msra.mxu3 %v822_v31 }
 0x138   : > { %v814_v50 = vpop.permute.xlu1 %813 }
 0x140   : > { %v960_v51 = vpop.permute.xlu1 %959 }
 0x14a   : > { %v763_v33 = vpop.f32.mrf.mxu3 }
 0x14b   : > { %v767_v34 = vmul.f32 0.17677669, %v763_v33 }
 0x14d   : > { %v771_v35 = vadd.f32 %v1968_v32, %v767_v34 }
 0x14f   : > { %v773_v36 = vsel %vm772_vm2, %v771_v35, -inf }
 0x150   : > { %774 = vmax.xlane.f32.xlu0 %v773_v36 }
 0x152   : > { %v765_v37 = vpop.f32.mrf.mxu3 }
 0x1c3   : > { %v775_v38 = vpop.xlane.xlu0 %774 }
 0x1c4   : > { %v776_v39 = vsub.f32 %v771_v35, %v775_v38 }
 0x1c6   : > { %v777_v40 = vmul.f32 1.442695, %v776_v39 }
 0x1c8   : > { %1975 = vpow2.f32 %v777_v40 }
 0x1ce   : > { %v1976_v41 = vpop.eup %1975 }
 0x1cf   : > { %v779_v42 = vsel %vm772_vm2, %v1976_v41, 0.0 }
 0x1d0   : > { %780 = vadd.xlane.f32.xlu0 %v779_v42 }
 0x1e4   : > { %886 = vrot.lane.b32.xlu0 %v742_v21, %s2114_s25 }
 0x243   : > { %v781_v43 = vpop.xlane.xlu0 %780 }
 0x244   : > { %1977 = vrcp.f32 %v781_v43 }
 0x24a   : > { %v1978_v44 = vpop.eup %1977 }
 0x24b   : > { %v783_v45 = vmul.f32 %v1978_v44, %v1976_v41 }
 0x24d   : > { %v784_v47 = vpack.c.bf16 %v783_v45, %v783_v45  ;;  %v1888_v45 = vld [vmem:[#allocation4 + $0x38] sm:$0xff] }
 0x24e   : > { %1095 = vmatpush.bf16.msrb.mxu1 %v1888_v45 }
 0x24f   : > { %1688 = vmatmul.msk.bf16.vlgmr.msrb.gmra.mxu3 %vm772_vm2, %v784_v47  ;;  %v1886_v47 = vld [vmem:[#allocation4 + $0x28] sm:$0xff] }
 0x250   : > { %977 = vmatpush.bf16.xpose.msrb.mxu3 %v968_v48  ;;  %v1885_v48 = vld [vmem:[#allocation4 + $0x20] sm:$0xff] }
 0x252   : > { %1096 = vmatpush.bf16.msrb.mxu1 %v1887_v46  ;;  %v1737_v46 = vld [vmem:[#allocation6 + $0x10] sm:$0xf] }
 0x256   : > { %v887_v49 = vpop.permute.xlu0 %886  ;;  %1097 = vmatpush.bf16.msrb.mxu1 %v1886_v47  ;;  %v1892_v47 = vld [vmem:[#allocation6 + $0x14] sm:$0xf0] }
 0x257   : > { %1691 = vmatmul.msk.bf16.vlgmr.msrb.gmra.mxu2 %vm747_vm0, %v887_v49  ;;  %v1884_v49 = vld [vmem:[#allocation4 + $0x18] sm:$0xff] }
 0x25a   : > { %1098 = vmatpush.bf16.msrb.mxu1 %v1885_v48  ;;  %v1891_v48 = vld [vmem:[#allocation6 + $0x14] sm:$0xf] }
 0x25e   : > { %1099 = vmatpush.bf16.msrb.mxu1 %v1884_v49  ;;  %v1738_v49 = vor.u32 %v1892_v47, %v1737_v46 }
 0x25f   : > { %1689 = vmatmul.msk.bf16.vlgmr.msra.gmra.mxu3 %vm747_vm0, %v814_v50  ;;  %v1883_v50 = vld [vmem:[#allocation4 + $0x10] sm:$0xff] }
 0x262   : > { %1100 = vmatpush.bf16.msrb.mxu1 %v1883_v50  ;;  %v1739_v50 = vld [vmem:[#allocation6 + $0x18] sm:$0xf0] }
 0x26f   : > { %1693 = vmatmul.msk.bf16.vlgmr.msrb.gmra.mxu3 %vm747_vm0, %v960_v51 }
 0x2d2   : > { %v801_v52 = vpop.f32.mrf.mxu3 }
 0x2d3   : > { %805 = vst.msk [vmem:[#allocation3] sm:$0xff] %vm747_vm0, %v801_v52 }
 0x2da   : > { %v803_v53 = vpop.f32.mrf.mxu3  ;;  %v906_v54 = vpop.f32.mrf.mxu2 }
 0x2db   : > { %v910_v55 = vmul.f32 0.17677669, %v906_v54  ;;  %v1882_v53 = vld [vmem:[#allocation4 + $0x8] sm:$0xff]  ;;  %v1881_v54 = vld [vmem:[#allocation4] sm:$0xff] }
 0x2dc   : > { %1101 = vmatpush.bf16.msrb.mxu1 %v1882_v53  ;;  %v1742_v53 = vor.u32 %v1891_v48, %v1739_v50 }
 0x2dd   : > { %v911_v56 = vadd.f32 %v1968_v32, %v910_v55 }
 0x2df   : > { %v912_v57 = vsel %vm772_vm2, %v911_v56, -inf }
 0x2e0   : > { %913 = vmax.xlane.f32.xlu1 %v912_v57  ;;  %1102 = vmatpush.bf16.msrb.mxu1 %v1881_v54  ;;  %v1889_v54 = vld [vmem:[#allocation6 + $0x4] sm:$0xf] }
 0x2e2   : > { %v833_v58 = vpop.f32.mrf.mxu3  ;;  %v908_v59 = vpop.f32.mrf.mxu2 }
 0x2e3   : > { %v837_v60 = vmul.f32 0.17677669, %v833_v58  ;;  %v1969_v58 = vld [vmem:[%s2502_s5] ss:$0 sm:$0xff] }
 0x2e5   : > { %v838_v61 = vadd.f32 %v1968_v32, %v837_v60 }
 0x2e7   : > { %v839_v63 = vsel %vm772_vm2, %v838_v61, -inf }
 0x2e8   : > { %840 = vmax.xlane.f32.xlu2 %v839_v63 }
 0x2ea   : > { %v835_v0 = vpop.f32.mrf.mxu3 }
 0x2eb   : > { %v2117_v0 = vmov 128.0  }
 0x2f2   : > { %v979_v1 = vpop.f32.mrf.mxu3 }
 0x2f3   : > { %v983_v2 = vmul.f32 0.17677669, %v979_v1  ;;  %v1785_v1 = vld [vmem:[#allocation6 + $0x70] sm:$0xf] }
 0x2f5   : > { %v984_v3 = vadd.f32 %v1968_v32, %v983_v2  ;;  %v1904_v2 = vld [vmem:[#allocation6 + $0x74] sm:$0xf0] }
 0x2f7   : > { %v985_v4 = vsel %vm772_vm2, %v984_v3, -inf }
 0x2f8   : > { %986 = vmax.xlane.f32.xlu0 %v985_v4  ;;  %v1786_v4 = vor.u32 %v1904_v2, %v1785_v1 }
 0x2fa   : > { %v981_v5 = vpop.f32.mrf.mxu3 }
 0x2fb   : > { %v1787_v5 = vld [vmem:[#allocation6 + $0x78] sm:$0xf0] }
 0x30c   : > { %925 = vrot.lane.b32.xlu0 %v2415_v26, %s2114_s25 }
 0x353   : > { %v914_v6 = vpop.xlane.xlu1 %913 }
 0x354   : > { %v915_v7 = vsub.f32 %v911_v56, %v914_v6 }
 0x356   : > { %v916_v8 = vmul.f32 1.442695, %v915_v7 }
 0x358   : > { %1979 = vpow2.f32 %v916_v8 }
 0x35b   : > { %v841_v9 = vpop.xlane.xlu2 %840 }
 0x35c   : > { %v842_v10 = vsub.f32 %v838_v61, %v841_v9 }
 0x35e   : > { %v1980_v11 = vpop.eup %1979  ;;  %v843_v12 = vmul.f32 1.442695, %v842_v10 }
 0x35f   : > { %v918_v13 = vsel %vm772_vm2, %v1980_v11, 0.0 }
 0x360   : > { %1981 = vpow2.f32 %v843_v12  ;;  %919 = vadd.xlane.f32.xlu1 %v918_v13 }
 0x366   : > { %v1982_v14 = vpop.eup %1981 }
 0x367   : > { %v845_v15 = vsel %vm772_vm2, %v1982_v14, 0.0 }
 0x368   : > { %846 = vadd.xlane.f32.xlu2 %v845_v15 }
 0x36b   : > { %v987_v16 = vpop.xlane.xlu0 %986 }
 0x36c   : > { %v988_v17 = vsub.f32 %v984_v3, %v987_v16  ;;  %v1903_v3 = vld [vmem:[#allocation6 + $0x74] sm:$0xf]  ;;  %v1777_v16 = vld [vmem:[#allocation6 + $0x60] sm:$0xf] }
 0x36d   : > { %v1790_v6 = vor.u32 %v1903_v3, %v1787_v5 }
 0x36e   : > { %v989_v18 = vmul.f32 1.442695, %v988_v17  ;;  %v1902_v17 = vld [vmem:[#allocation6 + $0x64] sm:$0xf0] }
 0x36f   : > { %1262 = vmatpush.bf16.msra.mxu3 %v1790_v6 }
 0x370   : > { %1983 = vpow2.f32 %v989_v18  ;;  %v1901_v18 = vld [vmem:[#allocation6 + $0x64] sm:$0xf] }
 0x376   : > { %v1984_v19 = vpop.eup %1983 }
 0x377   : > { %v991_v20 = vsel %vm772_vm2, %v1984_v19, 0.0 }
 0x378   : > { %992 = vadd.xlane.f32.xlu1 %v991_v20  ;;  %v1779_v20 = vld [vmem:[#allocation6 + $0x68] sm:$0xf0] }
 0x37e   : > { %v926_v21 = vpop.permute.xlu0 %925 }
 0x37f   : > { %v931_v22 = vsel %vm788_vm1, %v926_v21, 0  ;;  %v1782_v21 = vor.u32 %v1901_v18, %v1779_v20  ;;  %v1909_v18 = vld [vmem:[#allocation8 + $0x20] sm:$0xff]  ;;  %v1916_v20 = vld [vmem:[#allocation8 + $0x58] sm:$0xff] }
 0x380   : > { %852 = vrot.lane.b32.xlu2 %v2415_v26, %s2115_s27  ;;  %940 = vmatpush.bf16.msra.mxu2 %v931_v22  ;;  %v1769_v22 = vld [vmem:[#allocation6 + $0x50] sm:$0xf] }
 0x381   : > { %1263 = vmatpush.bf16.msra.mxu3 %v1782_v21  ;;  %v1907_v21 = vld [vmem:[#allocation8 + $0x10] sm:$0xff] }
 0x384   : > { %1249 = vmatpush.bf16.msrb.mxu2 %v1786_v4 }
 0x391   : > { %998 = vrot.lane.b32.xlu1 %v2415_v26, %s2116_s28 }
 0x3d3   : > { %v920_v23 = vpop.xlane.xlu1 %919 }
 0x3d4   : > { %1985 = vrcp.f32 %v920_v23  ;;  %v1900_v23 = vld [vmem:[#allocation6 + $0x54] sm:$0xf0] }
 0x3da   : > { %v1986_v24 = vpop.eup %1985 }
 0x3db   : > { %v922_v25 = vmul.f32 %v1986_v24, %v1980_v11  ;;  %v847_v27 = vpop.xlane.xlu2 %846  ;;  %v1899_v24 = vld [vmem:[#allocation6 + $0x54] sm:$0xf] }
 0x3dc   : > { %1987 = vrcp.f32 %v847_v27  ;;  %v1771_v27 = vld [vmem:[#allocation6 + $0x58] sm:$0xf0] }
 0x3dd   : > { %v923_v28 = vpack.c.bf16 %v922_v25, %v922_v25  ;;  %v1770_v25 = vor.u32 %v1900_v23, %v1769_v22  ;;  %v1915_v22 = vld [vmem:[#allocation8 + $0x50] sm:$0xff]  ;;  %v1906_v23 = vld [vmem:[#allocation8 + $0x8] sm:$0xff] }
 0x3df   : > { %1692 = vmatmul.msk.bf16.vlgmr.msra.gmra.mxu2 %vm772_vm2, %v923_v28  ;;  %v1774_v28 = vor.u32 %v1899_v24, %v1771_v27  ;;  %v1914_v24 = vld [vmem:[#allocation8 + $0x48] sm:$0xff]  ;;  %v1913_v27 = vld [vmem:[#allocation8 + $0x40] sm:$0xff] }
 0x3e1   : > { %1264 = vmatpush.bf16.msra.mxu3 %v1774_v28  ;;  %v1163_v28 = vld [vmem:[%s2506_s9] sm:$0x3] }
 0x3e2   : > { %v1988_v29 = vpop.eup %1987 }
 0x3e3   : > { %v849_v30 = vmul.f32 %v1988_v29, %v1982_v14  ;;  %v853_v31 = vpop.permute.xlu2 %852  ;;  %v1761_v29 = vld [vmem:[#allocation6 + $0x40] sm:$0xf] }
 0x3e4   : > { %v858_v32 = vsel %vm788_vm1, %v853_v31, 0  ;;  %v1897_v31 = vld [vmem:[#allocation6 + $0x44] sm:$0xf] }
 0x3e5   : > { %867 = vmatpush.bf16.msrb.mxu0 %v858_v32  ;;  %v850_v33 = vpack.c.bf16 %v849_v30, %v849_v30  ;;  %v1898_v30 = vld [vmem:[#allocation6 + $0x44] sm:$0xf0] }
 0x3e6   : > { %v1762_v32 = vor.u32 %v1898_v30, %v1761_v29  ;;  %v1165_v29 = vperm.slane %v1163_v28, 0  ;;  %v1166_v30 = vperm.slane %v1163_v28, 1 }
 0x3e8   : > { %1690 = vmatmul.msk.bf16.vlgmr.msrb.gmra.mxu0 %vm772_vm2, %v850_v33  ;;  %v1763_v33 = vld [vmem:[#allocation6 + $0x48] sm:$0xf0] }
 0x3eb   : > { %v993_v34 = vpop.xlane.xlu1 %992 }
 0x3ec   : > { %1989 = vrcp.f32 %v993_v34  ;;  %v1766_v34 = vor.u32 %v1897_v31, %v1763_v33 }
 0x3ed   : > { %1991 = vrcp.f32 %v2117_v0  ;;  %v1919_v0 = vld [vmem:[#allocation8 + $0x70] sm:$0xff] }
 0x3ee   : > { %1265 = vmatpush.bf16.msra.mxu3 %v1766_v34 }
 0x3f2   : > { %v1990_v26 = vpop.eup %1989 }
 0x3f3   : > { %v995_v35 = vmul.f32 %v1990_v26, %v1984_v19  ;;  %v1992_v7 = vpop.eup %1991  ;;  %v1778_v19 = vor.u32 %v1902_v17, %v1777_v16  ;;  %v1753_v26 = vld [vmem:[#allocation6 + $0x30] sm:$0xf]  ;;  %v1910_v16 = vld [vmem:[#allocation8 + $0x28] sm:$0xff] }
 0x3f4   : > { %v1114_v8 = vmul.f32 128.0, %v1992_v7  ;;  %vm1118_vm6 = vweird.f32 %v1992_v7  ;;  %v1918_v17 = vld [vmem:[#allocation8 + $0x68] sm:$0xff] }
 0x3f5   : > { %v996_v38 = vpack.c.bf16 %v995_v35, %v995_v35  ;;  %1250 = vmatpush.bf16.msrb.mxu2 %v1778_v19  ;;  %v1896_v35 = vld [vmem:[#allocation6 + $0x34] sm:$0xf0]  ;;  %v1917_v19 = vld [vmem:[#allocation8 + $0x60] sm:$0xff] }
 0x3f6   : > { %v1115_v9 = vsub.f32 1.0, %v1114_v8  ;;  %v1970_v8 = vld [vmem:[%s2503_s6] ss:$0 sm:$0xff] }
 0x3f8   : > { %v1116_v10 = vmul.f32 %v1992_v7, %v1115_v9 }
 0x3f9   : > { %1251 = vmatpush.bf16.msrb.mxu2 %v1770_v25  ;;  %v1905_v25 = vld [vmem:[#allocation8] sm:$0xff] }
 0x3fa   : > { %v1117_v11 = vadd.f32 %v1992_v7, %v1116_v10 }
 0x3fc   : > { %v2455_v12 = vsel %vm1118_vm6, %v1992_v7, %v1117_v11  ;;  %v1971_v11 = vld [vmem:[%s2504_s7] ss:$0 sm:$0xff] }
 0x3fd   : > { %1252 = vmatpush.bf16.msrb.mxu2 %v1762_v32 }
 0x403   : > { %v999_v36 = vpop.permute.xlu1 %998 }
 0x404   : > { %v1004_v37 = vsel %vm788_vm1, %v999_v36, 0  ;;  %v1895_v36 = vld [vmem:[#allocation6 + $0x34] sm:$0xf] }
 0x405   : > { %1013 = vmatpush.bf16.msra.mxu0 %v1004_v37  ;;  %v1754_v37 = vor.u32 %v1896_v35, %v1753_v26 }
 0x407   : > { %1253 = vmatpush.bf16.msrb.mxu2 %v1754_v37 }
 0x408   : > { %1694 = vmatmul.msk.bf16.vlgmr.msra.gmra.mxu0 %vm772_vm2, %v996_v38  ;;  %v1755_v38 = vld [vmem:[#allocation6 + $0x38] sm:$0xf0] }
 0x462   : > { %v942_v39 = vpop.f32.mrf.mxu2 }
 0x465   : > { %v869_v40 = vpop.f32.mrf.mxu0 }
 0x466   : > { %874 = vrot.lane.b32.xlu2 %v869_v40, %s2116_s28  ;;  %v1745_v40 = vld [vmem:[#allocation6 + $0x20] sm:$0xf] }
 0x46a   : > { %v944_v41 = vpop.f32.mrf.mxu2 }
 0x46b   : > { %v1894_v41 = vld [vmem:[#allocation6 + $0x24] sm:$0xf0] }
 0x46d   : > { %v871_v42 = vpop.f32.mrf.mxu0 }
 0x46e   : > { %947 = vrot.lane.b32.xlu2 %v942_v39, %s2114_s25  ;;  %v1758_v39 = vor.u32 %v1895_v36, %v1755_v38  ;;  %v1893_v42 = vld [vmem:[#allocation6 + $0x24] sm:$0xf] }
 0x470   : > { %1266 = vmatpush.bf16.msra.mxu3 %v1758_v39 }
 0x485   : > { %v1015_v43 = vpop.f32.mrf.mxu0 }
 0x486   : > { %1020 = vrot.lane.b32.xlu0 %v1015_v43, %s2115_s27  ;;  %v1746_v43 = vor.u32 %v1894_v41, %v1745_v40 }
 0x488   : > { %1254 = vmatpush.bf16.msrb.mxu2 %v1746_v43 }
 0x48c   : > { %1255 = vmatpush.bf16.msrb.mxu2 %v1738_v49 }
 0x48d   : > { %v1017_v44 = vpop.f32.mrf.mxu0 }
 0x48e   : > { %v1747_v44 = vld [vmem:[#allocation6 + $0x28] sm:$0xf0] }
 0x48f   : > { %v1750_v45 = vor.u32 %v1893_v42, %v1747_v44 }
 0x491   : > { %1267 = vmatpush.bf16.msra.mxu3 %v1750_v45 }
 0x495   : > { %1268 = vmatpush.bf16.msra.mxu3 %v1742_v53 }
 0x4c0   : > { %v875_v51 = vpop.permute.xlu2 %874 }
 0x4c1   : > { %878 = vst.msk [vmem:[#allocation3] sm:$0xff] %vm877_vm3, %v875_v51  ;;  %v1729_v51 = vld [vmem:[#allocation6] sm:$0xf] }
 0x4c8   : > { %v948_v52 = vpop.permute.xlu2 %947 }
 0x4c9   : > { %951 = vst.msk [vmem:[#allocation3] sm:$0xff] %vm950_vm4, %v948_v52  ;;  %v1890_v52 = vld [vmem:[#allocation6 + $0x4] sm:$0xf0] }
 0x4f8   : > { %v1021_v55 = vpop.permute.xlu0 %1020 }
 0x4f9   : > { %1024 = vst.msk [vmem:[#allocation3] sm:$0xff] %vm1023_vm5, %v1021_v55  ;;  %v1731_v55 = vld [vmem:[#allocation6 + $0x8] sm:$0xf0] }
 0x500   : > { %v1025_v56 = vld [vmem:[#allocation3] sm:$0xff] }
 0x501   : > { %v1042_v57 = vpack.c.bf16 %v1025_v56, %v1025_v56  ;;  %v1730_v56 = vor.u32 %v1890_v52, %v1729_v51 }
 0x503   : > { %1103 = vmatmul.bf16.vlgmr.msrb.gmra.mxu1 %v1042_v57  ;;  %v1734_v57 = vor.u32 %v1889_v54, %v1731_v55  ;;  %1256 = vmatpush.bf16.msrb.mxu2 %v1730_v56  ;;  %v1972_v56 = vld [vmem:[%s2508_s11] ss:$0 sm:$0xff] }
 0x505   : > { %1269 = vmatpush.bf16.msra.mxu3 %v1734_v57 }
 0x580   : > { %v1104_v59 = vpop.f32.mrf.mxu1 }
 0x581   : > { %v1105_v60 = vadd.f32 %v1969_v58, %v1104_v59  ;;  %v1912_v58 = vld [vmem:[#allocation8 + $0x38] sm:$0xff] }
 0x582   : > { %v1920_v59 = vld [vmem:[#allocation8 + $0x78] sm:$0xff]  ;;  %1427 = vmatpush.bf16.msrb.mxu0 %v1912_v58 }
 0x583   : > { %v1108_v61 = vadd.f32 %v1105_v60, %v2379_v62  ;;  %1440 = vmatpush.bf16.msra.mxu1 %v1920_v59 }
 0x585   : > { %1111 = vadd.xlane.f32.xlu2 %v1108_v61 }
 0x587   : > { %1441 = vmatpush.bf16.msra.mxu1 %v1919_v0 }
 0x588   : > { %v1106_v63 = vpop.f32.mrf.mxu1 }
 0x589   : > { %v1911_v63 = vld [vmem:[#allocation8 + $0x30] sm:$0xff] }
 0x58a   : > { %1428 = vmatpush.bf16.msrb.mxu0 %v1911_v63 }
 0x58b   : > { %1442 = vmatpush.bf16.msra.mxu1 %v1918_v17 }
 0x58e   : > { %1429 = vmatpush.bf16.msrb.mxu0 %v1910_v16 }
 0x58f   : > { %1443 = vmatpush.bf16.msra.mxu1 %v1917_v19 }
 0x592   : > { %1430 = vmatpush.bf16.msrb.mxu0 %v1909_v18 }
 0x593   : > { %1444 = vmatpush.bf16.msra.mxu1 %v1916_v20 }
 0x597   : > { %1445 = vmatpush.bf16.msra.mxu1 %v1915_v22 }
 0x59b   : > { %1446 = vmatpush.bf16.msra.mxu1 %v1914_v24 }
 0x59f   : > { %1447 = vmatpush.bf16.msra.mxu1 %v1913_v27 }
 0x5f8   : > { %v1112_v62 = vpop.xlane.xlu2 %1111 }
 0x5f9   : > { %v1120_v13 = vmul.f32 %v2455_v12, %v1112_v62 }
 0x5fb   : > { %v2458_v14 = vsub.f32 %v1108_v61, %v1120_v13 }
 0x5fd   : > { %v1122_v15 = vmul.f32 %v2458_v14, %v2458_v14 }
 0x5ff   : > { %1123 = vadd.xlane.f32.xlu0 %v1122_v15 }
 0x672   : > { %v1124_v60 = vpop.xlane.xlu0 %1123 }
 0x673   : > { %v1125_v61 = vmul.f32 %v1124_v60, %v2455_v12 }
 0x675   : > { %v1126_v1 = vadd.f32 1e-12, %v1125_v61 }
 0x677   : > { %1993 = vrsqrt.f32 %v1126_v1  ;;  %vm1133_vm8 = vweird.f32 %v1126_v1 }
 0x67d   : > { %v1994_v2 = vpop.eup %1993 }
 0x67e   : > { %v1128_v3 = vmul.f32 %v1994_v2, %v1126_v1  ;;  %vm1134_vm7 = vweird.f32 %v1994_v2 }
 0x67f   : > { %vm1135_vm9 = vmor %vm1133_vm8, %vm1134_vm7 }
 0x680   : > { %v1129_v4 = vmul.f32 %v1994_v2, %v1128_v3 }
 0x682   : > { %v1130_v5 = vmul.f32 0.5, %v1129_v4 }
 0x684   : > { %v1131_v6 = vsub.f32 1.5, %v1130_v5 }
 0x686   : > { %v1132_v7 = vmul.f32 %v1994_v2, %v1131_v6 }
 0x688   : > { %v1136_v9 = vsel %vm1135_vm9, %v1994_v2, %v1132_v7 }
 0x689   : > { %v1137_v10 = vmul.f32 %v1136_v9, %v2458_v14  ;;  %v1908_v14 = vld [vmem:[#allocation8 + $0x18] sm:$0xff] }
 0x68a   : > { %1431 = vmatpush.bf16.msrb.mxu0 %v1908_v14 }
 0x68b   : > { %v1141_v62 = vmul.f32 %v1970_v8, %v1137_v10 }
 0x68d   : > { %v2470_v13 = vadd.f32 %v1971_v11, %v1141_v62 }
 0x68e   : > { %1432 = vmatpush.bf16.msrb.mxu0 %v1907_v21 }
 0x68f   : > { %v1162_v15 = vpack.c.bf16 %v2470_v13, %v2470_v13 }
 0x691   : > { %1257 = vmatmul.bf16.vlgmr.msrb.gmra.mxu2 %v1162_v15  ;;  %1270 = vmatmul.bf16.vlgmr.msra.gmra.mxu3 %v1162_v15  ;;  %v1973_v15 = vld [vmem:[%s2509_s12] ss:$0 sm:$0xff] }
 0x692   : > { %1433 = vmatpush.bf16.msrb.mxu0 %v1906_v23 }
 0x696   : > { %1434 = vmatpush.bf16.msrb.mxu0 %v1905_v25 }
 0x714   : > { %v1258_v31 = vpop.f32.mrf.mxu2  ;;  %v1271_v32 = vpop.f32.mrf.mxu3 }
 0x715   : > { %v1259_v33 = vadd.f32 %v1258_v31, %v1165_v29  ;;  %v1272_v34 = vadd.f32 %v1271_v32, %v1166_v30 }
 0x717   : > { %v1277_v26 = vmul.f32 0.044715, %v1259_v33  ;;  %v1278_v35 = vmul.f32 0.044715, %v1272_v34  ;;  %v1275_v48 = vmul.f32 0.5, %v1259_v33  ;;  %v1276_v50 = vmul.f32 0.5, %v1272_v34 }
 0x719   : > { %v1279_v36 = vmul.f32 %v1277_v26, %v1259_v33  ;;  %v1280_v37 = vmul.f32 %v1278_v35, %v1272_v34 }
 0x71b   : > { %v1281_v38 = vmul.f32 %v1279_v36, %v1259_v33  ;;  %v1282_v39 = vmul.f32 %v1280_v37, %v1272_v34 }
 0x71c   : > { %v1260_v40 = vpop.f32.mrf.mxu2  ;;  %v1273_v41 = vpop.f32.mrf.mxu3 }
 0x71d   : > { %v1283_v42 = vadd.f32 %v1281_v38, %v1259_v33  ;;  %v1284_v43 = vadd.f32 %v1282_v39, %v1272_v34 }
 0x71f   : > { %v1285_v44 = vmul.f32 0.7978846, %v1283_v42  ;;  %v1286_v45 = vmul.f32 0.7978846, %v1284_v43 }
 0x721   : > { %1995 = vtanh.f32 %v1285_v44 }
 0x722   : > { %1997 = vtanh.f32 %v1286_v45 }
 0x727   : > { %v1996_v46 = vpop.eup %1995 }
 0x728   : > { %v1998_v47 = vpop.eup %1997  ;;  %v1289_v49 = vadd.f32 1.0, %v1996_v46 }
 0x729   : > { %v1290_v51 = vadd.f32 1.0, %v1998_v47 }
 0x72a   : > { %v1291_v52 = vmul.f32 %v1289_v49, %v1275_v48 }
 0x72b   : > { %v1292_v53 = vmul.f32 %v1290_v51, %v1276_v50 }
 0x72c   : > { %v1325_v54 = vpack.c.bf16 %v1291_v52, %v1291_v52 }
 0x72d   : > { %v1326_v55 = vpack.c.bf16 %v1292_v53, %v1292_v53 }
 0x72e   : > { %1435 = vmatmul.bf16.vlgmr.msrb.gmra.mxu0 %v1325_v54 }
 0x72f   : > { %1448 = vmatmul.bf16.vlgmr.msra.gmra.mxu1 %v1326_v55 }
 0x7ab   : > { %v1436_v57 = vpop.f32.mrf.mxu0 }
 0x7ac   : > { %v1437_v58 = vadd.f32 %v1972_v56, %v1436_v57  ;;  %v1449_v59 = vpop.f32.mrf.mxu1 }
 0x7ae   : > { %v1450_v60 = vadd.f32 %v1449_v59, %v1437_v58 }
 0x7b0   : > { %v1453_v61 = vadd.f32 %v1450_v60, %v2470_v13 }
 0x7b2   : > { %1456 = vadd.xlane.f32.xlu1 %v1453_v61 }
 0x7b3   : > { %v1438_v63 = vpop.f32.mrf.mxu0 }
 0x7b4   : > { %v1451_v0 = vpop.f32.mrf.mxu1 }
 0x825   : > { %v1457_v1 = vpop.xlane.xlu1 %1456 }
 0x826   : > { %v1458_v2 = vmul.f32 %v1457_v1, %v2455_v12 }
 0x828   : > { %v1459_v3 = vsub.f32 %v1453_v61, %v1458_v2 }
 0x82a   : > { %v1460_v4 = vmul.f32 %v1459_v3, %v1459_v3 }
 0x82c   : > { %1461 = vadd.xlane.f32.xlu2 %v1460_v4 }
 0x89f   : > { %v1462_v5 = vpop.xlane.xlu2 %1461 }
 0x8a0   : > { %v1463_v6 = vmul.f32 %v1462_v5, %v2455_v12  ;;  %v1974_v12 = vld [vmem:[%s2510_s13] ss:$0 sm:$0xff] }
 0x8a2   : > { %v1464_v7 = vadd.f32 1e-12, %v1463_v6 }
 0x8a4   : > { %1999 = vrsqrt.f32 %v1464_v7  ;;  %vm1471_vm11 = vweird.f32 %v1464_v7 }
 0x8aa   : > { %v2000_v8 = vpop.eup %1999 }
 0x8ab   : > { %v1466_v9 = vmul.f32 %v2000_v8, %v1464_v7  ;;  %vm1472_vm10 = vweird.f32 %v2000_v8 }
 0x8ac   : > { %vm1473_vm12 = vmor %vm1471_vm11, %vm1472_vm10 }
 0x8ad   : > { %v1467_v10 = vmul.f32 %v2000_v8, %v1466_v9 }
 0x8af   : > { %v1468_v11 = vmul.f32 0.5, %v1467_v10 }
 0x8b1   : > { %v1469_v62 = vsub.f32 1.5, %v1468_v11 }
 0x8b3   : > { %v1470_v13 = vmul.f32 %v2000_v8, %v1469_v62 }
 0x8b5   : > { %v1474_v16 = vsel %vm1473_vm12, %v2000_v8, %v1470_v13 }
 0x8b6   : > { %v1475_v17 = vmul.f32 %v1474_v16, %v1459_v3 }
 0x8b8   : > { %v1479_v18 = vmul.f32 %v1973_v15, %v1475_v17 }
 0x8ba   : > { %v1483_v19 = vadd.f32 %v1974_v12, %v1479_v18 }
 0x8bc   : > { %1484 = vst [vmem:[%s526_s22] sm:$0xff] %v1483_v19 }
 0x8bd PF: > { %s26_s29 = sadd.s32 1, %s2105_s29  }
 0x8be   : > { %p23_p7 = scmp.ge.s32.totalorder %s26_s29, 4  }
 0x8c0   :  { %25 = sbr.rel (!%p23_p7) target bundleno = 5 (0x5), region = 122 }
 0x8c5   :  { %1504 = vsyncpa [#allocation5], 1 }
 0x8c6   :  { %1506 = vsyncpa [#allocation5 + $0x1], 1 }
 0x8c7   :  { %1507 = vsyncpa [#allocation7], 1 }

// kernel: bert_model_forward.6
= control target key start
LH: loop header
LB: loop body
LE: loop exit
PB: predicated region body
PF: predicated region fallthrough
CT: control target
= control target key end

     0   :  { %s2643_s0 = inlined_call_operand.vmem [shape: f32[16,128], index: 0, kind: input, shape index: {}]   ;;  %s2644_s1 = inlined_call_operand.vmem [shape: f32[2,1,8], index: 1, kind: input, shape index: {}]   ;;  %s2645_s2 = inlined_call_operand.vmem [shape: bf16[128,384], index: 2, kind: input, shape index: {}]   ;;  %s2646_s3 = inlined_call_operand.vmem [shape: f32[1,384], index: 3, kind: input, shape index: {}]   ;;  %s2647_s4 = inlined_call_operand.hbm [shape: bf16[128,128], index: 4, kind: input, shape index: {}]   ;;  %s2648_s5 = inlined_call_operand.vmem [shape: f32[1,128], index: 5, kind: input, shape index: {}]   ;;  %s2649_s6 = inlined_call_operand.vmem [shape: f32[1,128], index: 6, kind: input, shape index: {}]   ;;  %s2650_s7 = inlined_call_operand.vmem [shape: f32[1,128], index: 7, kind: input, shape index: {}]   ;;  %s2651_s8 = inlined_call_operand.hbm [shape: bf16[128,256], index: 8, kind: input, shape index: {}]   ;;  %s2652_s9 = inlined_call_operand.vmem [shape: f32[1,256], index: 9, kind: input, shape index: {}]   ;;  %s2653_s10 = inlined_call_operand.hbm [shape: bf16[256,128], index: 10, kind: input, shape index: {}]   ;;  %s2654_s11 = inlined_call_operand.vmem [shape: f32[1,128], index: 11, kind: input, shape index: {}]   ;;  %s2655_s12 = inlined_call_operand.hbm [shape: f32[1,128], index: 12, kind: input, shape index: {}]   ;;  %s2656_s13 = inlined_call_operand.hbm [shape: f32[1,128], index: 13, kind: input, shape index: {}]   ;;  %s2657_s14 = inlined_call_operand.vmem [shape: f32[16,128], index: 14, kind: output, shape index: {}]  }
   0x1   :  { %2659 = sst [smem:[#allocation16_spill]] %s2647_s4 }
   0x2   :  { %2660 = sst [smem:[#allocation17_spill]] %s2651_s8 }
   0x3   :  { %2661 = sst [smem:[#allocation18_spill]] %s2655_s12 }
   0x4   :  { %19 = vsyncpa [#allocation5], 0 }
   0x5   :  { %20 = vsyncpa [#allocation7], 0 }
   0x6   :  { %21 = vsyncpa [#allocation10], 0  ;;  %s2331_s29 = smov 0  }
   0x7 LB: > { %2662 = sst [smem:[#allocation15_spill]] %s2241_s29  ;;  %s2340_s17 = sadd.s32 4294967295, %s2241_s29   ;;  %s2241_s29 = sphi %s2331_s29, %s27_s29  }
   0x8   : > { %s2663_s8 = sld [smem:[#allocation17_spill]]  ;;  %p1628_p0 = scmp.ge.s32.totalorder %s2241_s29, 1 }
   0x9   : > { %p362_p1 = scmp.lt.s32.totalorder %s2241_s29, 3  ;;  %p2009_p2 = scmp.eq.s32.totalorder %s2340_s17, 0 }
   0xa   : > { %s2243_s19 = smov [#allocation6]   ;;  %s2665_s12 = sld [smem:[#allocation18_spill]] }
   0xb   : > { %p2345_p3 = pnand %p1628_p0, %p362_p1  ;;  %s404_s20 = sshll.u32 %s2243_s19, 4  ;;  %s405_s20 = int_to_ptr.vmem [resolvable:$true] %s404_s20 }
   0xc   : > { %s2244_s25 = smov [#allocation9]   ;;  %s2667_s4 = sld [smem:[#allocation16_spill]] }
   0xd   : > { %p1993_p4 = pneg %p2345_p3  ;;  %s439_s26 = sshll.u32 %s2244_s25, 4  ;;  %s440_s26 = int_to_ptr.vmem [resolvable:$true] %s439_s26 }
   0xe   : > { %s402_s16 = sshll.u32 %s2663_s8, 4  ;;  %s2245_s15 = smov 128   ;;  %s403_s16 = int_to_ptr.hbm [resolvable:$true] %s402_s16 }
   0xf   : > { %p2356_p5 = pnand %p2009_p2, %p1993_p4  ;;  %s2246_s19 = smov 8  }
  0x10   : > { %s437_s23 = sshll.u32 %s2665_s12, 4  ;;  %s2247_s21 = smov [#allocation4]   ;;  %s438_s23 = int_to_ptr.hbm [resolvable:$true] %s437_s23 }
  0x11   : > { %1999 = dma.hbm_to_vmem [thread:$0]  (!%p2356_p5), %s403_s16, 2048, %s405_s20, [#allocation7], %s2245_s15, %s2245_s15, %s2246_s19  }
  0x12   : > { %s379_s30 = sshll.u32 %s2667_s4, 4  ;;  %s381_s22 = sshll.u32 %s2247_s21, 4  ;;  %s380_s30 = int_to_ptr.hbm [resolvable:$true] %s379_s30  ;;  %s382_s22 = int_to_ptr.vmem [resolvable:$true] %s381_s22 }
  0x13   : > { %2005 = dma.hbm_to_vmem [thread:$0]  (!%p2356_p5), %s438_s23, 16, %s440_s26, [#allocation10]  }
  0x14   : > { %s2248_s8 = smov 64   ;;  %s2249_s12 = smov 4  }
  0x15   : > { %1996 = dma.hbm_to_vmem [thread:$0]  (!%p2356_p5), %s380_s30, 1024, %s382_s22, [#allocation5], %s2248_s8, %s2248_s8, %s2249_s12  }
  0x16   : > { %s419_s28 = sshll.u32 %s2653_s10, 4  ;;  %s2250_s4 = smov [#allocation8]   ;;  %s420_s28 = int_to_ptr.hbm [resolvable:$true] %s419_s28 }
  0x17   : > { %s421_s29 = sshll.u32 %s2250_s4, 4  ;;  %s449_s23 = sshll.u32 %s2656_s13, 4  ;;  %s422_s29 = int_to_ptr.vmem [resolvable:$true] %s421_s29  ;;  %s450_s23 = int_to_ptr.hbm [resolvable:$true] %s449_s23 }
  0x18   : > { %2002 = dma.hbm_to_vmem [thread:$0]  (!%p2356_p5), %s420_s28, 2048, %s422_s29, [#allocation7], %s2248_s8, %s2248_s8, %s2249_s12  }
  0x19   : > { %s2251_s26 = smov [#allocation11]   ;;  %477 = sbr.rel (%p2345_p3) target bundleno = 2247 (0x8c7), region = 76 }
  0x1a   : > { %s451_s15 = sshll.u32 %s2251_s26, 4  ;;  %s452_s15 = int_to_ptr.vmem [resolvable:$true] %s451_s15 }
  0x1b   : > { %2008 = dma.hbm_to_vmem [thread:$0]  (!%p2356_p5), %s450_s23, 16, %s452_s15, [#allocation10]  }
  0x1e   : > { %2228 = dma.done.wait (%p2009_p2), [#allocation5], 1024  }
  0x1f   : > { %2230 = vsyncadd (%p2009_p2), [#allocation5], 4294966272 }
  0x20   : > { %2232 = dma.done.wait (%p2009_p2), [#allocation7], 4096  }
  0x21   : > { %2234 = vsyncadd (%p2009_p2), [#allocation7], 4294963200 }
  0x22   : > { %2236 = dma.done.wait (%p2009_p2), [#allocation10], 32  }
  0x23   : > { %2238 = vsyncadd (%p2009_p2), [#allocation10], 4294967264  ;;  %v1729_v0 = vld [vmem:[%s2645_s2 + $0xa8] sm:$0xf]  ;;  %v1931_v1 = vld [vmem:[%s2645_s2 + $0xb0] sm:$0xf0] }
  0x24   : > { %v1930_v2 = vld [vmem:[%s2645_s2 + $0xac] sm:$0xf]  ;;  %v1730_v3 = vor.u32 %v1931_v1, %v1729_v0  ;;  %v1731_v4 = vld [vmem:[%s2645_s2 + $0xb4] sm:$0xf0]  ;;  %v1717_v5 = vld [vmem:[%s2645_s2 + $0x90] sm:$0xf] }
  0x25   : > { %v1928_v6 = vld [vmem:[%s2645_s2 + $0x98] sm:$0xf0]  ;;  %v1734_v7 = vor.u32 %v1930_v2, %v1731_v4  ;;  %v1927_v8 = vld [vmem:[%s2645_s2 + $0x94] sm:$0xf]  ;;  %v1719_v9 = vld [vmem:[%s2645_s2 + $0x9c] sm:$0xf0] }
  0x26   : > { %728 = vmatpush.bf16.msra.mxu0 %v1730_v3  ;;  %v1718_v10 = vor.u32 %v1928_v6, %v1717_v5  ;;  %v1722_v11 = vor.u32 %v1927_v8, %v1719_v9  ;;  %v1705_v12 = vld [vmem:[%s2645_s2 + $0x78] sm:$0xf]  ;;  %v1925_v13 = vld [vmem:[%s2645_s2 + $0x80] sm:$0xf0]  ;;  %v1924_v14 = vld [vmem:[%s2645_s2 + $0x7c] sm:$0xf] }
  0x27   : > { %741 = vmatpush.bf16.msra.mxu1 %v1734_v7  ;;  %v1707_v15 = vld [vmem:[%s2645_s2 + $0x84] sm:$0xf0]  ;;  %v1706_v16 = vor.u32 %v1925_v13, %v1705_v12  ;;  %v1693_v18 = vld [vmem:[%s2645_s2 + $0x60] sm:$0xf]  ;;  %v1922_v19 = vld [vmem:[%s2645_s2 + $0x68] sm:$0xf0] }
  0x28   : > { %v1710_v17 = vor.u32 %v1924_v14, %v1707_v15  ;;  %v1921_v20 = vld [vmem:[%s2645_s2 + $0x64] sm:$0xf]  ;;  %v1695_v21 = vld [vmem:[%s2645_s2 + $0x6c] sm:$0xf0]  ;;  %p545_p6 = scmp.lt.s32.totalorder %s2340_s17, 1  ;;  %v1694_v22 = vor.u32 %v1922_v19, %v1693_v18  ;;  %vm776_vm0 = vcmask 261120  }
  0x29   : > { %v1737_v23 = vld [vmem:[%s2645_s2 + $0xb0] sm:$0xf]  ;;  %v1932_v24 = vld [vmem:[%s2645_s2 + $0xb8] sm:$0xf0]  ;;  %v1725_v25 = vld [vmem:[%s2645_s2 + $0x98] sm:$0xf]  ;;  %v1698_v26 = vor.u32 %v1921_v20, %v1695_v21 }
  0x2a   : > { %729 = vmatpush.bf16.msra.mxu0 %v1718_v10  ;;  %v1681_v27 = vld [vmem:[%s2645_s2 + $0x48] sm:$0xf]  ;;  %v1919_v28 = vld [vmem:[%s2645_s2 + $0x50] sm:$0xf0]  ;;  %v1738_v29 = vor.u32 %v1932_v24, %v1737_v23  ;;  %v1929_v30 = vld [vmem:[%s2645_s2 + $0xa0] sm:$0xf0] }
  0x2b   : > { %742 = vmatpush.bf16.msra.mxu1 %v1722_v11  ;;  %v1918_v31 = vld [vmem:[%s2645_s2 + $0x4c] sm:$0xf]  ;;  %v1683_v32 = vld [vmem:[%s2645_s2 + $0x54] sm:$0xf0]  ;;  %s2670_s17 = smov (!%p545_p6, %s2340_s17), 1  ;;  %v1726_v33 = vor.u32 %v1929_v30, %v1725_v25  ;;  %v1682_v34 = vor.u32 %v1919_v28, %v1681_v27  ;;  %s2252_s16 = smov 64  }
  0x2c   : > { %754 = vmatpush.bf16.msra.mxu2 %v1738_v29  ;;  %v1669_v35 = vld [vmem:[%s2645_s2 + $0x30] sm:$0xf]  ;;  %v1713_v36 = vld [vmem:[%s2645_s2 + $0x80] sm:$0xf]  ;;  %v1926_v37 = vld [vmem:[%s2645_s2 + $0x88] sm:$0xf0]  ;;  %v1686_v38 = vor.u32 %v1918_v31, %v1683_v32  ;;  %s551_s8 = scalar_lea.vmem %s2644_s1, %s2670_s17 }
  0x2d   : > { %v1916_v39 = vld [vmem:[%s2645_s2 + $0x38] sm:$0xf0]  ;;  %v1915_v40 = vld [vmem:[%s2645_s2 + $0x34] sm:$0xf]  ;;  %v1671_v41 = vld [vmem:[%s2645_s2 + $0x3c] sm:$0xf0]  ;;  %v1714_v42 = vor.u32 %v1926_v37, %v1713_v36 }
  0x2e   : > { %730 = vmatpush.bf16.msra.mxu0 %v1706_v16  ;;  %v1670_v43 = vor.u32 %v1916_v39, %v1669_v35  ;;  %v1701_v44 = vld [vmem:[%s2645_s2 + $0x68] sm:$0xf]  ;;  %v1923_v45 = vld [vmem:[%s2645_s2 + $0x70] sm:$0xf0]  ;;  %v1674_v46 = vor.u32 %v1915_v40, %v1671_v41  ;;  %v1657_v47 = vld [vmem:[%s2645_s2 + $0x18] sm:$0xf] }
  0x2f   : > { %743 = vmatpush.bf16.msra.mxu1 %v1710_v17  ;;  %v1913_v48 = vld [vmem:[%s2645_s2 + $0x20] sm:$0xf0]  ;;  %v1912_v49 = vld [vmem:[%s2645_s2 + $0x1c] sm:$0xf]  ;;  %v1659_v50 = vld [vmem:[%s2645_s2 + $0x24] sm:$0xf0]  ;;  %v1702_v51 = vor.u32 %v1923_v45, %v1701_v44 }
  0x30   : > { %755 = vmatpush.bf16.msra.mxu2 %v1726_v33  ;;  %s1641_s4 = sshll.u32 %s2670_s17, 3  ;;  %v1658_v52 = vor.u32 %v1913_v48, %v1657_v47  ;;  %v1689_v53 = vld [vmem:[%s2645_s2 + $0x50] sm:$0xf]  ;;  %v1920_v54 = vld [vmem:[%s2645_s2 + $0x58] sm:$0xf0]  ;;  %v1662_v55 = vor.u32 %v1912_v49, %v1659_v50  ;;  %s2253_s20 = smov 96  }
  0x31   : > { %v1645_v56 = vld [vmem:[%s2645_s2] sm:$0xf]  ;;  %v1910_v57 = vld [vmem:[%s2645_s2 + $0x8] sm:$0xf0]  ;;  %s548_s27 = scalar_lea.vmem %s2643_s0, %s1641_s4  ;;  %v1909_v58 = vld [vmem:[%s2645_s2 + $0x4] sm:$0xf]  ;;  %v1690_v60 = vor.u32 %v1920_v54, %v1689_v53 }
  0x32   : > { %731 = vmatpush.bf16.msra.mxu0 %v1694_v22  ;;  %v1647_v59 = vld [vmem:[%s2645_s2 + $0xc] sm:$0xf0]  ;;  %v1646_v61 = vor.u32 %v1910_v57, %v1645_v56  ;;  %v2531_v62 = vld [vmem:[%s548_s27] sm:$0xff]  ;;  %v1677_v63 = vld [vmem:[%s2645_s2 + $0x38] sm:$0xf]  ;;  %s2254_s23 = smov 32  }
  0x33   : > { %744 = vmatpush.bf16.msra.mxu1 %v1698_v26  ;;  %v1917_v0 = vld [vmem:[%s2645_s2 + $0x40] sm:$0xf0]  ;;  %v1650_v1 = vor.u32 %v1909_v58, %v1647_v59  ;;  %v591_v2 = vpack.c.bf16 %v2531_v62, %v2531_v62  ;;  %v1665_v4 = vld [vmem:[%s2645_s2 + $0x20] sm:$0xf]  ;;  %v1914_v5 = vld [vmem:[%s2645_s2 + $0x28] sm:$0xf0] }
  0x34   : > { %756 = vmatpush.bf16.msra.mxu2 %v1714_v42  ;;  %v1678_v3 = vor.u32 %v1917_v0, %v1677_v63  ;;  %v1666_v6 = vor.u32 %v1914_v5, %v1665_v4  ;;  %v1653_v7 = vld [vmem:[%s2645_s2 + $0x8] sm:$0xf]  ;;  %v1911_v8 = vld [vmem:[%s2645_s2 + $0x10] sm:$0xf0]  ;;  %v592_v10 = vld [vmem:[%s2646_s3] sm:$0x7] }
  0x35   : > { %v1654_v9 = vor.u32 %v1911_v8, %v1653_v7  ;;  %v595_v11 = vperm.slane %v592_v10, 1  ;;  %v594_v14 = vperm.slane %v592_v10, 0  ;;  %v596_v23 = vperm.slane %v592_v10, 2  ;;  %v2040_v32 = vld [vmem:[%s551_s8] ss:$0 sm:$0xff] }
  0x36   : > { %732 = vmatpush.bf16.msra.mxu0 %v1682_v34  ;;  %vm817_vm1 = vcmask 1043456   ;;  %vm801_vm2 = vcmask 64512   ;;  %vm906_vm3 = vcmask 523520   ;;  %vm979_vm4 = vcmask 785920  }
  0x37   : > { %745 = vmatpush.bf16.msra.mxu1 %v1686_v38  ;;  %vm1052_vm5 = vcmask 1048320  }
  0x38   : > { %757 = vmatpush.bf16.msra.mxu2 %v1702_v51 }
  0x3a   : > { %733 = vmatpush.bf16.msra.mxu0 %v1670_v43 }
  0x3b   : > { %746 = vmatpush.bf16.msra.mxu1 %v1674_v46 }
  0x3c   : > { %758 = vmatpush.bf16.msra.mxu2 %v1690_v60 }
  0x3e   : > { %734 = vmatpush.bf16.msra.mxu0 %v1658_v52 }
  0x3f   : > { %747 = vmatpush.bf16.msra.mxu1 %v1662_v55 }
  0x40   : > { %759 = vmatpush.bf16.msra.mxu2 %v1678_v3 }
  0x42   : > { %735 = vmatpush.bf16.msra.mxu0 %v1646_v61 }
  0x43   : > { %748 = vmatpush.bf16.msra.mxu1 %v1650_v1 }
  0x44   : > { %760 = vmatpush.bf16.msra.mxu2 %v1666_v6 }
  0x45   : > { %736 = vmatmul.bf16.vlgmr.msra.gmra.mxu0 %v591_v2 }
  0x46   : > { %749 = vmatmul.bf16.vlgmr.msra.gmra.mxu1 %v591_v2 }
  0x48   : > { %761 = vmatpush.bf16.msra.mxu2 %v1654_v9 }
  0x4b   : > { %762 = vmatmul.bf16.vlgmr.msra.gmra.mxu2 %v591_v2 }
  0xc2   : > { %v737_v12 = vpop.f32.mrf.mxu0 }
  0xc3   : > { %v750_v13 = vpop.f32.mrf.mxu1  ;;  %v738_v17 = vadd.f32 %v737_v12, %v594_v14 }
  0xc4   : > { %v751_v15 = vadd.f32 %v750_v13, %v595_v11 }
  0xc5   : > { %v771_v21 = vpack.c.bf16 %v738_v17, %v738_v17 }
  0xc6   : > { %v773_v16 = vpack.c.bf16 %v751_v15, %v751_v15 }
  0xc8   : > { %918 = vrot.lane.b32.xlu2 %v773_v16, %s2252_s16  ;;  %845 = vrot.lane.b32.xlu1 %v773_v16, %s2253_s20  ;;  %v781_v18 = vsel %vm776_vm0, %v773_v16, 0 }
  0xc9   : > { %790 = vmatpush.bf16.xpose.msra.mxu3 %v781_v18 }
  0xca   : > { %v739_v19 = vpop.f32.mrf.mxu0 }
  0xcb   : > { %v752_v20 = vpop.f32.mrf.mxu1 }
  0xce   : > { %v763_v22 = vpop.f32.mrf.mxu2 }
  0xcf   : > { %v764_v24 = vadd.f32 %v763_v22, %v596_v23 }
  0xd0   : > { %991 = vrot.lane.b32.xlu2 %v773_v16, %s2254_s23  ;;  %842 = vrot.lane.b32.xlu1 %v771_v21, %s2253_s20 }
  0xd1   : > { %1739 = vmatmul.msk.bf16.vlgmr.msra.gmra.mxu3 %vm776_vm0, %v771_v21  ;;  %v2567_v26 = vpack.c.bf16 %v764_v24, %v764_v24 }
  0xd3   : > { %v819_v27 = vsel %vm817_vm1, %v2567_v26, 0 }
  0xd4   : > { %828 = vmatpush.bf16.msrb.mxu3 %v819_v27 }
  0xd6   : > { %v765_v25 = vpop.f32.mrf.mxu2 }
  0xd8   : > { %988 = vrot.lane.b32.xlu1 %v771_v21, %s2254_s23 }
 0x122   : > { %v919_v28 = vpop.permute.xlu2 %918 }
 0x123   : > { %v924_v29 = vsel %vm776_vm0, %v919_v28, 0 }
 0x124   : > { %933 = vmatpush.bf16.xpose.msrb.mxu2 %v924_v29 }
 0x12a   : > { %v992_v46 = vpop.permute.xlu2 %991 }
 0x12b   : > { %v997_v48 = vsel %vm776_vm0, %v992_v46, 0  ;;  %v1939_v46 = vld [vmem:[#allocation4 + $0x30] sm:$0xff] }
 0x13a   : > { %v846_v30 = vpop.permute.xlu1 %845 }
 0x13b   : > { %v851_v31 = vsel %vm776_vm0, %v846_v30, 0 }
 0x13c   : > { %860 = vmatpush.bf16.xpose.msra.mxu3 %v851_v31 }
 0x142   : > { %v843_v50 = vpop.permute.xlu1 %842 }
 0x14a   : > { %v989_v51 = vpop.permute.xlu1 %988 }
 0x154   : > { %v792_v33 = vpop.f32.mrf.mxu3 }
 0x155   : > { %v796_v34 = vmul.f32 0.17677669, %v792_v33 }
 0x157   : > { %v800_v35 = vadd.f32 %v2040_v32, %v796_v34 }
 0x159   : > { %v802_v36 = vsel %vm801_vm2, %v800_v35, -inf }
 0x15a   : > { %803 = vmax.xlane.f32.xlu0 %v802_v36 }
 0x15c   : > { %v794_v37 = vpop.f32.mrf.mxu3 }
 0x1cd   : > { %v804_v38 = vpop.xlane.xlu0 %803 }
 0x1ce   : > { %v805_v39 = vsub.f32 %v800_v35, %v804_v38 }
 0x1d0   : > { %v806_v40 = vmul.f32 1.442695, %v805_v39 }
 0x1d2   : > { %2047 = vpow2.f32 %v806_v40 }
 0x1d8   : > { %v2048_v41 = vpop.eup %2047 }
 0x1d9   : > { %v808_v42 = vsel %vm801_vm2, %v2048_v41, 0.0 }
 0x1da   : > { %809 = vadd.xlane.f32.xlu0 %v808_v42 }
 0x1ee   : > { %915 = vrot.lane.b32.xlu0 %v771_v21, %s2252_s16 }
 0x24d   : > { %v810_v43 = vpop.xlane.xlu0 %809 }
 0x24e   : > { %2049 = vrcp.f32 %v810_v43 }
 0x254   : > { %v2050_v44 = vpop.eup %2049 }
 0x255   : > { %v812_v45 = vmul.f32 %v2050_v44, %v2048_v41 }
 0x257   : > { %v813_v47 = vpack.c.bf16 %v812_v45, %v812_v45  ;;  %v1940_v45 = vld [vmem:[#allocation4 + $0x38] sm:$0xff] }
 0x258   : > { %1124 = vmatpush.bf16.msrb.mxu1 %v1940_v45 }
 0x259   : > { %1740 = vmatmul.msk.bf16.vlgmr.msrb.gmra.mxu3 %vm801_vm2, %v813_v47  ;;  %v1938_v47 = vld [vmem:[#allocation4 + $0x28] sm:$0xff] }
 0x25a   : > { %1006 = vmatpush.bf16.xpose.msrb.mxu3 %v997_v48  ;;  %v1937_v48 = vld [vmem:[#allocation4 + $0x20] sm:$0xff] }
 0x25c   : > { %1125 = vmatpush.bf16.msrb.mxu1 %v1939_v46  ;;  %v1789_v46 = vld [vmem:[#allocation6 + $0x10] sm:$0xf] }
 0x260   : > { %v916_v49 = vpop.permute.xlu0 %915  ;;  %1126 = vmatpush.bf16.msrb.mxu1 %v1938_v47  ;;  %v1944_v47 = vld [vmem:[#allocation6 + $0x14] sm:$0xf0] }
 0x261   : > { %1743 = vmatmul.msk.bf16.vlgmr.msrb.gmra.mxu2 %vm776_vm0, %v916_v49  ;;  %v1936_v49 = vld [vmem:[#allocation4 + $0x18] sm:$0xff] }
 0x264   : > { %1127 = vmatpush.bf16.msrb.mxu1 %v1937_v48  ;;  %v1943_v48 = vld [vmem:[#allocation6 + $0x14] sm:$0xf] }
 0x268   : > { %1128 = vmatpush.bf16.msrb.mxu1 %v1936_v49  ;;  %v1790_v49 = vor.u32 %v1944_v47, %v1789_v46 }
 0x269   : > { %1741 = vmatmul.msk.bf16.vlgmr.msra.gmra.mxu3 %vm776_vm0, %v843_v50  ;;  %v1935_v50 = vld [vmem:[#allocation4 + $0x10] sm:$0xff] }
 0x26c   : > { %1129 = vmatpush.bf16.msrb.mxu1 %v1935_v50  ;;  %v1791_v50 = vld [vmem:[#allocation6 + $0x18] sm:$0xf0] }
 0x279   : > { %1745 = vmatmul.msk.bf16.vlgmr.msrb.gmra.mxu3 %vm776_vm0, %v989_v51 }
 0x2dc   : > { %v830_v52 = vpop.f32.mrf.mxu3 }
 0x2dd   : > { %834 = vst.msk [vmem:[#allocation3] sm:$0xff] %vm776_vm0, %v830_v52 }
 0x2e4   : > { %v832_v53 = vpop.f32.mrf.mxu3  ;;  %v935_v54 = vpop.f32.mrf.mxu2 }
 0x2e5   : > { %v939_v55 = vmul.f32 0.17677669, %v935_v54  ;;  %v1934_v53 = vld [vmem:[#allocation4 + $0x8] sm:$0xff]  ;;  %v1933_v54 = vld [vmem:[#allocation4] sm:$0xff] }
 0x2e6   : > { %1130 = vmatpush.bf16.msrb.mxu1 %v1934_v53  ;;  %v1794_v53 = vor.u32 %v1943_v48, %v1791_v50 }
 0x2e7   : > { %v940_v56 = vadd.f32 %v2040_v32, %v939_v55 }
 0x2e9   : > { %v941_v57 = vsel %vm801_vm2, %v940_v56, -inf }
 0x2ea   : > { %942 = vmax.xlane.f32.xlu1 %v941_v57  ;;  %1131 = vmatpush.bf16.msrb.mxu1 %v1933_v54  ;;  %v1941_v54 = vld [vmem:[#allocation6 + $0x4] sm:$0xf] }
 0x2ec   : > { %v862_v58 = vpop.f32.mrf.mxu3  ;;  %v937_v59 = vpop.f32.mrf.mxu2 }
 0x2ed   : > { %v866_v60 = vmul.f32 0.17677669, %v862_v58  ;;  %v2041_v58 = vld [vmem:[%s2648_s5] ss:$0 sm:$0xff] }
 0x2ef   : > { %v867_v61 = vadd.f32 %v2040_v32, %v866_v60 }
 0x2f1   : > { %v868_v63 = vsel %vm801_vm2, %v867_v61, -inf }
 0x2f2   : > { %869 = vmax.xlane.f32.xlu2 %v868_v63 }
 0x2f4   : > { %v864_v0 = vpop.f32.mrf.mxu3 }
 0x2f5   : > { %v2255_v0 = vmov 128.0  }
 0x2fc   : > { %v1008_v1 = vpop.f32.mrf.mxu3 }
 0x2fd   : > { %v1012_v2 = vmul.f32 0.17677669, %v1008_v1  ;;  %v1837_v1 = vld [vmem:[#allocation6 + $0x70] sm:$0xf] }
 0x2ff   : > { %v1013_v3 = vadd.f32 %v2040_v32, %v1012_v2  ;;  %v1956_v2 = vld [vmem:[#allocation6 + $0x74] sm:$0xf0] }
 0x301   : > { %v1014_v4 = vsel %vm801_vm2, %v1013_v3, -inf }
 0x302   : > { %1015 = vmax.xlane.f32.xlu0 %v1014_v4  ;;  %v1838_v4 = vor.u32 %v1956_v2, %v1837_v1 }
 0x304   : > { %v1010_v5 = vpop.f32.mrf.mxu3 }
 0x305   : > { %v1839_v5 = vld [vmem:[#allocation6 + $0x78] sm:$0xf0] }
 0x316   : > { %954 = vrot.lane.b32.xlu0 %v2567_v26, %s2252_s16 }
 0x35d   : > { %v943_v6 = vpop.xlane.xlu1 %942 }
 0x35e   : > { %v944_v7 = vsub.f32 %v940_v56, %v943_v6 }
 0x360   : > { %v945_v8 = vmul.f32 1.442695, %v944_v7 }
 0x362   : > { %2051 = vpow2.f32 %v945_v8 }
 0x365   : > { %v870_v9 = vpop.xlane.xlu2 %869 }
 0x366   : > { %v871_v10 = vsub.f32 %v867_v61, %v870_v9 }
 0x368   : > { %v2052_v11 = vpop.eup %2051  ;;  %v872_v12 = vmul.f32 1.442695, %v871_v10 }
 0x369   : > { %v947_v13 = vsel %vm801_vm2, %v2052_v11, 0.0 }
 0x36a   : > { %2053 = vpow2.f32 %v872_v12  ;;  %948 = vadd.xlane.f32.xlu1 %v947_v13 }
 0x370   : > { %v2054_v14 = vpop.eup %2053 }
 0x371   : > { %v874_v15 = vsel %vm801_vm2, %v2054_v14, 0.0 }
 0x372   : > { %875 = vadd.xlane.f32.xlu2 %v874_v15 }
 0x375   : > { %v1016_v16 = vpop.xlane.xlu0 %1015 }
 0x376   : > { %v1017_v17 = vsub.f32 %v1013_v3, %v1016_v16  ;;  %v1955_v3 = vld [vmem:[#allocation6 + $0x74] sm:$0xf]  ;;  %v1829_v16 = vld [vmem:[#allocation6 + $0x60] sm:$0xf] }
 0x377   : > { %v1842_v6 = vor.u32 %v1955_v3, %v1839_v5 }
 0x378   : > { %v1018_v18 = vmul.f32 1.442695, %v1017_v17  ;;  %v1954_v17 = vld [vmem:[#allocation6 + $0x64] sm:$0xf0] }
 0x379   : > { %1291 = vmatpush.bf16.msra.mxu3 %v1842_v6 }
 0x37a   : > { %2055 = vpow2.f32 %v1018_v18  ;;  %v1953_v18 = vld [vmem:[#allocation6 + $0x64] sm:$0xf] }
 0x380   : > { %v2056_v19 = vpop.eup %2055 }
 0x381   : > { %v1020_v20 = vsel %vm801_vm2, %v2056_v19, 0.0 }
 0x382   : > { %1021 = vadd.xlane.f32.xlu1 %v1020_v20  ;;  %v1831_v20 = vld [vmem:[#allocation6 + $0x68] sm:$0xf0] }
 0x388   : > { %v955_v21 = vpop.permute.xlu0 %954 }
 0x389   : > { %v960_v22 = vsel %vm817_vm1, %v955_v21, 0  ;;  %v1834_v21 = vor.u32 %v1953_v18, %v1831_v20  ;;  %v1961_v18 = vld [vmem:[#allocation8 + $0x20] sm:$0xff]  ;;  %v1968_v20 = vld [vmem:[#allocation8 + $0x58] sm:$0xff] }
 0x38a   : > { %881 = vrot.lane.b32.xlu2 %v2567_v26, %s2253_s20  ;;  %969 = vmatpush.bf16.msra.mxu2 %v960_v22  ;;  %v1821_v22 = vld [vmem:[#allocation6 + $0x50] sm:$0xf] }
 0x38b   : > { %1292 = vmatpush.bf16.msra.mxu3 %v1834_v21  ;;  %v1959_v21 = vld [vmem:[#allocation8 + $0x10] sm:$0xff] }
 0x38e   : > { %1278 = vmatpush.bf16.msrb.mxu2 %v1838_v4 }
 0x39b   : > { %1027 = vrot.lane.b32.xlu1 %v2567_v26, %s2254_s23 }
 0x3dd   : > { %v949_v23 = vpop.xlane.xlu1 %948 }
 0x3de   : > { %2057 = vrcp.f32 %v949_v23  ;;  %v1952_v23 = vld [vmem:[#allocation6 + $0x54] sm:$0xf0] }
 0x3e4   : > { %v2058_v24 = vpop.eup %2057 }
 0x3e5   : > { %v951_v25 = vmul.f32 %v2058_v24, %v2052_v11  ;;  %v876_v27 = vpop.xlane.xlu2 %875  ;;  %v1951_v24 = vld [vmem:[#allocation6 + $0x54] sm:$0xf] }
 0x3e6   : > { %2059 = vrcp.f32 %v876_v27  ;;  %v1823_v27 = vld [vmem:[#allocation6 + $0x58] sm:$0xf0] }
 0x3e7   : > { %v952_v28 = vpack.c.bf16 %v951_v25, %v951_v25  ;;  %v1822_v25 = vor.u32 %v1952_v23, %v1821_v22  ;;  %v1967_v22 = vld [vmem:[#allocation8 + $0x50] sm:$0xff]  ;;  %v1958_v23 = vld [vmem:[#allocation8 + $0x8] sm:$0xff] }
 0x3e9   : > { %1744 = vmatmul.msk.bf16.vlgmr.msra.gmra.mxu2 %vm801_vm2, %v952_v28  ;;  %v1826_v28 = vor.u32 %v1951_v24, %v1823_v27  ;;  %v1966_v24 = vld [vmem:[#allocation8 + $0x48] sm:$0xff]  ;;  %v1965_v27 = vld [vmem:[#allocation8 + $0x40] sm:$0xff] }
 0x3eb   : > { %1293 = vmatpush.bf16.msra.mxu3 %v1826_v28  ;;  %v1192_v28 = vld [vmem:[%s2652_s9] sm:$0x3] }
 0x3ec   : > { %v2060_v29 = vpop.eup %2059 }
 0x3ed   : > { %v878_v30 = vmul.f32 %v2060_v29, %v2054_v14  ;;  %v882_v31 = vpop.permute.xlu2 %881  ;;  %v1813_v29 = vld [vmem:[#allocation6 + $0x40] sm:$0xf] }
 0x3ee   : > { %v887_v32 = vsel %vm817_vm1, %v882_v31, 0  ;;  %v1949_v31 = vld [vmem:[#allocation6 + $0x44] sm:$0xf] }
 0x3ef   : > { %896 = vmatpush.bf16.msrb.mxu0 %v887_v32  ;;  %v879_v33 = vpack.c.bf16 %v878_v30, %v878_v30  ;;  %v1950_v30 = vld [vmem:[#allocation6 + $0x44] sm:$0xf0] }
 0x3f0   : > { %v1814_v32 = vor.u32 %v1950_v30, %v1813_v29  ;;  %v1194_v29 = vperm.slane %v1192_v28, 0  ;;  %v1195_v30 = vperm.slane %v1192_v28, 1 }
 0x3f2   : > { %1742 = vmatmul.msk.bf16.vlgmr.msrb.gmra.mxu0 %vm801_vm2, %v879_v33  ;;  %v1815_v33 = vld [vmem:[#allocation6 + $0x48] sm:$0xf0] }
 0x3f5   : > { %v1022_v34 = vpop.xlane.xlu1 %1021 }
 0x3f6   : > { %2061 = vrcp.f32 %v1022_v34  ;;  %v1818_v34 = vor.u32 %v1949_v31, %v1815_v33 }
 0x3f7   : > { %2063 = vrcp.f32 %v2255_v0  ;;  %v1971_v0 = vld [vmem:[#allocation8 + $0x70] sm:$0xff] }
 0x3f8   : > { %1294 = vmatpush.bf16.msra.mxu3 %v1818_v34 }
 0x3fc   : > { %v2062_v26 = vpop.eup %2061 }
 0x3fd   : > { %v1024_v35 = vmul.f32 %v2062_v26, %v2056_v19  ;;  %v2064_v7 = vpop.eup %2063  ;;  %v1830_v19 = vor.u32 %v1954_v17, %v1829_v16  ;;  %v1805_v26 = vld [vmem:[#allocation6 + $0x30] sm:$0xf]  ;;  %v1962_v16 = vld [vmem:[#allocation8 + $0x28] sm:$0xff] }
 0x3fe   : > { %v1143_v8 = vmul.f32 128.0, %v2064_v7  ;;  %vm1147_vm6 = vweird.f32 %v2064_v7  ;;  %v1970_v17 = vld [vmem:[#allocation8 + $0x68] sm:$0xff] }
 0x3ff   : > { %v1025_v38 = vpack.c.bf16 %v1024_v35, %v1024_v35  ;;  %1279 = vmatpush.bf16.msrb.mxu2 %v1830_v19  ;;  %v1948_v35 = vld [vmem:[#allocation6 + $0x34] sm:$0xf0]  ;;  %v1969_v19 = vld [vmem:[#allocation8 + $0x60] sm:$0xff] }
 0x400   : > { %v1144_v9 = vsub.f32 1.0, %v1143_v8  ;;  %v2042_v8 = vld [vmem:[%s2649_s6] ss:$0 sm:$0xff] }
 0x402   : > { %v1145_v10 = vmul.f32 %v2064_v7, %v1144_v9 }
 0x403   : > { %1280 = vmatpush.bf16.msrb.mxu2 %v1822_v25  ;;  %v1957_v25 = vld [vmem:[#allocation8] sm:$0xff] }
 0x404   : > { %v1146_v11 = vadd.f32 %v2064_v7, %v1145_v10 }
 0x406   : > { %v2607_v12 = vsel %vm1147_vm6, %v2064_v7, %v1146_v11  ;;  %v2043_v11 = vld [vmem:[%s2650_s7] ss:$0 sm:$0xff] }
 0x407   : > { %1281 = vmatpush.bf16.msrb.mxu2 %v1814_v32 }
 0x40d   : > { %v1028_v36 = vpop.permute.xlu1 %1027 }
 0x40e   : > { %v1033_v37 = vsel %vm817_vm1, %v1028_v36, 0  ;;  %v1947_v36 = vld [vmem:[#allocation6 + $0x34] sm:$0xf] }
 0x40f   : > { %1042 = vmatpush.bf16.msra.mxu0 %v1033_v37  ;;  %v1806_v37 = vor.u32 %v1948_v35, %v1805_v26 }
 0x411   : > { %1282 = vmatpush.bf16.msrb.mxu2 %v1806_v37 }
 0x412   : > { %1746 = vmatmul.msk.bf16.vlgmr.msra.gmra.mxu0 %vm801_vm2, %v1025_v38  ;;  %v1807_v38 = vld [vmem:[#allocation6 + $0x38] sm:$0xf0] }
 0x46c   : > { %v971_v39 = vpop.f32.mrf.mxu2 }
 0x46f   : > { %v898_v40 = vpop.f32.mrf.mxu0 }
 0x470   : > { %903 = vrot.lane.b32.xlu2 %v898_v40, %s2254_s23  ;;  %v1797_v40 = vld [vmem:[#allocation6 + $0x20] sm:$0xf] }
 0x474   : > { %v973_v41 = vpop.f32.mrf.mxu2 }
 0x475   : > { %v1946_v41 = vld [vmem:[#allocation6 + $0x24] sm:$0xf0] }
 0x477   : > { %v900_v42 = vpop.f32.mrf.mxu0 }
 0x478   : > { %976 = vrot.lane.b32.xlu2 %v971_v39, %s2252_s16  ;;  %v1810_v39 = vor.u32 %v1947_v36, %v1807_v38  ;;  %v1945_v42 = vld [vmem:[#allocation6 + $0x24] sm:$0xf] }
 0x47a   : > { %1295 = vmatpush.bf16.msra.mxu3 %v1810_v39 }
 0x48f   : > { %v1044_v43 = vpop.f32.mrf.mxu0 }
 0x490   : > { %1049 = vrot.lane.b32.xlu0 %v1044_v43, %s2253_s20  ;;  %v1798_v43 = vor.u32 %v1946_v41, %v1797_v40  ;;  %s555_s20 = scalar_lea.vmem %s2657_s14, %s1641_s4 }
 0x492   : > { %1283 = vmatpush.bf16.msrb.mxu2 %v1798_v43 }
 0x496   : > { %1284 = vmatpush.bf16.msrb.mxu2 %v1790_v49 }
 0x497   : > { %v1046_v44 = vpop.f32.mrf.mxu0 }
 0x498   : > { %v1799_v44 = vld [vmem:[#allocation6 + $0x28] sm:$0xf0] }
 0x499   : > { %v1802_v45 = vor.u32 %v1945_v42, %v1799_v44 }
 0x49b   : > { %1296 = vmatpush.bf16.msra.mxu3 %v1802_v45 }
 0x49f   : > { %1297 = vmatpush.bf16.msra.mxu3 %v1794_v53 }
 0x4ca   : > { %v904_v51 = vpop.permute.xlu2 %903 }
 0x4cb   : > { %907 = vst.msk [vmem:[#allocation3] sm:$0xff] %vm906_vm3, %v904_v51  ;;  %v1781_v51 = vld [vmem:[#allocation6] sm:$0xf] }
 0x4d2   : > { %v977_v52 = vpop.permute.xlu2 %976 }
 0x4d3   : > { %980 = vst.msk [vmem:[#allocation3] sm:$0xff] %vm979_vm4, %v977_v52  ;;  %v1942_v52 = vld [vmem:[#allocation6 + $0x4] sm:$0xf0] }
 0x502   : > { %v1050_v55 = vpop.permute.xlu0 %1049 }
 0x503   : > { %1053 = vst.msk [vmem:[#allocation3] sm:$0xff] %vm1052_vm5, %v1050_v55  ;;  %v1783_v55 = vld [vmem:[#allocation6 + $0x8] sm:$0xf0] }
 0x50a   : > { %v1054_v56 = vld [vmem:[#allocation3] sm:$0xff] }
 0x50b   : > { %v1071_v57 = vpack.c.bf16 %v1054_v56, %v1054_v56  ;;  %v1782_v56 = vor.u32 %v1942_v52, %v1781_v51 }
 0x50d   : > { %1132 = vmatmul.bf16.vlgmr.msrb.gmra.mxu1 %v1071_v57  ;;  %v1786_v57 = vor.u32 %v1941_v54, %v1783_v55  ;;  %1285 = vmatpush.bf16.msrb.mxu2 %v1782_v56  ;;  %v2044_v56 = vld [vmem:[%s2654_s11] ss:$0 sm:$0xff] }
 0x50f   : > { %1298 = vmatpush.bf16.msra.mxu3 %v1786_v57 }
 0x58a   : > { %v1133_v59 = vpop.f32.mrf.mxu1 }
 0x58b   : > { %v1134_v60 = vadd.f32 %v2041_v58, %v1133_v59  ;;  %v1964_v58 = vld [vmem:[#allocation8 + $0x38] sm:$0xff] }
 0x58c   : > { %v1972_v59 = vld [vmem:[#allocation8 + $0x78] sm:$0xff]  ;;  %1456 = vmatpush.bf16.msrb.mxu0 %v1964_v58 }
 0x58d   : > { %v1137_v61 = vadd.f32 %v1134_v60, %v2531_v62  ;;  %1469 = vmatpush.bf16.msra.mxu1 %v1972_v59 }
 0x58f   : > { %1140 = vadd.xlane.f32.xlu2 %v1137_v61 }
 0x591   : > { %1470 = vmatpush.bf16.msra.mxu1 %v1971_v0 }
 0x592   : > { %v1135_v63 = vpop.f32.mrf.mxu1 }
 0x593   : > { %v1963_v63 = vld [vmem:[#allocation8 + $0x30] sm:$0xff] }
 0x594   : > { %1457 = vmatpush.bf16.msrb.mxu0 %v1963_v63 }
 0x595   : > { %1471 = vmatpush.bf16.msra.mxu1 %v1970_v17  ;;  %v2046_v17 = vld [vmem:[#allocation11] ss:$0 sm:$0xff] }
 0x598   : > { %1458 = vmatpush.bf16.msrb.mxu0 %v1962_v16 }
 0x599   : > { %1472 = vmatpush.bf16.msra.mxu1 %v1969_v19 }
 0x59c   : > { %1459 = vmatpush.bf16.msrb.mxu0 %v1961_v18 }
 0x59d   : > { %1473 = vmatpush.bf16.msra.mxu1 %v1968_v20 }
 0x5a1   : > { %1474 = vmatpush.bf16.msra.mxu1 %v1967_v22 }
 0x5a5   : > { %1475 = vmatpush.bf16.msra.mxu1 %v1966_v24 }
 0x5a9   : > { %1476 = vmatpush.bf16.msra.mxu1 %v1965_v27 }
 0x602   : > { %v1141_v62 = vpop.xlane.xlu2 %1140 }
 0x603   : > { %v1149_v13 = vmul.f32 %v2607_v12, %v1141_v62 }
 0x605   : > { %v2610_v14 = vsub.f32 %v1137_v61, %v1149_v13 }
 0x607   : > { %v1151_v15 = vmul.f32 %v2610_v14, %v2610_v14 }
 0x609   : > { %1152 = vadd.xlane.f32.xlu0 %v1151_v15 }
 0x67c   : > { %v1153_v60 = vpop.xlane.xlu0 %1152 }
 0x67d   : > { %v1154_v61 = vmul.f32 %v1153_v60, %v2607_v12 }
 0x67f   : > { %v1155_v1 = vadd.f32 1e-12, %v1154_v61 }
 0x681   : > { %2065 = vrsqrt.f32 %v1155_v1  ;;  %vm1162_vm8 = vweird.f32 %v1155_v1 }
 0x687   : > { %v2066_v2 = vpop.eup %2065 }
 0x688   : > { %v1157_v3 = vmul.f32 %v2066_v2, %v1155_v1  ;;  %vm1163_vm7 = vweird.f32 %v2066_v2 }
 0x689   : > { %vm1164_vm9 = vmor %vm1162_vm8, %vm1163_vm7 }
 0x68a   : > { %v1158_v4 = vmul.f32 %v2066_v2, %v1157_v3 }
 0x68c   : > { %v1159_v5 = vmul.f32 0.5, %v1158_v4 }
 0x68e   : > { %v1160_v6 = vsub.f32 1.5, %v1159_v5 }
 0x690   : > { %v1161_v7 = vmul.f32 %v2066_v2, %v1160_v6 }
 0x692   : > { %v1165_v9 = vsel %vm1164_vm9, %v2066_v2, %v1161_v7 }
 0x693   : > { %v1166_v10 = vmul.f32 %v1165_v9, %v2610_v14  ;;  %v1960_v14 = vld [vmem:[#allocation8 + $0x18] sm:$0xff] }
 0x694   : > { %1460 = vmatpush.bf16.msrb.mxu0 %v1960_v14 }
 0x695   : > { %v1170_v62 = vmul.f32 %v2042_v8, %v1166_v10 }
 0x697   : > { %v2622_v13 = vadd.f32 %v2043_v11, %v1170_v62 }
 0x698   : > { %1461 = vmatpush.bf16.msrb.mxu0 %v1959_v21 }
 0x699   : > { %v1191_v15 = vpack.c.bf16 %v2622_v13, %v2622_v13 }
 0x69b   : > { %1286 = vmatmul.bf16.vlgmr.msrb.gmra.mxu2 %v1191_v15  ;;  %1299 = vmatmul.bf16.vlgmr.msra.gmra.mxu3 %v1191_v15  ;;  %v2045_v15 = vld [vmem:[#allocation9] ss:$0 sm:$0xff] }
 0x69c   : > { %1462 = vmatpush.bf16.msrb.mxu0 %v1958_v23 }
 0x6a0   : > { %1463 = vmatpush.bf16.msrb.mxu0 %v1957_v25 }
 0x71e   : > { %v1287_v31 = vpop.f32.mrf.mxu2  ;;  %v1300_v32 = vpop.f32.mrf.mxu3 }
 0x71f   : > { %v1288_v33 = vadd.f32 %v1287_v31, %v1194_v29  ;;  %v1301_v34 = vadd.f32 %v1300_v32, %v1195_v30 }
 0x721   : > { %v1306_v26 = vmul.f32 0.044715, %v1288_v33  ;;  %v1307_v35 = vmul.f32 0.044715, %v1301_v34  ;;  %v1304_v48 = vmul.f32 0.5, %v1288_v33  ;;  %v1305_v50 = vmul.f32 0.5, %v1301_v34 }
 0x723   : > { %v1308_v36 = vmul.f32 %v1306_v26, %v1288_v33  ;;  %v1309_v37 = vmul.f32 %v1307_v35, %v1301_v34 }
 0x725   : > { %v1310_v38 = vmul.f32 %v1308_v36, %v1288_v33  ;;  %v1311_v39 = vmul.f32 %v1309_v37, %v1301_v34 }
 0x726   : > { %v1289_v40 = vpop.f32.mrf.mxu2  ;;  %v1302_v41 = vpop.f32.mrf.mxu3 }
 0x727   : > { %v1312_v42 = vadd.f32 %v1310_v38, %v1288_v33  ;;  %v1313_v43 = vadd.f32 %v1311_v39, %v1301_v34 }
 0x729   : > { %v1314_v44 = vmul.f32 0.7978846, %v1312_v42  ;;  %v1315_v45 = vmul.f32 0.7978846, %v1313_v43 }
 0x72b   : > { %2067 = vtanh.f32 %v1314_v44 }
 0x72c   : > { %2069 = vtanh.f32 %v1315_v45 }
 0x731   : > { %v2068_v46 = vpop.eup %2067 }
 0x732   : > { %v2070_v47 = vpop.eup %2069  ;;  %v1318_v49 = vadd.f32 1.0, %v2068_v46 }
 0x733   : > { %v1319_v51 = vadd.f32 1.0, %v2070_v47 }
 0x734   : > { %v1320_v52 = vmul.f32 %v1318_v49, %v1304_v48 }
 0x735   : > { %v1321_v53 = vmul.f32 %v1319_v51, %v1305_v50 }
 0x736   : > { %v1354_v54 = vpack.c.bf16 %v1320_v52, %v1320_v52 }
 0x737   : > { %v1355_v55 = vpack.c.bf16 %v1321_v53, %v1321_v53 }
 0x738   : > { %1464 = vmatmul.bf16.vlgmr.msrb.gmra.mxu0 %v1354_v54 }
 0x739   : > { %1477 = vmatmul.bf16.vlgmr.msra.gmra.mxu1 %v1355_v55 }
 0x7b5   : > { %v1465_v57 = vpop.f32.mrf.mxu0 }
 0x7b6   : > { %v1466_v58 = vadd.f32 %v2044_v56, %v1465_v57  ;;  %v1478_v59 = vpop.f32.mrf.mxu1 }
 0x7b8   : > { %v1479_v60 = vadd.f32 %v1478_v59, %v1466_v58 }
 0x7ba   : > { %v1482_v61 = vadd.f32 %v1479_v60, %v2622_v13 }
 0x7bc   : > { %1485 = vadd.xlane.f32.xlu1 %v1482_v61 }
 0x7bd   : > { %v1467_v63 = vpop.f32.mrf.mxu0 }
 0x7be   : > { %v1480_v0 = vpop.f32.mrf.mxu1 }
 0x82f   : > { %v1486_v1 = vpop.xlane.xlu1 %1485 }
 0x830   : > { %v1487_v2 = vmul.f32 %v1486_v1, %v2607_v12 }
 0x832   : > { %v1488_v3 = vsub.f32 %v1482_v61, %v1487_v2 }
 0x834   : > { %v1489_v4 = vmul.f32 %v1488_v3, %v1488_v3 }
 0x836   : > { %1490 = vadd.xlane.f32.xlu2 %v1489_v4 }
 0x8a9   : > { %v1491_v5 = vpop.xlane.xlu2 %1490 }
 0x8aa   : > { %v1492_v6 = vmul.f32 %v1491_v5, %v2607_v12 }
 0x8ac   : > { %v1493_v7 = vadd.f32 1e-12, %v1492_v6 }
 0x8ae   : > { %2071 = vrsqrt.f32 %v1493_v7  ;;  %vm1500_vm11 = vweird.f32 %v1493_v7 }
 0x8b4   : > { %v2072_v8 = vpop.eup %2071 }
 0x8b5   : > { %v1495_v9 = vmul.f32 %v2072_v8, %v1493_v7  ;;  %vm1501_vm10 = vweird.f32 %v2072_v8 }
 0x8b6   : > { %vm1502_vm12 = vmor %vm1500_vm11, %vm1501_vm10 }
 0x8b7   : > { %v1496_v10 = vmul.f32 %v2072_v8, %v1495_v9 }
 0x8b9   : > { %v1497_v11 = vmul.f32 0.5, %v1496_v10 }
 0x8bb   : > { %v1498_v62 = vsub.f32 1.5, %v1497_v11 }
 0x8bd   : > { %v1499_v13 = vmul.f32 %v2072_v8, %v1498_v62 }
 0x8bf   : > { %v1503_v16 = vsel %vm1502_vm12, %v2072_v8, %v1499_v13 }
 0x8c0   : > { %v1504_v18 = vmul.f32 %v1503_v16, %v1488_v3 }
 0x8c2   : > { %v1508_v19 = vmul.f32 %v2045_v15, %v1504_v18 }
 0x8c4   : > { %v1512_v12 = vadd.f32 %v2046_v17, %v1508_v19 }
 0x8c6   : > { %1513 = vst [vmem:[%s555_s20] sm:$0xff] %v1512_v12 }
 0x8c7 PF: > { %s2668_s23 = sld [smem:[#allocation15_spill]] }
 0x8cd   : > { %s27_s29 = sadd.s32 1, %s2668_s23  }
 0x8ce   : > { %p24_p7 = scmp.ge.s32.totalorder %s27_s29, 4  }
 0x8d0   :  { %26 = sbr.rel (!%p24_p7) target bundleno = 7 (0x7), region = 130 }
 0x8d5   :  { %1533 = vsyncpa [#allocation5], 1 }
 0x8d6   :  { %1535 = vsyncpa [#allocation5 + $0x1], 1 }
 0x8d7   :  { %1536 = vsyncpa [#allocation7], 1 }
 0x8d8   :  { %1537 = vsyncpa [#allocation10], 1 }

</bundles_post_ra>
